<compile_context>
chip_gen: v7x
topology: tpu7x:2x2x1
jax: 0.10.0
libtpu: 0.0.40
codegen_flags: <defaults>
</compile_context>

<pallas_src>
import functools

import jax
import jax.numpy as jnp
from jax import lax
from jax.experimental import pallas as pl
from jax.experimental.pallas import tpu as pltpu


# Contract over axis 0 of both operands: feeds the MXU with N as the
# contracting dim directly (no transpose materialization).
_CONTRACT_AXIS0 = (((0,), (0,)), ((), ()))


def _eye(n, dtype):
    r = lax.broadcasted_iota(jnp.int32, (n, n), 0)
    c = lax.broadcasted_iota(jnp.int32, (n, n), 1)
    return (r == c).astype(dtype)


def _round_up(x, m):
    return (x + m - 1) // m * m


def cov_kernel(u_ref, v_ref, suu_ref, svv_ref, suv_ref,
               acc_uu, acc_vv, acc_uv, acc_su, acc_sv, *, n_real):
    """Streaming one-pass moment accumulation + in-kernel covariance finalize."""
    i = pl.program_id(0)

    @pl.when(i == 0)
    def _init():
        acc_uu[...] = jnp.zeros_like(acc_uu)
        acc_vv[...] = jnp.zeros_like(acc_vv)
        acc_uv[...] = jnp.zeros_like(acc_uv)
        acc_su[...] = jnp.zeros_like(acc_su)
        acc_sv[...] = jnp.zeros_like(acc_sv)

    u = u_ref[...]                                   # (TILE_N, d_u)
    v = v_ref[...]                                   # (TILE_N, d_v)
    ones = jnp.ones((u.shape[0], 1), jnp.float32)    # column sums on the MXU

    acc_uu[...] += lax.dot_general(u, u, _CONTRACT_AXIS0,
                                   preferred_element_type=jnp.float32)
    acc_vv[...] += lax.dot_general(v, v, _CONTRACT_AXIS0,
                                   preferred_element_type=jnp.float32)
    acc_uv[...] += lax.dot_general(u, v, _CONTRACT_AXIS0,
                                   preferred_element_type=jnp.float32)
    acc_su[...] += lax.dot_general(ones, u, _CONTRACT_AXIS0,
                                   preferred_element_type=jnp.float32)   # (1, d_u)
    acc_sv[...] += lax.dot_general(ones, v, _CONTRACT_AXIS0,
                                   preferred_element_type=jnp.float32)   # (1, d_v)

    @pl.when(i == pl.num_programs(0) - 1)
    def _finalize():
        n = float(n_real)
        inv_nm1 = 1.0 / float(n_real - 1)
        su = acc_su[...]                              # (1, d_u)
        sv = acc_sv[...]                              # (1, d_v)
        # sum_x^T sum_x / N mean-corrections as tiny K=1 outer products.
        corr_uu = lax.dot_general(su, su, _CONTRACT_AXIS0,
                                  preferred_element_type=jnp.float32) / n
        corr_vv = lax.dot_general(sv, sv, _CONTRACT_AXIS0,
                                  preferred_element_type=jnp.float32) / n
        corr_uv = lax.dot_general(su, sv, _CONTRACT_AXIS0,
                                  preferred_element_type=jnp.float32) / n
        d_u = suu_ref.shape[0]
        d_v = svv_ref.shape[0]
        suu_ref[...] = ((acc_uu[...] - corr_uu) * inv_nm1
                        + 0.001 * _eye(d_u, jnp.float32))
        svv_ref[...] = ((acc_vv[...] - corr_vv) * inv_nm1
                        + 0.001 * _eye(d_v, jnp.float32))
        suv_ref[...] = (acc_uv[...] - corr_uv) * inv_nm1


def _covariances(u, v, tile_n):
    n, d_u = u.shape
    _, d_v = v.shape
    tile_n = max(8, _round_up(min(tile_n, n), 8))
    n_pad = _round_up(n, tile_n)
    if n_pad != n:
        # Zero rows contribute nothing to sums / Gram matrices; finalize uses
        # the real N.
        u = jnp.pad(u, ((0, n_pad - n), (0, 0)))
        v = jnp.pad(v, ((0, n_pad - n), (0, 0)))
    num_tiles = n_pad // tile_n

    kernel = functools.partial(cov_kernel, n_real=n)
    return pl.pallas_call(
        kernel,
        out_shape=(
            jax.ShapeDtypeStruct((d_u, d_u), jnp.float32),
            jax.ShapeDtypeStruct((d_v, d_v), jnp.float32),
            jax.ShapeDtypeStruct((d_u, d_v), jnp.float32),
        ),
        grid=(num_tiles,),
        in_specs=[
            pl.BlockSpec((tile_n, d_u), lambda i: (i, 0)),
            pl.BlockSpec((tile_n, d_v), lambda i: (i, 0)),
        ],
        out_specs=(
            pl.BlockSpec((d_u, d_u), lambda i: (0, 0)),   # resident across grid
            pl.BlockSpec((d_v, d_v), lambda i: (0, 0)),
            pl.BlockSpec((d_u, d_v), lambda i: (0, 0)),
        ),
        scratch_shapes=[
            pltpu.VMEM((d_u, d_u), jnp.float32),   # acc u^T u
            pltpu.VMEM((d_v, d_v), jnp.float32),   # acc v^T v
            pltpu.VMEM((d_u, d_v), jnp.float32),   # acc u^T v
            pltpu.VMEM((1, d_u), jnp.float32),     # acc sum(u)
            pltpu.VMEM((1, d_v), jnp.float32),     # acc sum(v)
        ],
        compiler_params=pltpu.CompilerParams(
            dimension_semantics=("arbitrary",)),
    )(u, v)


def _spd_cond(a):
    """2-norm condition number of a symmetric (S)PD matrix (== torch.linalg.cond)."""
    w = jnp.abs(jnp.linalg.eigvalsh(a))
    return jnp.max(w) / jnp.min(w)


@functools.partial(jax.jit, static_argnames=("tile_n",))
def dcca_loss(u, v, tile_n=512):
    n = u.shape[0]
    assert n >= 2, "DCCA loss requires N >= 2 (divides by N - 1)."
    u = u.astype(jnp.float32)
    v = v.astype(jnp.float32)

    # ---- Pallas kernel: streaming covariance pass (+ 0.001*I reg) ----
    suu, svv, suv = _covariances(u, v, tile_n)

    # ---- Plain-JAX glue: tiny d x d linear algebra ----
    # TODO(synk): torch.linalg.cond / torch.linalg.inv (SVD / LU) have no clean
    # Pallas TPU equivalent; use eigvalsh-based SPD condition numbers and
    # Cholesky solves (Suu/Svv are SPD after +0.001*I) instead of explicit
    # inverses.
    cond_u = _spd_cond(suu)
    cond_v = _spd_cond(svv)

    cf_u = jax.scipy.linalg.cho_factor(suu)
    cf_v = jax.scipy.linalg.cho_factor(svv)
    a = jax.scipy.linalg.cho_solve(cf_u, suv)        # inv(Suu) @ Suv
    t = jax.scipy.linalg.cho_solve(cf_v, a.T).T      # (inv(Suu) @ Suv) @ inv(Svv)
    loss = -jnp.sum(t * t)                           # == -trace(T @ T^T)
    return loss, cond_u, cond_v


def dcca_loss_ref(u, v):
    """Pure-JAX reference mirroring the PyTorch forward."""
    u = u.astype(jnp.float32)
    v = v.astype(jnp.float32)
    n = u.shape[0]
    uc = u - jnp.mean(u, axis=0)
    vc = v - jnp.mean(v, axis=0)
    suu = uc.T @ uc / (n - 1) + 0.001 * jnp.eye(u.shape[1], dtype=jnp.float32)
    svv = vc.T @ vc / (n - 1) + 0.001 * jnp.eye(v.shape[1], dtype=jnp.float32)
    suv = uc.T @ vc / (n - 1)
    t = jnp.linalg.inv(suu) @ suv @ jnp.linalg.inv(svv)
    return -jnp.trace(t @ t.T)


if __name__ == "__main__":
    key = jax.random.PRNGKey(0)
    ku, kv = jax.random.split(key)
    # N > d_u, d_v so the sample covariances are well conditioned (like a real
    # DCCA batch); tile_n=32 exercises the 4-step tiled moment accumulation.
    N, d_u, d_v = 128, 32, 16
    u = jax.random.normal(ku, (N, d_u), dtype=jnp.float32)
    v = jax.random.normal(kv, (N, d_v), dtype=jnp.float32)

    loss, cond_u, cond_v = dcca_loss(u, v, tile_n=32)
    loss = jax.block_until_ready(loss)
    cond_u = float(jax.block_until_ready(cond_u))
    cond_v = float(jax.block_until_ready(cond_v))
    if cond_u > 1e10 or cond_v > 1e10:
        print("high condition values are detected. Increase reg!")

    ref = jax.block_until_ready(dcca_loss_ref(u, v))
    assert jnp.allclose(loss, ref, rtol=2e-3, atol=2e-3), (loss, ref)
    print("KERNEL_OK")
</pallas_src>

<mosaic_0001>
module attributes {stable_mosaic.version = 11 : i64} {
  func.func @cov_kernel(%arg0: i32, %arg1: memref<32x32xf32, #tpu.memory_space<vmem>>, %arg2: memref<32x16xf32, #tpu.memory_space<vmem>>, %arg3: memref<32x32xf32, #tpu.memory_space<vmem>>, %arg4: memref<16x16xf32, #tpu.memory_space<vmem>>, %arg5: memref<32x16xf32, #tpu.memory_space<vmem>>, %arg6: memref<32x32xf32, #tpu.memory_space<vmem>>, %arg7: memref<16x16xf32, #tpu.memory_space<vmem>>, %arg8: memref<32x16xf32, #tpu.memory_space<vmem>>, %arg9: memref<1x32xf32, #tpu.memory_space<vmem>>, %arg10: memref<1x16xf32, #tpu.memory_space<vmem>>) attributes {dimension_semantics = [#tpu.dimension_semantics<arbitrary>], iteration_bounds = array<i64: 4>, scalar_prefetch = 0 : i64, scratch_operands = 5 : i64, tpu.core_type = #tpu.core_type<tc>, window_params = [{transform_indices = @transform_0, window_bounds = array<i64: 32, 32>}, {transform_indices = @transform_1, window_bounds = array<i64: 32, 16>}, {pipeline_mode = #tpu.pipeline_mode<synchronous>, transform_indices = @transform_2, window_bounds = array<i64: 32, 32>}, {pipeline_mode = #tpu.pipeline_mode<synchronous>, transform_indices = @transform_3, window_bounds = array<i64: 16, 16>}, {pipeline_mode = #tpu.pipeline_mode<synchronous>, transform_indices = @transform_4, window_bounds = array<i64: 32, 16>}]} {
    %c0_i32 = arith.constant 0 : i32
    %0 = arith.cmpi eq, %arg0, %c0_i32 : i32
    %1 = arith.extui %0 : i1 to i32
    %c0_i32_0 = arith.constant 0 : i32
    %2 = arith.cmpi ne, %1, %c0_i32_0 : i32
    scf.if %2 {
      %cst_30 = arith.constant 0.000000e+00 : f32
      %29 = vector.broadcast %cst_30 : f32 to vector<32x32xf32>
      %c0_31 = arith.constant 0 : index
      %c0_32 = arith.constant 0 : index
      %30 = vector.load %arg6[%c0_31, %c0_32] : memref<32x32xf32, #tpu.memory_space<vmem>>, vector<32x32xf32>
      tpu.vector_store %arg6[%c0_31, %c0_32], %29 {strides = array<i32>} : memref<32x32xf32, #tpu.memory_space<vmem>>, vector<32x32xf32>,
      %cst_33 = arith.constant 0.000000e+00 : f32
      %31 = vector.broadcast %cst_33 : f32 to vector<16x16xf32>
      %c0_34 = arith.constant 0 : index
      %c0_35 = arith.constant 0 : index
      %32 = vector.load %arg7[%c0_34, %c0_35] : memref<16x16xf32, #tpu.memory_space<vmem>>, vector<16x16xf32>
      tpu.vector_store %arg7[%c0_34, %c0_35], %31 {strides = array<i32>} : memref<16x16xf32, #tpu.memory_space<vmem>>, vector<16x16xf32>,
      %cst_36 = arith.constant 0.000000e+00 : f32
      %33 = vector.broadcast %cst_36 : f32 to vector<32x16xf32>
      %c0_37 = arith.constant 0 : index
      %c0_38 = arith.constant 0 : index
      %34 = vector.load %arg8[%c0_37, %c0_38] : memref<32x16xf32, #tpu.memory_space<vmem>>, vector<32x16xf32>
      tpu.vector_store %arg8[%c0_37, %c0_38], %33 {strides = array<i32>} : memref<32x16xf32, #tpu.memory_space<vmem>>, vector<32x16xf32>,
      %cst_39 = arith.constant 0.000000e+00 : f32
      %35 = vector.broadcast %cst_39 : f32 to vector<1x32xf32>
      %c0_40 = arith.constant 0 : index
      %c0_41 = arith.constant 0 : index
      %36 = vector.load %arg9[%c0_40, %c0_41] : memref<1x32xf32, #tpu.memory_space<vmem>>, vector<1x32xf32>
      tpu.vector_store %arg9[%c0_40, %c0_41], %35 {strides = array<i32>} : memref<1x32xf32, #tpu.memory_space<vmem>>, vector<1x32xf32>,
      %cst_42 = arith.constant 0.000000e+00 : f32
      %37 = vector.broadcast %cst_42 : f32 to vector<1x16xf32>
      %c0_43 = arith.constant 0 : index
      %c0_44 = arith.constant 0 : index
      %38 = vector.load %arg10[%c0_43, %c0_44] : memref<1x16xf32, #tpu.memory_space<vmem>>, vector<1x16xf32>
      tpu.vector_store %arg10[%c0_43, %c0_44], %37 {strides = array<i32>} : memref<1x16xf32, #tpu.memory_space<vmem>>, vector<1x16xf32>,
    } else {
    }
    %c0 = arith.constant 0 : index
    %c0_1 = arith.constant 0 : index
    %3 = vector.load %arg1[%c0, %c0_1] : memref<32x32xf32, #tpu.memory_space<vmem>>, vector<32x32xf32>
    %c0_2 = arith.constant 0 : index
    %c0_3 = arith.constant 0 : index
    %4 = vector.load %arg2[%c0_2, %c0_3] : memref<32x16xf32, #tpu.memory_space<vmem>>, vector<32x16xf32>
    %cst = arith.constant 1.000000e+00 : f32
    %5 = vector.broadcast %cst : f32 to vector<32x1xf32>
    %c0_4 = arith.constant 0 : index
    %c0_5 = arith.constant 0 : index
    %6 = vector.load %arg6[%c0_4, %c0_5] : memref<32x32xf32, #tpu.memory_space<vmem>>, vector<32x32xf32>
    %cst_6 = arith.constant dense<0.000000e+00> : vector<32x32xf32>
    %7 = tpu.matmul %3, %3, %cst_6 {dimension_numbers = #tpu.dot_dimension_numbers<[0], [0], [1], [1], [0, 1, 1, 1], [], []>} : vector<32x32xf32>, vector<32x32xf32>, vector<32x32xf32> -> vector<32x32xf32>
    %8 = arith.addf %6, %7 : vector<32x32xf32>
    %c0_7 = arith.constant 0 : index
    %c0_8 = arith.constant 0 : index
    %9 = vector.load %arg6[%c0_7, %c0_8] : memref<32x32xf32, #tpu.memory_space<vmem>>, vector<32x32xf32>
    tpu.vector_store %arg6[%c0_7, %c0_8], %8 {strides = array<i32>} : memref<32x32xf32, #tpu.memory_space<vmem>>, vector<32x32xf32>,
    %c0_9 = arith.constant 0 : index
    %c0_10 = arith.constant 0 : index
    %10 = vector.load %arg7[%c0_9, %c0_10] : memref<16x16xf32, #tpu.memory_space<vmem>>, vector<16x16xf32>
    %cst_11 = arith.constant dense<0.000000e+00> : vector<16x16xf32>
    %11 = tpu.matmul %4, %4, %cst_11 {dimension_numbers = #tpu.dot_dimension_numbers<[0], [0], [1], [1], [0, 1, 1, 1], [], []>} : vector<32x16xf32>, vector<32x16xf32>, vector<16x16xf32> -> vector<16x16xf32>
    %12 = arith.addf %10, %11 : vector<16x16xf32>
    %c0_12 = arith.constant 0 : index
    %c0_13 = arith.constant 0 : index
    %13 = vector.load %arg7[%c0_12, %c0_13] : memref<16x16xf32, #tpu.memory_space<vmem>>, vector<16x16xf32>
    tpu.vector_store %arg7[%c0_12, %c0_13], %12 {strides = array<i32>} : memref<16x16xf32, #tpu.memory_space<vmem>>, vector<16x16xf32>,
    %c0_14 = arith.constant 0 : index
    %c0_15 = arith.constant 0 : index
    %14 = vector.load %arg8[%c0_14, %c0_15] : memref<32x16xf32, #tpu.memory_space<vmem>>, vector<32x16xf32>
    %cst_16 = arith.constant dense<0.000000e+00> : vector<32x16xf32>
    %15 = tpu.matmul %3, %4, %cst_16 {dimension_numbers = #tpu.dot_dimension_numbers<[0], [0], [1], [1], [0, 1, 1, 1], [], []>} : vector<32x32xf32>, vector<32x16xf32>, vector<32x16xf32> -> vector<32x16xf32>
    %16 = arith.addf %14, %15 : vector<32x16xf32>
    %c0_17 = arith.constant 0 : index
    %c0_18 = arith.constant 0 : index
    %17 = vector.load %arg8[%c0_17, %c0_18] : memref<32x16xf32, #tpu.memory_space<vmem>>, vector<32x16xf32>
    tpu.vector_store %arg8[%c0_17, %c0_18], %16 {strides = array<i32>} : memref<32x16xf32, #tpu.memory_space<vmem>>, vector<32x16xf32>,
    %c0_19 = arith.constant 0 : index
    %c0_20 = arith.constant 0 : index
    %18 = vector.load %arg9[%c0_19, %c0_20] : memref<1x32xf32, #tpu.memory_space<vmem>>, vector<1x32xf32>
    %cst_21 = arith.constant dense<0.000000e+00> : vector<1x32xf32>
    %19 = tpu.matmul %5, %3, %cst_21 {dimension_numbers = #tpu.dot_dimension_numbers<[0], [0], [1], [1], [0, 1, 1, 1], [], []>} : vector<32x1xf32>, vector<32x32xf32>, vector<1x32xf32> -> vector<1x32xf32>
    %20 = arith.addf %18, %19 : vector<1x32xf32>
    %c0_22 = arith.constant 0 : index
    %c0_23 = arith.constant 0 : index
    %21 = vector.load %arg9[%c0_22, %c0_23] : memref<1x32xf32, #tpu.memory_space<vmem>>, vector<1x32xf32>
    tpu.vector_store %arg9[%c0_22, %c0_23], %20 {strides = array<i32>} : memref<1x32xf32, #tpu.memory_space<vmem>>, vector<1x32xf32>,
    %c0_24 = arith.constant 0 : index
    %c0_25 = arith.constant 0 : index
    %22 = vector.load %arg10[%c0_24, %c0_25] : memref<1x16xf32, #tpu.memory_space<vmem>>, vector<1x16xf32>
    %cst_26 = arith.constant dense<0.000000e+00> : vector<1x16xf32>
    %23 = tpu.matmul %5, %4, %cst_26 {dimension_numbers = #tpu.dot_dimension_numbers<[0], [0], [1], [1], [0, 1, 1, 1], [], []>} : vector<32x1xf32>, vector<32x16xf32>, vector<1x16xf32> -> vector<1x16xf32>
    %24 = arith.addf %22, %23 : vector<1x16xf32>
    %c0_27 = arith.constant 0 : index
    %c0_28 = arith.constant 0 : index
    %25 = vector.load %arg10[%c0_27, %c0_28] : memref<1x16xf32, #tpu.memory_space<vmem>>, vector<1x16xf32>
    tpu.vector_store %arg10[%c0_27, %c0_28], %24 {strides = array<i32>} : memref<1x16xf32, #tpu.memory_space<vmem>>, vector<1x16xf32>,
    %c3_i32 = arith.constant 3 : i32
    %26 = arith.cmpi eq, %arg0, %c3_i32 : i32
    %27 = arith.extui %26 : i1 to i32
    %c0_i32_29 = arith.constant 0 : i32
    %28 = arith.cmpi ne, %27, %c0_i32_29 : i32
    scf.if %28 {
      %c0_30 = arith.constant 0 : index
      %c0_31 = arith.constant 0 : index
      %29 = vector.load %arg9[%c0_30, %c0_31] : memref<1x32xf32, #tpu.memory_space<vmem>>, vector<1x32xf32>
      %c0_32 = arith.constant 0 : index
      %c0_33 = arith.constant 0 : index
      %30 = vector.load %arg10[%c0_32, %c0_33] : memref<1x16xf32, #tpu.memory_space<vmem>>, vector<1x16xf32>
      %cst_34 = arith.constant dense<0.000000e+00> : vector<32x32xf32>
      %31 = tpu.matmul %29, %29, %cst_34 {dimension_numbers = #tpu.dot_dimension_numbers<[0], [0], [1], [1], [0, 1, 1, 1], [], []>} : vector<1x32xf32>, vector<1x32xf32>, vector<32x32xf32> -> vector<32x32xf32>
      %cst_35 = arith.constant 1.280000e+02 : f32
      %32 = vector.broadcast %cst_35 : f32 to vector<32x32xf32>
      %33 = arith.divf %31, %32 : vector<32x32xf32>
      %cst_36 = arith.constant dense<0.000000e+00> : vector<16x16xf32>
      %34 = tpu.matmul %30, %30, %cst_36 {dimension_numbers = #tpu.dot_dimension_numbers<[0], [0], [1], [1], [0, 1, 1, 1], [], []>} : vector<1x16xf32>, vector<1x16xf32>, vector<16x16xf32> -> vector<16x16xf32>
      %cst_37 = arith.constant 1.280000e+02 : f32
      %35 = vector.broadcast %cst_37 : f32 to vector<16x16xf32>
      %36 = arith.divf %34, %35 : vector<16x16xf32>
      %cst_38 = arith.constant dense<0.000000e+00> : vector<32x16xf32>
      %37 = tpu.matmul %29, %30, %cst_38 {dimension_numbers = #tpu.dot_dimension_numbers<[0], [0], [1], [1], [0, 1, 1, 1], [], []>} : vector<1x32xf32>, vector<1x16xf32>, vector<32x16xf32> -> vector<32x16xf32>
      %cst_39 = arith.constant 1.280000e+02 : f32
      %38 = vector.broadcast %cst_39 : f32 to vector<32x16xf32>
      %39 = arith.divf %37, %38 : vector<32x16xf32>
      %c0_40 = arith.constant 0 : index
      %c0_41 = arith.constant 0 : index
      %40 = vector.load %arg6[%c0_40, %c0_41] : memref<32x32xf32, #tpu.memory_space<vmem>>, vector<32x32xf32>
      %41 = arith.subf %40, %33 : vector<32x32xf32>
      %cst_42 = arith.constant 0.00787401571 : f32
      %42 = vector.broadcast %cst_42 : f32 to vector<32x32xf32>
      %43 = arith.mulf %41, %42 : vector<32x32xf32>
      %44 = tpu.iota {dimensions = array<i32: 0>} : vector<32x32xi32>
      %45 = tpu.iota {dimensions = array<i32: 1>} : vector<32x32xi32>
      %46 = arith.cmpi eq, %44, %45 : vector<32x32xi32>
      %47 = arith.extui %46 : vector<32x32xi1> to vector<32x32xi32>
      %48 = arith.sitofp %47 : vector<32x32xi32> to vector<32x32xf32>
      %cst_43 = arith.constant 1.000000e-03 : f32
      %49 = vector.broadcast %cst_43 : f32 to vector<32x32xf32>
      %50 = arith.mulf %49, %48 : vector<32x32xf32>
      %51 = arith.addf %43, %50 : vector<32x32xf32>
      %c0_44 = arith.constant 0 : index
      %c0_45 = arith.constant 0 : index
      %52 = vector.load %arg3[%c0_44, %c0_45] : memref<32x32xf32, #tpu.memory_space<vmem>>, vector<32x32xf32>
      tpu.vector_store %arg3[%c0_44, %c0_45], %51 {strides = array<i32>} : memref<32x32xf32, #tpu.memory_space<vmem>>, vector<32x32xf32>,
      %c0_46 = arith.constant 0 : index
      %c0_47 = arith.constant 0 : index
      %53 = vector.load %arg7[%c0_46, %c0_47] : memref<16x16xf32, #tpu.memory_space<vmem>>, vector<16x16xf32>
      %54 = arith.subf %53, %36 : vector<16x16xf32>
      %cst_48 = arith.constant 0.00787401571 : f32
      %55 = vector.broadcast %cst_48 : f32 to vector<16x16xf32>
      %56 = arith.mulf %54, %55 : vector<16x16xf32>
      %57 = tpu.iota {dimensions = array<i32: 0>} : vector<16x16xi32>
      %58 = tpu.iota {dimensions = array<i32: 1>} : vector<16x16xi32>
      %59 = arith.cmpi eq, %57, %58 : vector<16x16xi32>
      %60 = arith.extui %59 : vector<16x16xi1> to vector<16x16xi32>
      %61 = arith.sitofp %60 : vector<16x16xi32> to vector<16x16xf32>
      %cst_49 = arith.constant 1.000000e-03 : f32
      %62 = vector.broadcast %cst_49 : f32 to vector<16x16xf32>
      %63 = arith.mulf %62, %61 : vector<16x16xf32>
      %64 = arith.addf %56, %63 : vector<16x16xf32>
      %c0_50 = arith.constant 0 : index
      %c0_51 = arith.constant 0 : index
      %65 = vector.load %arg4[%c0_50, %c0_51] : memref<16x16xf32, #tpu.memory_space<vmem>>, vector<16x16xf32>
      tpu.vector_store %arg4[%c0_50, %c0_51], %64 {strides = array<i32>} : memref<16x16xf32, #tpu.memory_space<vmem>>, vector<16x16xf32>,
      %c0_52 = arith.constant 0 : index
      %c0_53 = arith.constant 0 : index
      %66 = vector.load %arg8[%c0_52, %c0_53] : memref<32x16xf32, #tpu.memory_space<vmem>>, vector<32x16xf32>
      %67 = arith.subf %66, %39 : vector<32x16xf32>
      %cst_54 = arith.constant 0.00787401571 : f32
      %68 = vector.broadcast %cst_54 : f32 to vector<32x16xf32>
      %69 = arith.mulf %67, %68 : vector<32x16xf32>
      %c0_55 = arith.constant 0 : index
      %c0_56 = arith.constant 0 : index
      %70 = vector.load %arg5[%c0_55, %c0_56] : memref<32x16xf32, #tpu.memory_space<vmem>>, vector<32x16xf32>
      tpu.vector_store %arg5[%c0_55, %c0_56], %69 {strides = array<i32>} : memref<32x16xf32, #tpu.memory_space<vmem>>, vector<32x16xf32>,
    } else {
    }
    return
  }
  func.func @transform_0(%arg0: i32) -> (i32, i32) {
    %c0_i32 = arith.constant 0 : i32
    %c0_i32_0 = arith.constant 0 : i32
    return %arg0, %c0_i32 : i32, i32
  }
  func.func @transform_1(%arg0: i32) -> (i32, i32) {
    %c0_i32 = arith.constant 0 : i32
    %c0_i32_0 = arith.constant 0 : i32
    return %arg0, %c0_i32 : i32, i32
  }
  func.func @transform_2(%arg0: i32) -> (i32, i32) {
    %c0_i32 = arith.constant 0 : i32
    %c0_i32_0 = arith.constant 0 : i32
    %c0_i32_1 = arith.constant 0 : i32
    return %c0_i32, %c0_i32_0 : i32, i32
  }
  func.func @transform_3(%arg0: i32) -> (i32, i32) {
    %c0_i32 = arith.constant 0 : i32
    %c0_i32_0 = arith.constant 0 : i32
    %c0_i32_1 = arith.constant 0 : i32
    return %c0_i32, %c0_i32_0 : i32, i32
  }
  func.func @transform_4(%arg0: i32) -> (i32, i32) {
    %c0_i32 = arith.constant 0 : i32
    %c0_i32_0 = arith.constant 0 : i32
    %c0_i32_1 = arith.constant 0 : i32
    return %c0_i32, %c0_i32_0 : i32, i32
  }
}

</mosaic_0001>

<bundles_post_ra>
// kernel: custom-call.25
= control target key start
LH: loop header
LB: loop body
LE: loop exit
PB: predicated region body
PF: predicated region fallthrough
CT: control target
= control target key end

     0   :  { %11 = vsyncpa [#allocation9], 0  ;;  %s2173_s0 = inlined_call_operand.vmem [shape: f32[8,8], index: 0, kind: input, shape index: {}]   ;;  %s2174_s1 = inlined_call_operand.vmem [shape: f32[8,8], index: 1, kind: input, shape index: {}]   ;;  %s2175_s2 = inlined_call_operand.vmem [shape: f32[8,8], index: 2, kind: input, shape index: {}]   ;;  %s2176_s3 = inlined_call_operand.vmem [shape: f32[8,8], index: 3, kind: input, shape index: {}]   ;;  %s2177_s4 = inlined_call_operand.vmem [shape: f32[8], index: 4, kind: output, shape index: {0}]   ;;  %s2178_s5 = inlined_call_operand.vmem [shape: f32[8], index: 5, kind: output, shape index: {1}]   ;;  %s2179_s6 = inlined_call_operand.hbm [shape: f32[8,8], index: 6, kind: output, shape index: {2}]   ;;  %s2180_s7 = inlined_call_operand.hbm [shape: f32[8,8], index: 7, kind: output, shape index: {3}]   ;;  %s2181_s8 = inlined_call_operand.hbm [shape: f32[8,8], index: 8, kind: output, shape index: {4}]   ;;  %s2182_s9 = inlined_call_operand.hbm [shape: f32[8,8], index: 9, kind: output, shape index: {5}]  }
   0x1   :  { %12 = vsyncpa [#allocation11], 0 }
   0x2   :  { %13 = vsyncpa [#allocation14], 0  ;;  %s1815_s30 = smov [#allocation0]   ;;  %s1819_s12 = smov %s2173_s0  }
   0x3 LB: > { %v61_v0 = vld [vmem:[%s1821_s12] sm:$0xff]  ;;  %s63_s12 = scalar_lea.vmem %s1821_s12, 8   ;;  %s1821_s12 = sphi %s1819_s12, %s63_s12   ;;  %s1817_s30 = sphi %s1815_s30, %s64_s30  }
   0x4   : > { %62 = vst [vmem:[%s1817_s30] sm:$0xff] %v61_v0  ;;  %s64_s30 = scalar_lea.vmem %s1817_s30, 8   ;;  %p58_p0 = scmp.gt.s32.totalorder %s63_s12, %s2173_s0 }
   0x5   :  { %s1823_s15 = smov (%p58_p0), [#allocation1]   ;;  %s1827_s18 = smov (%p58_p0), %s2174_s1  }
   0x6   :  { %60 = sbr.rel (!%p58_p0) target bundleno = 3 (0x3), region = 242 }
   0xd LB: > { %v123_v1 = vld [vmem:[%s1829_s18] sm:$0xff]  ;;  %s125_s18 = scalar_lea.vmem %s1829_s18, 8   ;;  %s1829_s18 = sphi %s1827_s18, %s125_s18   ;;  %s1825_s15 = sphi %s1823_s15, %s126_s15  }
   0xe   : > { %124 = vst [vmem:[%s1825_s15] sm:$0xff] %v123_v1  ;;  %s126_s15 = scalar_lea.vmem %s1825_s15, 8   ;;  %p120_p1 = scmp.gt.s32.totalorder %s125_s18, %s2174_s1 }
   0xf   :  { %s1831_s0 = smov (%p120_p1), [#allocation2]   ;;  %s1835_s23 = smov (%p120_p1), %s2175_s2  }
  0x10   :  { %122 = sbr.rel (!%p120_p1) target bundleno = 13 (0xd), region = 264 }
  0x17 LB: > { %v185_v2 = vld [vmem:[%s1837_s23] sm:$0xff]  ;;  %s187_s23 = scalar_lea.vmem %s1837_s23, 8   ;;  %s1837_s23 = sphi %s1835_s23, %s187_s23   ;;  %s1833_s0 = sphi %s1831_s0, %s188_s0  }
  0x18   : > { %186 = vst [vmem:[%s1833_s0] sm:$0xff] %v185_v2  ;;  %s188_s0 = scalar_lea.vmem %s1833_s0, 8   ;;  %p182_p2 = scmp.gt.s32.totalorder %s187_s23, %s2175_s2 }
  0x19   :  { %s1839_s1 = smov (%p182_p2), [#allocation3]   ;;  %s1843_s28 = smov (%p182_p2), %s2176_s3  }
  0x1a   :  { %184 = sbr.rel (!%p182_p2) target bundleno = 23 (0x17), region = 286 }
  0x21 LB: > { %v247_v3 = vld [vmem:[%s1845_s28] sm:$0xff]  ;;  %s249_s28 = scalar_lea.vmem %s1845_s28, 8   ;;  %s1845_s28 = sphi %s1843_s28, %s249_s28   ;;  %s1841_s1 = sphi %s1839_s1, %s250_s1  }
  0x22   : > { %248 = vst [vmem:[%s1841_s1] sm:$0xff] %v247_v3  ;;  %s250_s1 = scalar_lea.vmem %s1841_s1, 8   ;;  %p244_p3 = scmp.gt.s32.totalorder %s249_s28, %s2176_s3 }
  0x23   :  { %s262_s2 = smov (%p244_p3), [#allocation15]  ;;  %v263_v4 = vld [vmem:[#allocation0] sm:$0xff] (%p244_p3)  ;;  %s265_s10 = smov (%p244_p3), [#allocation16]  ;;  %v266_v5 = vld [vmem:[#allocation1] sm:$0xff] (%p244_p3)  ;;  %v269_v6 = vld [vmem:[#allocation2] sm:$0xff] (%p244_p3)  ;;  %v279_v7 = vlaneseq (%p244_p3)  ;;  %v1855_v9 = vmov (%p244_p3), 0.0  }
  0x24   :  { %246 = sbr.rel (!%p244_p3) target bundleno = 33 (0x21), region = 308  ;;  %264 = vst [vmem:[%s262_s2] sm:$0xff] (%p244_p3), %v263_v4  ;;  %267 = vst [vmem:[%s265_s10] sm:$0xff] (%p244_p3), %v266_v5  ;;  %s268_s11 = smov (%p244_p3), [#allocation17] }
  0x25   :  { %s271_s12 = smov (%p244_p3), [#allocation18]  ;;  %274 = vst [vmem:[#allocation8] sm:$0xff] (%p244_p3), %v1855_v9  ;;  %275 = vst [vmem:[#allocation10] sm:$0xff] (%p244_p3), %v1855_v9  ;;  %v1936_v10 = vand.u32 (%p244_p3), 127, %v279_v7  ;;  %v1938_v11 = vshrl.u32 (%p244_p3), %v279_v7, 7  ;;  %s278_s3 = smov (%p244_p3), [#allocation8] }
  0x26   :  { %276 = vst [vmem:[#allocation12] sm:$0xff] (%p244_p3), %v1855_v9  ;;  %277 = vst [vmem:[#allocation13] sm:$0xff] (%p244_p3), %v1855_v9  ;;  %s291_s13 = smov (%p244_p3), [#allocation13]  ;;  %s1179_s14 = smov (%p244_p3), [#allocation15] }
  0x27   :  { %270 = vst [vmem:[%s268_s11] sm:$0xff] (%p244_p3), %v269_v6  ;;  %v281_v10 = vmov (%p244_p3), %v1936_v10  ;;  %v284_v11 = vmov (%p244_p3), %v1938_v11  ;;  %vm1183_vm2 = vcmp.lt.s32.totalorder (%p244_p3), %v1936_v10, 8  ;;  %s1196_s15 = smov (%p244_p3), [#allocation16]  ;;  %s1213_s16 = smov (%p244_p3), [#allocation17] }
  0x28   :  { %v294_v10 = vmov (%p244_p3), %v1936_v10  ;;  %v297_v11 = vmov (%p244_p3), %v1938_v11  ;;  %vm288_vm0 = vcmp.eq.s32.totalorder (%p244_p3), %v284_v11, %v281_v10  ;;  %s1230_s17 = smov (%p244_p3), [#allocation18] }
  0x29   :  { %v272_v8 = vld [vmem:[#allocation3] sm:$0xff] (%p244_p3)  ;;  %vm301_vm1 = vcmp.eq.s32.totalorder (%p244_p3), %v297_v11, %v294_v10  ;;  %v1175_v10 = vmov (%p244_p3), %v1936_v10  ;;  %v1178_v11 = vmov (%p244_p3), %v1938_v11 }
  0x2a   :  { %273 = vst [vmem:[%s271_s12] sm:$0xff] (%p244_p3), %v272_v8  ;;  %vm1188_vm3 = vcmp.eq.s32.totalorder (%p244_p3), %v1178_v11, %v1175_v10  ;;  %v1226_v10 = vmov (%p244_p3), %v1936_v10  ;;  %v1195_v11 = vmov (%p244_p3), %v1938_v11 }
  0x2b   :  { %v1185_v16 = vld [vmem:[%s1179_s14] sm:$0xff]  ;;  %v1192_v10 = vmov %v1936_v10  ;;  %v1229_v11 = vmov %v1938_v11 }
  0x2c   :  { %v285_v12 = vld [vmem:[%s278_s3] sm:$0xff]  ;;  %v1186_v18 = vsel %vm1183_vm2, %v1185_v16, 0.0  ;;  %v1209_v10 = vmov %v1936_v10  ;;  %v1212_v11 = vmov %v1938_v11  ;;  %vm1239_vm4 = vcmp.eq.s32.totalorder %v1229_v11, %v1226_v10 }
  0x2d   :  { %v298_v13 = vld [vmem:[%s291_s13] sm:$0xff]  ;;  %v289_v14 = vsel %vm288_vm0, 1.0, %v285_v12  ;;  %v1187_v22 = vmul.f32 %v1186_v18, %v1186_v18 }
  0x2e   :  { %v302_v15 = vsel %vm301_vm1, 1.0, %v298_v13  ;;  %290 = vst [vmem:[%s278_s3] sm:$0xff] %v289_v14  ;;  %v1202_v17 = vld [vmem:[%s1196_s15] sm:$0xff] }
  0x2f   :  { %303 = vst [vmem:[%s291_s13] sm:$0xff] %v302_v15  ;;  %v1203_v19 = vsel %vm1183_vm2, %v1202_v17, 0.0  ;;  %v1219_v20 = vld [vmem:[%s1213_s16] sm:$0xff]  ;;  %v1189_v29 = vsel %vm1188_vm3, 0.0, %v1187_v22 }
  0x30   :  { %v1204_v23 = vmul.f32 %v1203_v19, %v1203_v19  ;;  %v1220_v24 = vsel %vm1183_vm2, %v1219_v20, 0.0 }
  0x31   :  { %v1236_v21 = vld [vmem:[%s1230_s17] sm:$0xff]  ;;  %v1221_v26 = vmul.f32 %v1220_v24, %v1220_v24 }
  0x32   :  { %v1237_v25 = vsel %vm1183_vm2, %v1236_v21, 0.0  ;;  %v1206_v27 = vadd.f32 %v1204_v23, %v1187_v22  ;;  %v1205_v30 = vadd.f32 %v1204_v23, %v1189_v29 }
  0x33   :  { %v1238_v28 = vmul.f32 %v1237_v25, %v1237_v25 }
  0x34   :  { %v1223_v31 = vadd.f32 %v1221_v26, %v1206_v27  ;;  %v1222_v32 = vadd.f32 %v1221_v26, %v1205_v30 }
  0x35   :  { %v1240_v33 = vsel %vm1239_vm4, 0.0, %v1238_v28 }
  0x36   :  { %v1242_v34 = vadd.f32 %v1238_v28, %v1223_v31  ;;  %v1241_v35 = vadd.f32 %v1240_v33, %v1222_v32 }
  0x38   :  { %1243 = vadd.xlane.f32.xlu0 %v1242_v34 }
  0x3c   :  { %1251 = vadd.xlane.f32.xlu0 %v1241_v35 }
  0xc5   :  { %v1244_v36 = vpop.xlane.xlu0 %1243 }
  0xc6   :  { %v1245_v37 = vrot.slane %v1244_v36, 4 }
  0xc8   :  { %v1246_v38 = vadd.f32 %v1245_v37, %v1244_v36 }
  0xc9   :  { %v1252_v39 = vpop.xlane.xlu0 %1251 }
  0xca   :  { %v1247_v40 = vrot.slane %v1246_v38, 2  ;;  %v1253_v41 = vrot.slane %v1252_v39, 4 }
  0xcc   :  { %v1254_v42 = vadd.f32 %v1253_v41, %v1252_v39  ;;  %v1248_v43 = vadd.f32 %v1247_v40, %v1246_v38 }
  0xce   :  { %v1255_v44 = vrot.slane %v1254_v42, 2  ;;  %v1249_v46 = vrot.slane %v1248_v43, 1 }
  0xd0   :  { %v1256_v45 = vadd.f32 %v1255_v44, %v1254_v42  ;;  %v1250_v49 = vadd.f32 %v1249_v46, %v1248_v43 }
  0xd2   :  { %v1257_v47 = vrot.slane %v1256_v45, 1 }
  0xd4   :  { %v1258_v48 = vadd.f32 %v1257_v47, %v1256_v45 }
  0xd6   :  { %1338 = vpush %v1258_v48 }
  0xd7   :  { %1340 = vpush %v1250_v49 }
 0x107   :  { %s1339_s18 = spop %1338 }
 0x108   :  { %s1341_s19 = spop %1340 }
 0x109   :  { %s1261_s20 = smul.f32 1e-10, %s1341_s19 }
 0x10b   :  { %p1262_p4 = scmp.le.f32.partialorder %s1339_s18, %s1261_s20 }
 0x10c   :  { %s1962_s0 = smov (!%p1262_p4), 0  }
 0x10d   :  { %1265 = sbr.rel (%p1262_p4) target bundleno = 951 (0x3b7), region = 324 }
 0x114 LB: > { %s1967_s21 = smov 0   ;;  %s1849_s0 = sphi %s1962_s0, %s2183_s0  }
 0x115 LB: >> { %s408_s22 = smov [#allocation15]  ;;  %v412_v10 = vmov %v1936_v10  ;;  %v415_v11 = vmov %v1938_v11  ;;  %s428_s23 = smov [#allocation16]  ;;  %vm731_vm14 = vcmp.eq.s32.totalorder %v1938_v11, 0  ;;  %vm743_vm15 = vcmp.eq.s32.totalorder %v1938_v11, 7  ;;  %s1853_s21 = sphi %s1967_s21, %s407_s21  }
 0x116   : >> { %v432_v10 = vmov %v1936_v10  ;;  %v435_v11 = vmov %v1938_v11  ;;  %v416_v50 = vld [vmem:[%s408_s22] sm:$0xff]  ;;  %vm419_vm5 = vcmp.eq.s32.totalorder %v415_v11, %v412_v10  ;;  %s448_s24 = smov [#allocation18]  ;;  %s409_s25 = smov [#allocation19] }
 0x117   : >> { %vm439_vm6 = vcmp.eq.s32.totalorder %v435_v11, %v432_v10  ;;  %v452_v10 = vmov %v1936_v10  ;;  %v455_v11 = vmov %v1938_v11  ;;  %v420_v51 = vsel %vm419_vm5, %v416_v50, 0.0  ;;  %v436_v52 = vld [vmem:[%s428_s23] sm:$0xff]  ;;  %s429_s1 = smov [#allocation20]  ;;  %s449_s26 = smov [#allocation21] }
 0x118   : >> { %vm459_vm7 = vcmp.eq.s32.totalorder %v455_v11, %v452_v10  ;;  %v421_v53 = vrot.slane %v420_v51, 4  ;;  %v440_v54 = vsel %vm439_vm6, %v436_v52, 0.0  ;;  %v456_v55 = vld [vmem:[%s448_s24] sm:$0xff]  ;;  %s472_s27 = smov [#allocation20]  ;;  %s470_s28 = smov [#allocation19]  ;;  %v521_v10 = vmov %v1936_v10 }
 0x119   : >> { %v441_v56 = vrot.slane %v440_v54, 4  ;;  %v460_v57 = vsel %vm459_vm7, %v456_v55, 0.0  ;;  %s474_s29 = smov [#allocation21]  ;;  %s509_s30 = smov [#allocation22]  ;;  %v524_v11 = vmov %v1938_v11  ;;  %v536_v10 = vmov %v1936_v10 }
 0x11a   : >> { %v422_v58 = vadd.f32 %v421_v53, %v420_v51  ;;  %v461_v59 = vrot.slane %v460_v57, 4  ;;  %s511_s2 = smov [#allocation23]  ;;  %s468_s10 = smov [#allocation24]  ;;  %v539_v11 = vmov %v1938_v11  ;;  %vm526_vm12 = vcmp.eq.s32.totalorder %v524_v11, %v521_v10 }
 0x11b   : >> { %v442_v60 = vadd.f32 %v441_v56, %v440_v54  ;;  %s469_s11 = smov [#allocation25]  ;;  %s513_s10 = smov %s468_s10  ;;  %vm541_vm13 = vcmp.eq.s32.totalorder %v539_v11, %v536_v10  ;;  %v634_v10 = vmov %v1936_v10  ;;  %v637_v11 = vmov %v1938_v11 }
 0x11c   : >> { %v423_v61 = vrot.slane %v422_v58, 2  ;;  %v462_v62 = vadd.f32 %v461_v59, %v460_v57  ;;  %s515_s11 = smov %s469_s11  ;;  %s517_s12 = smov [#allocation24]  ;;  %v607_v10 = vmov %v1936_v10  ;;  %v610_v11 = vmov %v1938_v11 }
 0x11d   : >> { %v443_v63 = vrot.slane %v442_v60, 2  ;;  %s532_s3 = smov [#allocation25]  ;;  %s530_s13 = smov [#allocation26]  ;;  %v648_v10 = vmov %v1936_v10  ;;  %v651_v11 = vmov %v1938_v11  ;;  %vm641_vm0 = vcmp.eq.s32.totalorder %v637_v11, %v634_v10 }
 0x11e   : >> { %v424_v0 = vadd.f32 %v423_v61, %v422_v58  ;;  %v463_v1 = vrot.slane %v462_v62, 2  ;;  %s547_s14 = smov [#allocation26]  ;;  %s1982_s15 = smov [#allocation15]  ;;  %v621_v10 = vmov %v1936_v10  ;;  %v624_v11 = vmov %v1938_v11 }
 0x11f   : >> { %v444_v2 = vadd.f32 %v443_v63, %v442_v60  ;;  %s545_s16 = smov [#allocation27]  ;;  %s1984_s17 = smov [#allocation16]  ;;  %v555_v49 = vld [vmem:[%s1982_s15] sm:$0xff]  ;;  %vm615_vm1 = vcmp.eq.s32.totalorder %v610_v11, %v607_v10  ;;  %vm656_vm3 = vcmp.eq.s32.totalorder %v651_v11, %v648_v10  ;;  %vm628_vm4 = vcmp.eq.s32.totalorder %v624_v11, %v621_v10 }
 0x120   : >> { %v425_v3 = vrot.slane %v424_v0, 1  ;;  %v464_v4 = vadd.f32 %v463_v1, %v462_v62  ;;  %s1986_s18 = smov [#allocation18]  ;;  %s771_s19 = smov [#allocation26]  ;;  %v556_v50 = vld [vmem:[%s1984_s17] sm:$0xff]  ;;  %vm670_vm5 = vcmp.eq.s32.totalorder %v1936_v10, 0  ;;  %vm674_vm6 = vcmp.eq.s32.totalorder %v1936_v10, 1 }
 0x121   : >> { %v445_v5 = vrot.slane %v444_v2, 1  ;;  %s1988_s20 = smov [#allocation8]  ;;  %s1990_s22 = smov [#allocation10]  ;;  %v558_v51 = vld [vmem:[%s1986_s18] sm:$0xff]  ;;  %vm687_vm7 = vcmp.eq.s32.totalorder %v1936_v10, 7 }
 0x122   : >> { %v426_v6 = vadd.f32 %v425_v3, %v424_v0  ;;  %v465_v7 = vrot.slane %v464_v4, 1  ;;  %s1992_s23 = smov [#allocation12]  ;;  %s1995_s24 = smov [#allocation13]  ;;  %v779_v52 = vld [vmem:[%s1988_s20] sm:$0xff] }
 0x123   : >> { %v446_v8 = vadd.f32 %v445_v5, %v444_v2  ;;  %v780_v53 = vld [vmem:[%s1990_s22] sm:$0xff]  ;;  %s407_s21 = sadd.s32 1, %s1853_s21  }
 0x124   : >> { %427 = vst [vmem:[%s409_s25] sm:$0x1] %v426_v6  ;;  %v466_v9 = vadd.f32 %v465_v7, %v464_v4  ;;  %s1997_s25 = smov [#allocation17]  ;;  %v781_v56 = vld [vmem:[%s1992_s23] sm:$0xff]  ;;  %p404_p5 = scmp.ge.s32.totalorder %s407_s21, 15  }
 0x125   : >> { %447 = vst [vmem:[%s429_s1] sm:$0x1] %v446_v8  ;;  %v782_v57 = vld [vmem:[%s1995_s24] sm:$0xff]  ;;  %s549_s1 = smov [#allocation27]  ;;  %v308_v10 = vmov (%p404_p5), %v1936_v10  ;;  %v311_v11 = vmov (%p404_p5), %v1938_v11 }
 0x126   : >> { %467 = vst [vmem:[%s449_s26] sm:$0x1] %v466_v9  ;;  %s773_s26 = smov [#allocation27]  ;;  %v557_v58 = vld [vmem:[%s1997_s25] sm:$0xff]  ;;  %v361_v10 = vmov (%p404_p5), %v1936_v10 }
 0x12b   : >> { %v471_v14 = vld [vmem:[%s470_s28] sm:$0xff]  ;;  %s800_s28 = smov [#allocation12] }
 0x12c   : >> { %v473_v12 = vld [vmem:[%s472_s27] sm:$0xff]  ;;  %v494_v27 = vand.u32 2147483647, %v471_v14  ;;  %s799_s27 = smov [#allocation8] }
 0x12d   : >> { %v477_v13 = vmul.f32 2.0, %v473_v12  ;;  %v475_v15 = vld [vmem:[%s474_s29] sm:$0xff]  ;;  %v495_v32 = vand.u32 2147483647, %v473_v12  ;;  %s575_s29 = smov [#allocation24] }
 0x12e   : >> { %v476_v16 = vsub.f32 %v475_v15, %v471_v14  ;;  %v496_v28 = vand.u32 2147483647, %v475_v15 }
 0x12f   : >> { %1593 = vrcp.f32 %v477_v13 }
 0x130   : >> { %v497_v31 = vmin.f32 %v494_v27, %v496_v28 }
 0x132   : >> { %v498_v33 = vmul.f32 1.1920929e-08, %v497_v31 }
 0x134   : >> { %vm499_vm11 = vcmp.le.f32.partialorder %v495_v32, %v498_v33 }
 0x139   : >> { %v1594_v17 = vpop.eup %1593 }
 0x13a   : >> { %v479_v18 = vmul.f32 %v1594_v17, %v476_v16 }
 0x13c   : >> { %v481_v19 = vmul.f32 %v479_v18, %v479_v18  ;;  %vm480_vm10 = vcmp.ge.f32.partialorder %v479_v18, 0.0 }
 0x13e   : >> { %v482_v20 = vadd.f32 1.0, %v481_v19 }
 0x140   : >> { %1595 = vrsqrt.f32 %v482_v20  ;;  %vm485_vm8 = vcmp.eq.f32.partialorder %v482_v20, inf  ;;  %v488_v22 = vand.u32 2147483648, %v482_v20  ;;  %vm487_vm9 = vcmp.eq.f32.partialorder %v482_v20, 0.0 }
 0x14a   : >> { %v1596_v21 = vpop.eup %1595 }
 0x14b   : >> { %v484_v23 = vmul.f32 %v1596_v21, %v482_v20 }
 0x14d   : >> { %v486_v24 = vsel %vm485_vm8, %v482_v20, %v484_v23  ;;  %vm323_vm8 = vcmp.eq.s32.totalorder (%p404_p5), %v311_v11, %v308_v10  ;;  %v364_v11 = vmov (%p404_p5), %v1938_v11  ;;  %v327_v10 = vmov (%p404_p5), %v1936_v10 }
 0x14e   : >> { %v489_v25 = vsel %vm487_vm9, %v488_v22, %v486_v24  ;;  %v330_v11 = vmov (%p404_p5), %v1938_v11  ;;  %v344_v10 = vmov (%p404_p5), %v1936_v10  ;;  %vm376_vm9 = vcmp.eq.s32.totalorder (%p404_p5), %v364_v11, %v361_v10 }
 0x14f   : >> { %v490_v26 = vxor.u32 2147483648, %v489_v25  ;;  %v347_v11 = vmov (%p404_p5), %v1938_v11 }
 0x151   : >> { %v491_v29 = vsel %vm480_vm10, %v489_v25, %v490_v26 }
 0x152   : >> { %v492_v30 = vadd.f32 %v491_v29, %v479_v18 }
 0x154   : >> { %1597 = vrcp.f32 %v492_v30 }
 0x15e   : >> { %v1598_v34 = vpop.eup %1597 }
 0x15f   : >> { %v500_v35 = vsel %vm499_vm11, 0.0, %v1598_v34 }
 0x160   : >> { %v501_v36 = vmul.f32 %v500_v35, %v500_v35  ;;  %v505_v37 = vmul.f32 %v500_v35, %v473_v12 }
 0x162   : >> { %v502_v38 = vadd.f32 1.0, %v501_v36  ;;  %v506_v39 = vsub.f32 %v471_v14, %v505_v37  ;;  %v508_v40 = vadd.f32 %v505_v37, %v475_v15 }
 0x164   : >> { %1599 = vrsqrt.f32 %v502_v38  ;;  %510 = vst [vmem:[%s509_s30] sm:$0xff] %v506_v39  ;;  %512 = vst [vmem:[%s511_s2] sm:$0xff] %v508_v40  ;;  %s577_s30 = smov [#allocation25]  ;;  %s2014_s2 = smov [#allocation10] }
 0x16e   : >> { %v1600_v41 = vpop.eup %1599 }
 0x16f   : >> { %514 = vst [vmem:[%s513_s10] sm:$0xff] %v1600_v41  ;;  %v504_v42 = vmul.f32 %v1600_v41, %v500_v35  ;;  %s2016_s10 = smov [#allocation13] }
 0x171   : >> { %516 = vst [vmem:[%s515_s11] sm:$0xff] %v504_v42  ;;  %s2020_s11 = smov [#allocation17] }
 0x176   : >> { %v518_v43 = vld [vmem:[%s517_s12] ss:$0 sm:$0xff]  ;;  %s2022_s12 = smov [#allocation18] }
 0x177   : >> { %v527_v44 = vsel %vm526_vm12, %v518_v43, 0.0  ;;  %v576_v23 = vld [vmem:[%s575_s29] ss:$0 sm:$0xff]  ;;  %s748_s29 = smov [#allocation18] }
 0x178   : >> { %528 = vadd.xlane.f32.xlu0 %v527_v44  ;;  %v533_v45 = vld [vmem:[%s532_s3] ss:$0 sm:$0xff]  ;;  %s2024_s3 = smov [#allocation15] }
 0x179   : >> { %v542_v46 = vsel %vm541_vm13, %v533_v45, 0.0  ;;  %v578_v24 = vld [vmem:[%s577_s30] ss:$0 sm:$0xff]  ;;  %s847_s30 = sadd.s32 (%p404_p5), 1, %s1849_s0  }
 0x17a   : > { %p400_p6 = scmp.ge.s32.totalorder (%p404_p5), %s847_s30, 15  ;;  %s2183_s0 = smov (%p404_p5), %s847_s30 }
 0x17c   : >> { %543 = vadd.xlane.f32.xlu0 %v542_v46 }
 0x205   : >> { %v529_v47 = vpop.xlane.xlu0 %528 }
 0x206   : >> { %531 = vst [vmem:[%s530_s13] sm:$0xff] %v529_v47  ;;  %s2026_s13 = smov [#allocation16] }
 0x209   : >> { %v544_v48 = vpop.xlane.xlu0 %543 }
 0x20a   : >> { %546 = vst [vmem:[%s545_s16] sm:$0xff] %v544_v48  ;;  %s631_s16 = smov [#allocation17] }
 0x20d   : >> { %v548_v54 = vld [vmem:[%s547_s14] sm:$0xff]  ;;  %s604_s14 = smov [#allocation22] }
 0x20e   : >> { %v772_v55 = vld [vmem:[%s771_s19] sm:$0xff]  ;;  %v559_v59 = vmul.f32 %v555_v49, %v548_v54  ;;  %v562_v60 = vmul.f32 %v556_v50, %v548_v54  ;;  %v569_v61 = vmul.f32 %v558_v51, %v548_v54  ;;  %v566_v4 = vmul.f32 %v557_v58, %v548_v54  ;;  %s618_s19 = smov [#allocation16] }
 0x20f   : >> { %v783_v62 = vmul.f32 %v779_v52, %v772_v55  ;;  %v786_v63 = vmul.f32 %v780_v53, %v772_v55  ;;  %v790_v0 = vmul.f32 %v781_v56, %v772_v55  ;;  %v793_v1 = vmul.f32 %v782_v57, %v772_v55  ;;  %v611_v55 = vld [vmem:[%s604_s14] ss:$0 sm:$0xff] }
 0x211   : >> { %v550_v2 = vld [vmem:[%s549_s1] sm:$0xff]  ;;  %s2063_s1 = smov [#allocation18] }
 0x212   : >> { %v774_v3 = vld [vmem:[%s773_s26] sm:$0xff]  ;;  %v563_v5 = vmul.f32 %v558_v51, %v550_v2  ;;  %v565_v6 = vmul.f32 %v555_v49, %v550_v2  ;;  %v568_v7 = vmul.f32 %v556_v50, %v550_v2  ;;  %v560_v14 = vmul.f32 %v557_v58, %v550_v2  ;;  %s723_s26 = smov [#allocation15] }
 0x213   : >> { %v784_v8 = vmul.f32 %v781_v56, %v774_v3  ;;  %v787_v9 = vmul.f32 %v782_v57, %v774_v3  ;;  %v789_v12 = vmul.f32 %v779_v52, %v774_v3  ;;  %v792_v13 = vmul.f32 %v780_v53, %v774_v3 }
 0x214   : >> { %v564_v15 = vsub.f32 %v562_v60, %v563_v5  ;;  %v570_v16 = vadd.f32 %v569_v61, %v568_v7  ;;  %v567_v18 = vadd.f32 %v566_v4, %v565_v6  ;;  %v561_v22 = vsub.f32 %v559_v59, %v560_v14 }
 0x215   : >> { %v785_v17 = vsub.f32 %v783_v62, %v784_v8  ;;  %v788_v19 = vsub.f32 %v786_v63, %v787_v9  ;;  %v791_v20 = vadd.f32 %v790_v0, %v789_v12  ;;  %v794_v21 = vadd.f32 %v793_v1, %v792_v13 }
 0x216   : >> { %572 = vst [vmem:[%s1984_s17] sm:$0xff] %v564_v15  ;;  %574 = vst [vmem:[%s1986_s18] sm:$0xff] %v570_v16  ;;  %s603_s17 = smov [#allocation15]  ;;  %s644_s18 = smov [#allocation18] }
 0x217   : >> { %795 = vst [vmem:[%s1988_s20] sm:$0xff] %v785_v17  ;;  %573 = vst [vmem:[%s1997_s25] sm:$0xff] %v567_v18  ;;  %s2060_s20 = smov [#allocation17]  ;;  %s1857_s25 = smov 127  }
 0x218   : >> { %796 = vst [vmem:[%s1990_s22] sm:$0xff] %v788_v19  ;;  %797 = vst [vmem:[%s1992_s23] sm:$0xff] %v791_v20  ;;  %s659_s22 = smov [#allocation15]  ;;  %s1856_s23 = smov 1  }
 0x219   : >> { %798 = vst [vmem:[%s1995_s24] sm:$0xff] %v794_v21  ;;  %571 = vst [vmem:[%s1982_s15] sm:$0xff] %v561_v22  ;;  %s645_s15 = smov [#allocation23]  ;;  %s660_s24 = smov [#allocation16] }
 0x21a   : >> { %v652_v56 = vld [vmem:[%s645_s15] ss:$0 sm:$0xff] }
 0x21d   : >> { %v586_v39 = vld [vmem:[%s2022_s12] sm:$0xff] }
 0x21e   : >> { %v801_v25 = vld [vmem:[%s799_s27] ss:$0 sm:$0xff]  ;;  %v1325_v27 = vld [vmem:[%s799_s27 + $0x7] ss:$0 sm:$0xff]  ;;  %v594_v42 = vmul.f32 %v586_v39, %v578_v24  ;;  %v597_v46 = vmul.f32 %v586_v39, %v576_v23 }
 0x21f   : >> { %v1324_v26 = vld [vmem:[%s799_s27 - $0x1] sm:$0xfe]  ;;  %v1329_v34 = vld [vmem:[%s2014_s2 + $0x7] ss:$0 sm:$0xff] }
 0x220   : >> { %v808_v28 = vsel %vm731_vm14, %v801_v25, %v1324_v26  ;;  %v812_v29 = vld [vmem:[%s800_s28] ss:$0 sm:$0xff]  ;;  %v1327_v30 = vld [vmem:[%s800_s28 + $0x1] sm:$0x7f] }
 0x221   : >> { %v825_v31 = vld [vmem:[%s2014_s2] ss:$0 sm:$0xff]  ;;  %811 = vst [vmem:[%s799_s27] sm:$0xff] %v808_v28  ;;  %v820_v32 = vsel %vm743_vm15, %v1325_v27, %v1327_v30  ;;  %v1331_v37 = vld [vmem:[%s2016_s10 + $0x1] sm:$0x7f] }
 0x222   : >> { %v1328_v33 = vld [vmem:[%s2014_s2 - $0x1] sm:$0xfe]  ;;  %1326 = vst [vmem:[%s799_s27 + $0x1] sm:$0x1] %v812_v29  ;;  %822 = vst [vmem:[%s800_s28] sm:$0xff] %v820_v32  ;;  %v844_v40 = vsel %vm743_vm15, %v1329_v34, %v1331_v37  ;;  %s747_s27 = smov [#allocation16]  ;;  %s724_s28 = smov [#allocation17] }
 0x223   : >> { %v836_v35 = vld [vmem:[%s2016_s10] ss:$0 sm:$0xff]  ;;  %v832_v36 = vsel %vm731_vm14, %v825_v31, %v1328_v33 }
 0x224   : >> { %v585_v38 = vld [vmem:[%s2020_s11] sm:$0xff]  ;;  %835 = vst [vmem:[%s2014_s2] sm:$0xff] %v832_v36  ;;  %846 = vst [vmem:[%s2016_s10] sm:$0xff] %v844_v40  ;;  %s331_s10 = smov (%p404_p5), [#allocation16] }
 0x225   : >> { %v593_v41 = vmul.f32 %v585_v38, %v576_v23  ;;  %v596_v43 = vmul.f32 %v585_v38, %v578_v24  ;;  %v583_v44 = vld [vmem:[%s2024_s3] sm:$0xff]  ;;  %1330 = vst [vmem:[%s2014_s2 + $0x1] sm:$0x1] %v836_v35  ;;  %s312_s2 = smov (%p404_p5), [#allocation15] }
 0x226   : >> { %v584_v45 = vld [vmem:[%s2026_s13] sm:$0xff]  ;;  %v587_v47 = vmul.f32 %v583_v44, %v576_v23  ;;  %v590_v49 = vmul.f32 %v583_v44, %v578_v24 }
 0x227   : >> { %v588_v48 = vmul.f32 %v584_v45, %v578_v24  ;;  %v595_v50 = vsub.f32 %v593_v41, %v594_v42  ;;  %v591_v51 = vmul.f32 %v584_v45, %v576_v23  ;;  %v598_v52 = vadd.f32 %v597_v46, %v596_v43 }
 0x229   : >> { %v589_v53 = vsub.f32 %v587_v47, %v588_v48  ;;  %601 = vst [vmem:[%s2020_s11] sm:$0xff] %v595_v50  ;;  %v592_v54 = vadd.f32 %v591_v51, %v590_v49  ;;  %602 = vst [vmem:[%s2022_s12] sm:$0xff] %v598_v52  ;;  %s348_s11 = smov (%p404_p5), [#allocation17]  ;;  %s365_s12 = smov (%p404_p5), [#allocation18] }
 0x22b   : >> { %599 = vst [vmem:[%s2024_s3] sm:$0xff] %v589_v53  ;;  %600 = vst [vmem:[%s2026_s13] sm:$0xff] %v592_v54 }
 0x230   : >> { %v638_v57 = vld [vmem:[%s631_s16] sm:$0xff] }
 0x231   : >> { %v642_v58 = vsel %vm641_vm0, 0.0, %v638_v57  ;;  %v653_v60 = vld [vmem:[%s644_s18] sm:$0xff] }
 0x232   : >> { %v612_v59 = vld [vmem:[%s603_s17] sm:$0xff]  ;;  %643 = vst [vmem:[%s631_s16] sm:$0xff] %v642_v58  ;;  %v657_v63 = vsel %vm656_vm3, %v652_v56, %v653_v60 }
 0x233   : >> { %v616_v61 = vsel %vm615_vm1, %v611_v55, %v612_v59  ;;  %v625_v62 = vld [vmem:[%s618_s19] sm:$0xff]  ;;  %658 = vst [vmem:[%s644_s18] sm:$0xff] %v657_v63 }
 0x234   : >> { %617 = vst [vmem:[%s603_s17] sm:$0xff] %v616_v61  ;;  %v629_v0 = vsel %vm628_vm4, 0.0, %v625_v62 }
 0x235   : >> { %630 = vst [vmem:[%s618_s19] sm:$0xff] %v629_v0 }
 0x239   : >> { %v697_v1 = vld [vmem:[%s2060_s20] sm:$0xff] }
 0x23a   : >> { %698 = vrot.lane.b32.xlu0 %v697_v1, %s1856_s23  ;;  %v693_v4 = vld [vmem:[%s2063_s1] sm:$0xff] }
 0x23b   : >> { %v665_v2 = vld [vmem:[%s659_s22] sm:$0xff] }
 0x23c   : >> { %666 = vrot.lane.b32.xlu1 %v665_v2, %s1856_s23  ;;  %v661_v3 = vld [vmem:[%s660_s24] sm:$0xff] }
 0x240   : >> { %662 = vrot.lane.b32.xlu1 %v661_v3, %s1856_s23 }
 0x244   : >> { %683 = vrot.lane.b32.xlu1 %v661_v3, %s1857_s25 }
 0x248   : >> { %694 = vrot.lane.b32.xlu1 %v693_v4, %s1856_s23 }
 0x24c   : >> { %715 = vrot.lane.b32.xlu1 %v693_v4, %s1857_s25 }
 0x2ac   : >> { %v699_v13 = vpop.permute.xlu0 %698 }
 0x2ad   : >> { %v703_v15 = vsel %vm670_vm5, %v697_v1, %v699_v13 }
 0x2ae   : >> { %v667_v5 = vpop.permute.xlu1 %666 }
 0x2af   : >> { %v671_v6 = vsel %vm670_vm5, %v665_v2, %v667_v5 }
 0x2b2   : >> { %v663_v7 = vpop.permute.xlu1 %662 }
 0x2b3   : >> { %v675_v8 = vsel %vm674_vm6, %v663_v7, %v671_v6 }
 0x2b4   : >> { %v681_v9 = vsel %vm1183_vm2, %v675_v8, 0.0 }
 0x2b5   : >> { %689 = vst [vmem:[%s659_s22] sm:$0xff] %v681_v9 }
 0x2b6   : >> { %v684_v12 = vpop.permute.xlu1 %683 }
 0x2b7   : >> { %v688_v14 = vsel %vm687_vm7, %v665_v2, %v684_v12 }
 0x2b8   : >> { %690 = vst [vmem:[%s660_s24] sm:$0xff] %v688_v14 }
 0x2ba   : >> { %v695_v16 = vpop.permute.xlu1 %694 }
 0x2bb   : >> { %v707_v17 = vsel %vm674_vm6, %v695_v16, %v703_v15 }
 0x2bc   : >> { %v725_v18 = vld [vmem:[%s723_s26] ss:$0 sm:$0xff]  ;;  %v1317_v20 = vld [vmem:[%s723_s26 + $0x7] ss:$0 sm:$0xff]  ;;  %v713_v22 = vsel %vm1183_vm2, %v707_v17, 0.0 }
 0x2bd   : >> { %v1316_v19 = vld [vmem:[%s723_s26 - $0x1] sm:$0xfe]  ;;  %721 = vst [vmem:[%s2060_s20] sm:$0xff] %v713_v22 }
 0x2be   : >> { %v732_v21 = vsel %vm731_vm14, %v725_v18, %v1316_v19  ;;  %v716_v23 = vpop.permute.xlu1 %715 }
 0x2bf   : >> { %735 = vst [vmem:[%s723_s26] sm:$0xff] %v732_v21  ;;  %v749_v24 = vld [vmem:[%s747_s27] ss:$0 sm:$0xff]  ;;  %v1321_v26 = vld [vmem:[%s747_s27 + $0x7] ss:$0 sm:$0xff]  ;;  %v720_v27 = vsel %vm687_vm7, %v697_v1, %v716_v23 }
 0x2c0   : >> { %v1320_v25 = vld [vmem:[%s747_s27 - $0x1] sm:$0xfe]  ;;  %722 = vst [vmem:[%s2063_s1] sm:$0xff] %v720_v27 }
 0x2c1   : >> { %v756_v28 = vsel %vm731_vm14, %v749_v24, %v1320_v25 }
 0x2c2   : >> { %759 = vst [vmem:[%s747_s27] sm:$0xff] %v756_v28 }
 0x2c4   : >> { %v736_v29 = vld [vmem:[%s724_s28] ss:$0 sm:$0xff]  ;;  %v1319_v30 = vld [vmem:[%s724_s28 + $0x1] sm:$0x7f] }
 0x2c5   : >> { %1318 = vst [vmem:[%s723_s26 + $0x1] sm:$0x1] %v736_v29  ;;  %v744_v31 = vsel %vm743_vm15, %v1317_v20, %v1319_v30  ;;  %406 = sbr.rel (!%p404_p5) target bundleno = 277 (0x115), region = 319 }
 0x2c6   : >> { %746 = vst [vmem:[%s724_s28] sm:$0xff] %v744_v31 }
 0x2c7   : >> { %v760_v32 = vld [vmem:[%s748_s29] ss:$0 sm:$0xff]  ;;  %v1323_v33 = vld [vmem:[%s748_s29 + $0x1] sm:$0x7f] }
 0x2c8   : >> { %1322 = vst [vmem:[%s747_s27 + $0x1] sm:$0x1] %v760_v32  ;;  %v768_v34 = vsel %vm743_vm15, %v1321_v26, %v1323_v33 }
 0x2c9   : >> { %770 = vst [vmem:[%s748_s29] sm:$0xff] %v768_v34 }
 0x2cc   : > { %v318_v35 = vld [vmem:[%s312_s2] sm:$0xff] }
 0x2cd   : > { %v319_v37 = vsel %vm1183_vm2, %v318_v35, 0.0  ;;  %v354_v39 = vld [vmem:[%s348_s11] sm:$0xff] }
 0x2ce   : > { %v320_v41 = vmul.f32 %v319_v37, %v319_v37  ;;  %v355_v43 = vsel %vm1183_vm2, %v354_v39, 0.0 }
 0x2cf   : > { %v337_v36 = vld [vmem:[%s331_s10] sm:$0xff]  ;;  %v356_v45 = vmul.f32 %v355_v43, %v355_v43 }
 0x2d0   : > { %v338_v38 = vsel %vm1183_vm2, %v337_v36, 0.0  ;;  %v371_v40 = vld [vmem:[%s365_s12] sm:$0xff]  ;;  %v324_v48 = vsel %vm323_vm8, 0.0, %v320_v41 }
 0x2d1   : > { %v339_v42 = vmul.f32 %v338_v38, %v338_v38  ;;  %v372_v44 = vsel %vm1183_vm2, %v371_v40, 0.0 }
 0x2d2   : > { %v373_v47 = vmul.f32 %v372_v44, %v372_v44 }
 0x2d3   : > { %v341_v46 = vadd.f32 %v339_v42, %v320_v41  ;;  %v340_v49 = vadd.f32 %v339_v42, %v324_v48 }
 0x2d4   : > { %v377_v52 = vsel %vm376_vm9, 0.0, %v373_v47 }
 0x2d5   : > { %v358_v50 = vadd.f32 %v356_v45, %v341_v46  ;;  %v357_v51 = vadd.f32 %v356_v45, %v340_v49 }
 0x2d7   : > { %v379_v53 = vadd.f32 %v373_v47, %v358_v50  ;;  %v378_v54 = vadd.f32 %v377_v52, %v357_v51 }
 0x2d9   : > { %380 = vadd.xlane.f32.xlu0 %v379_v53 }
 0x2dd   : > { %388 = vadd.xlane.f32.xlu0 %v378_v54 }
 0x366   : > { %v381_v55 = vpop.xlane.xlu0 %380 }
 0x367   : > { %v382_v56 = vrot.slane %v381_v55, 4 }
 0x369   : > { %v383_v57 = vadd.f32 %v382_v56, %v381_v55 }
 0x36a   : > { %v389_v58 = vpop.xlane.xlu0 %388 }
 0x36b   : > { %v384_v59 = vrot.slane %v383_v57, 2  ;;  %v390_v60 = vrot.slane %v389_v58, 4 }
 0x36d   : > { %v391_v61 = vadd.f32 %v390_v60, %v389_v58  ;;  %v385_v62 = vadd.f32 %v384_v59, %v383_v57 }
 0x36f   : > { %v392_v63 = vrot.slane %v391_v61, 2  ;;  %v386_v1 = vrot.slane %v385_v62, 1 }
 0x371   : > { %v393_v0 = vadd.f32 %v392_v63, %v391_v61  ;;  %v387_v4 = vadd.f32 %v386_v1, %v385_v62 }
 0x373   : > { %v394_v2 = vrot.slane %v393_v0, 1 }
 0x375   : > { %v395_v3 = vadd.f32 %v394_v2, %v393_v0 }
 0x377   : > { %1342 = vpush %v395_v3 }
 0x378   : > { %1344 = vpush %v387_v4 }
 0x3a8   : > { %s1343_s21 = spop %1342 }
 0x3a9   : > { %s1345_s3 = spop %1344 }
 0x3aa   : > { %s398_s13 = smul.f32 1e-10, %s1345_s3 }
 0x3ac   : > { %p399_p7 = scmp.le.f32.partialorder %s1343_s21, %s398_s13 }
 0x3ae   : > { %p401_p8 = por %p400_p6, %p399_p7 }
 0x3b0   :  { %849 = sbr.rel (!%p401_p8) target bundleno = 276 (0x114), region = 330 }
 0x3b7 PF:  { %s850_s14 = smov [#allocation15]  ;;  %v854_v10 = vmov %v1936_v10  ;;  %v857_v11 = vmov %v1938_v11  ;;  %s1858_s15 = smov [#allocation10]  }
 0x3b8   :  { %v874_v10 = vmov %v1936_v10  ;;  %v877_v11 = vmov %v1938_v11  ;;  %s1040_s16 = sshll.u32 %s1858_s15, 4  ;;  %v858_v5 = vld [vmem:[%s850_s14] sm:$0xff]  ;;  %vm861_vm10 = vcmp.eq.s32.totalorder %v857_v11, %v854_v10  ;;  %s870_s0 = smov [#allocation18]  ;;  %s1041_s16 = int_to_ptr.vmem [resolvable:$true] %s1040_s16 }
 0x3b9   :  { %vm881_vm11 = vcmp.eq.s32.totalorder %v877_v11, %v874_v10  ;;  %v862_v6 = vsel %vm861_vm10, %v858_v5, 0.0  ;;  %s1601_s17 = scalar_lea.vmem %s1041_s16, 128  ;;  %p1606_p10 = scmp.lt.s32.totalorder %s1041_s16, %s1041_s16 }
 0x3ba   :  { %p1602_p9 = scmp.ne.s32.totalorder %s1041_s16, %s1601_s17  ;;  %p1607_p11 = scmp.lt.s32.totalorder %s1601_s17, %s1601_s17 }
 0x3bc   :  { %p1608_p12 = por %p1607_p11, %p1606_p10 }
 0x3be   :  { %p1609_p13 = pnand %p1608_p12, %p1602_p9 }
 0x3c0   :  { %1612 = shalt.err (!%p1609_p13)
}
 0x3c1   :  { %s1613_s20 = scalar_lea.hbm %s2180_s7, 128 }
 0x3c2   :  { %p1614_p0 = scmp.ne.s32.totalorder %s2180_s7, %s1613_s20  ;;  %p1617_p1 = scmp.lt.u32.totalorder %s1613_s20, %s2180_s7 }
 0x3c4   :  { %p1619_p2 = pnand %p1617_p1, %p1614_p0 }
 0x3c6   :  { %1622 = shalt.err (!%p1619_p2)
}
 0x3c7   :  { %1043 = dma.vmem_to_hbm [thread:$0]  %s1041_s16, 128, %s2180_s7, [#allocation11]   ;;  %v863_v7 = vrot.slane %v862_v6, 4  ;;  %v878_v8 = vld [vmem:[%s870_s0] sm:$0xff] }
 0x3c8   :  { %v882_v9 = vsel %vm881_vm11, %v878_v8, 0.0  ;;  %s1859_s27 = smov [#allocation8]   ;;  %s1860_s29 = smov [#allocation12]  }
 0x3c9   :  { %v864_v12 = vadd.f32 %v863_v7, %v862_v6  ;;  %v883_v13 = vrot.slane %v882_v9, 4  ;;  %s1033_s28 = sshll.u32 %s1859_s27, 4  ;;  %s1047_s30 = sshll.u32 %s1860_s29, 4  ;;  %s1034_s28 = int_to_ptr.vmem [resolvable:$true] %s1033_s28  ;;  %s1048_s30 = int_to_ptr.vmem [resolvable:$true] %s1047_s30 }
 0x3ca   :  { %s1623_s2 = scalar_lea.vmem %s1034_s28, 128  ;;  %p1628_p4 = scmp.lt.s32.totalorder %s1034_s28, %s1034_s28 }
 0x3cb   :  { %v865_v14 = vrot.slane %v864_v12, 2  ;;  %v884_v15 = vadd.f32 %v883_v13, %v882_v9  ;;  %p1624_p3 = scmp.ne.s32.totalorder %s1034_s28, %s1623_s2  ;;  %p1629_p5 = scmp.lt.s32.totalorder %s1623_s2, %s1623_s2 }
 0x3cd   :  { %p1630_p6 = por %p1629_p5, %p1628_p4 }
 0x3cf   :  { %p1631_p7 = pnand %p1630_p6, %p1624_p3 }
 0x3d1   :  { %1634 = shalt.err (!%p1631_p7)
}
 0x3d2   :  { %s1635_s11 = scalar_lea.hbm %s2179_s6, 128 }
 0x3d3   :  { %p1636_p8 = scmp.ne.s32.totalorder %s2179_s6, %s1635_s11  ;;  %p1639_p9 = scmp.lt.u32.totalorder %s1635_s11, %s2179_s6 }
 0x3d5   :  { %p1641_p10 = pnand %p1639_p9, %p1636_p8 }
 0x3d7   :  { %1644 = shalt.err (!%p1641_p10)
}
 0x3d8   :  { %1036 = dma.vmem_to_hbm [thread:$0]  %s1034_s28, 128, %s2179_s6, [#allocation9]   ;;  %v866_v10 = vadd.f32 %v865_v14, %v864_v12  ;;  %v885_v11 = vrot.slane %v884_v15, 2 }
 0x3d9   :  { %s1645_s16 = scalar_lea.vmem %s1048_s30, 128  ;;  %p1650_p12 = scmp.lt.s32.totalorder %s1048_s30, %s1048_s30 }
 0x3da   :  { %p1646_p11 = scmp.ne.s32.totalorder %s1048_s30, %s1645_s16  ;;  %p1651_p13 = scmp.lt.s32.totalorder %s1645_s16, %s1645_s16 }
 0x3dc   :  { %p1652_p0 = por %p1651_p13, %p1650_p12 }
 0x3de   :  { %p1653_p1 = pnand %p1652_p0, %p1646_p11 }
 0x3e0   :  { %1656 = shalt.err (!%p1653_p1)
}
 0x3e1   :  { %s1657_s18 = scalar_lea.hbm %s2181_s8, 128 }
 0x3e2   :  { %p1658_p2 = scmp.ne.s32.totalorder %s2181_s8, %s1657_s18  ;;  %p1661_p3 = scmp.lt.u32.totalorder %s1657_s18, %s2181_s8 }
 0x3e4   :  { %p1663_p4 = pnand %p1661_p3, %p1658_p2 }
 0x3e6   :  { %1666 = shalt.err (!%p1663_p4)
}
 0x3e7   :  { %1050 = dma.vmem_to_hbm [thread:$0]  %s1048_s30, 128, %s2181_s8, [#allocation11]   ;;  %v867_v16 = vrot.slane %v866_v10, 1  ;;  %v886_v17 = vadd.f32 %v885_v11, %v884_v15 }
 0x3e8   :  { %s1861_s25 = smov [#allocation13]   ;;  %s851_s26 = smov [#allocation4] }
 0x3e9   :  { %s1054_s1 = sshll.u32 %s1861_s25, 4  ;;  %s1055_s1 = int_to_ptr.vmem [resolvable:$true] %s1054_s1 }
 0x3ea   :  { %s1667_s27 = scalar_lea.vmem %s1055_s1, 128  ;;  %p1672_p6 = scmp.lt.s32.totalorder %s1055_s1, %s1055_s1 }
 0x3eb   :  { %p1668_p5 = scmp.ne.s32.totalorder %s1055_s1, %s1667_s27  ;;  %p1673_p7 = scmp.lt.s32.totalorder %s1667_s27, %s1667_s27 }
 0x3ed   :  { %p1674_p8 = por %p1673_p7, %p1672_p6 }
 0x3ef   :  { %p1675_p9 = pnand %p1674_p8, %p1668_p5 }
 0x3f1   :  { %1678 = shalt.err (!%p1675_p9)
}
 0x3f2   :  { %s1679_s2 = scalar_lea.hbm %s2182_s9, 128 }
 0x3f3   :  { %p1680_p10 = scmp.ne.s32.totalorder %s2182_s9, %s1679_s2  ;;  %p1683_p11 = scmp.lt.u32.totalorder %s1679_s2, %s2182_s9 }
 0x3f5   :  { %p1685_p12 = pnand %p1683_p11, %p1680_p10 }
 0x3f7   :  { %1688 = shalt.err (!%p1685_p12)
}
 0x3f8   :  { %1057 = dma.vmem_to_hbm [thread:$0]  %s1055_s1, 128, %s2182_s9, [#allocation14]   ;;  %v868_v18 = vadd.f32 %v867_v16, %v866_v10  ;;  %v887_v19 = vrot.slane %v886_v17, 1 }
 0x3f9   :  { %s871_s21 = smov [#allocation6] }
 0x3fa   :  { %869 = vst [vmem:[%s851_s26] sm:$0x1] %v868_v18  ;;  %v888_v20 = vadd.f32 %v887_v19, %v886_v17 }
 0x3fc   :  { %889 = vst [vmem:[%s871_s21] sm:$0x1] %v888_v20 }
 0x401   :  { %v893_v21 = vld [vmem:[#allocation4] sm:$0x1] }
 0x402   :  { %895 = vst [vmem:[#allocation5] sm:$0x1] %v893_v21 }
 0x403   :  { %v899_v22 = vld [vmem:[#allocation6] sm:$0x1] }
 0x404   :  { %901 = vst [vmem:[#allocation7] sm:$0x1] %v899_v22 }
 0x409   :  { %v964_v23 = vld [vmem:[#allocation5] sm:$0x1] }
 0x40a   :  { %965 = vst [vmem:[%s2177_s4] sm:$0x1] %v964_v23 }
 0x40b   :  { %v1028_v24 = vld [vmem:[#allocation7] sm:$0x1] }
 0x40c   :  { %1029 = vst [vmem:[%s2178_s5] sm:$0x1] %v1028_v24 }
 0x40d   :  { %1809 = dma.done.wait [#allocation9], 128  }
 0x40e   :  { %1810 = vsyncadd [#allocation9], 4294967168 }
 0x40f   :  { %1811 = dma.done.wait [#allocation11], 256  }
 0x410   :  { %1812 = vsyncadd [#allocation11], 4294967040 }
 0x411   :  { %1813 = dma.done.wait [#allocation14], 128  }
 0x412   :  { %1814 = vsyncadd [#allocation14], 4294967168 }
 0x413   :  { %1066 = vsyncpa [#allocation9], 1 }
 0x414   :  { %1067 = vsyncpa [#allocation11], 1 }
 0x415   :  { %1068 = vsyncpa [#allocation14], 1 }

// kernel: custom-call.24
= control target key start
LH: loop header
LB: loop body
LE: loop exit
PB: predicated region body
PF: predicated region fallthrough
CT: control target
= control target key end

     0   :  { %11 = vsyncpa [#allocation9], 0  ;;  %s2927_s0 = inlined_call_operand.vmem [shape: f32[16,16], index: 0, kind: input, shape index: {}]   ;;  %s2928_s1 = inlined_call_operand.vmem [shape: f32[16,16], index: 1, kind: input, shape index: {}]   ;;  %s2929_s2 = inlined_call_operand.vmem [shape: f32[16,16], index: 2, kind: input, shape index: {}]   ;;  %s2930_s3 = inlined_call_operand.vmem [shape: f32[16,16], index: 3, kind: input, shape index: {}]   ;;  %s2931_s4 = inlined_call_operand.vmem [shape: f32[16], index: 4, kind: output, shape index: {0}]   ;;  %s2932_s5 = inlined_call_operand.vmem [shape: f32[16], index: 5, kind: output, shape index: {1}]   ;;  %s2933_s6 = inlined_call_operand.hbm [shape: f32[16,16], index: 6, kind: output, shape index: {2}]   ;;  %s2934_s7 = inlined_call_operand.hbm [shape: f32[16,16], index: 7, kind: output, shape index: {3}]   ;;  %s2935_s8 = inlined_call_operand.hbm [shape: f32[16,16], index: 8, kind: output, shape index: {4}]   ;;  %s2936_s9 = inlined_call_operand.hbm [shape: f32[16,16], index: 9, kind: output, shape index: {5}]  }
   0x1   :  { %12 = vsyncpa [#allocation11], 0 }
   0x2   :  { %13 = vsyncpa [#allocation14], 0  ;;  %s27_s11 = scalar_lea.vmem %s2927_s0, 8 }
   0x3   :  { %p1519_p0 = scmp.gt.s32.totalorder %s2927_s0, %s27_s11 }
   0x4   :  { %s2358_s14 = smov (!%p1519_p0), [#allocation0]   ;;  %s2362_s17 = smov (!%p1519_p0), %s2927_s0  }
   0x5   :  { %1520 = sbr.rel (%p1519_p0) target bundleno = 22 (0x16), region = 305 }
   0xc LB: > { %v61_v0 = vld [vmem:[%s2364_s17] sm:$0xff]  ;;  %s63_s17 = scalar_lea.vmem %s2364_s17, 8   ;;  %s2364_s17 = sphi %s2362_s17, %s63_s17   ;;  %s2360_s14 = sphi %s2358_s14, %s64_s14  }
   0xd   : > { %62 = vst [vmem:[%s2360_s14] sm:$0xff] %v61_v0  ;;  %s64_s14 = scalar_lea.vmem %s2360_s14, 8   ;;  %p58_p1 = scmp.gt.s32.totalorder %s63_s17, %s27_s11 }
   0xf   :  { %60 = sbr.rel (!%p58_p1) target bundleno = 12 (0xc), region = 311 }
  0x16 PF:  { %s89_s20 = scalar_lea.vmem %s2928_s1, 8 }
  0x17   :  { %p1539_p2 = scmp.gt.s32.totalorder %s2928_s1, %s89_s20 }
  0x18   :  { %s2366_s0 = smov (!%p1539_p2), [#allocation1]   ;;  %s2370_s25 = smov (!%p1539_p2), %s2928_s1  }
  0x19   :  { %1540 = sbr.rel (%p1539_p2) target bundleno = 42 (0x2a), region = 327 }
  0x20 LB: > { %v123_v1 = vld [vmem:[%s2372_s25] sm:$0xff]  ;;  %s125_s25 = scalar_lea.vmem %s2372_s25, 8   ;;  %s2372_s25 = sphi %s2370_s25, %s125_s25   ;;  %s2368_s0 = sphi %s2366_s0, %s126_s0  }
  0x21   : > { %124 = vst [vmem:[%s2368_s0] sm:$0xff] %v123_v1  ;;  %s126_s0 = scalar_lea.vmem %s2368_s0, 8   ;;  %p120_p3 = scmp.gt.s32.totalorder %s125_s25, %s89_s20 }
  0x23   :  { %122 = sbr.rel (!%p120_p3) target bundleno = 32 (0x20), region = 333 }
  0x2a PF:  { %s151_s28 = scalar_lea.vmem %s2929_s2, 8 }
  0x2b   :  { %p1559_p4 = scmp.gt.s32.totalorder %s2929_s2, %s151_s28 }
  0x2c   :  { %s2374_s1 = smov (!%p1559_p4), [#allocation2]   ;;  %s2378_s12 = smov (!%p1559_p4), %s2929_s2  }
  0x2d   :  { %1560 = sbr.rel (%p1559_p4) target bundleno = 62 (0x3e), region = 349 }
  0x34 LB: > { %v185_v2 = vld [vmem:[%s2380_s12] sm:$0xff]  ;;  %s187_s12 = scalar_lea.vmem %s2380_s12, 8   ;;  %s2380_s12 = sphi %s2378_s12, %s187_s12   ;;  %s2376_s1 = sphi %s2374_s1, %s188_s1  }
  0x35   : > { %186 = vst [vmem:[%s2376_s1] sm:$0xff] %v185_v2  ;;  %s188_s1 = scalar_lea.vmem %s2376_s1, 8   ;;  %p182_p5 = scmp.gt.s32.totalorder %s187_s12, %s151_s28 }
  0x37   :  { %184 = sbr.rel (!%p182_p5) target bundleno = 52 (0x34), region = 355 }
  0x3e PF:  { %s213_s15 = scalar_lea.vmem %s2930_s3, 8 }
  0x3f   :  { %p1579_p6 = scmp.gt.s32.totalorder %s2930_s3, %s213_s15 }
  0x40   :  { %s2382_s2 = smov (!%p1579_p6), [#allocation3]   ;;  %s2386_s20 = smov (!%p1579_p6), %s2930_s3  }
  0x41   :  { %1580 = sbr.rel (%p1579_p6) target bundleno = 82 (0x52), region = 371 }
  0x48 LB: > { %v247_v3 = vld [vmem:[%s2388_s20] sm:$0xff]  ;;  %s249_s20 = scalar_lea.vmem %s2388_s20, 8   ;;  %s2388_s20 = sphi %s2386_s20, %s249_s20   ;;  %s2384_s2 = sphi %s2382_s2, %s250_s2  }
  0x49   : > { %248 = vst [vmem:[%s2384_s2] sm:$0xff] %v247_v3  ;;  %s250_s2 = scalar_lea.vmem %s2384_s2, 8   ;;  %p244_p7 = scmp.gt.s32.totalorder %s249_s20, %s213_s15 }
  0x4b   :  { %246 = sbr.rel (!%p244_p7) target bundleno = 72 (0x48), region = 377 }
  0x52 PF:  { %s262_s21 = smov [#allocation15]  ;;  %v263_v4 = vld [vmem:[#allocation0] sm:$0xff]  ;;  %v267_v5 = vld [vmem:[#allocation0 + $0x8] sm:$0xff]  ;;  %s269_s22 = smov [#allocation16]  ;;  %v270_v6 = vld [vmem:[#allocation1] sm:$0xff]  ;;  %v303_v7 = vlaneseq  ;;  %v2398_v11 = vmov 0.0  }
  0x53   :  { %264 = vst [vmem:[%s262_s21] sm:$0xff] %v263_v4  ;;  %1764 = vst [vmem:[%s262_s21 + $0x8] sm:$0xff] %v267_v5  ;;  %v274_v8 = vld [vmem:[#allocation1 + $0x8] sm:$0xff]  ;;  %s276_s3 = smov [#allocation17]  ;;  %v277_v9 = vld [vmem:[#allocation2] sm:$0xff]  ;;  %s283_s0 = smov [#allocation18] }
  0x54   :  { %271 = vst [vmem:[%s269_s22] sm:$0xff] %v270_v6  ;;  %v281_v10 = vld [vmem:[#allocation2 + $0x8] sm:$0xff]  ;;  %290 = vst [vmem:[#allocation8] sm:$0xff] %v2398_v11  ;;  %v284_v12 = vld [vmem:[#allocation3] sm:$0xff]  ;;  %v2491_v14 = vand.u32 127, %v303_v7  ;;  %v2493_v15 = vshrl.u32 %v303_v7, 7  ;;  %s302_s23 = smov [#allocation8] }
  0x55   :  { %292 = vst [vmem:[#allocation8 + $0x8] sm:$0xff] %v2398_v11  ;;  %293 = vst [vmem:[#allocation10] sm:$0xff] %v2398_v11  ;;  %v288_v13 = vld [vmem:[#allocation3 + $0x8] sm:$0xff]  ;;  %s322_s24 = smov [#allocation13]  ;;  %s1597_s25 = smov [#allocation15] }
  0x56   :  { %295 = vst [vmem:[#allocation10 + $0x8] sm:$0xff] %v2398_v11  ;;  %296 = vst [vmem:[#allocation12] sm:$0xff] %v2398_v11  ;;  %v305_v14 = vmov %v2491_v14  ;;  %v308_v15 = vmov %v2493_v15  ;;  %vm1601_vm4 = vcmp.lt.s32.totalorder %v2491_v14, 16  ;;  %s1623_s26 = smov [#allocation16]  ;;  %s1646_s27 = smov [#allocation17] }
  0x57   :  { %298 = vst [vmem:[#allocation12 + $0x8] sm:$0xff] %v2398_v11  ;;  %299 = vst [vmem:[#allocation13] sm:$0xff] %v2398_v11  ;;  %v325_v14 = vmov %v2491_v14  ;;  %v328_v15 = vmov %v2493_v15  ;;  %v318_v16 = vadd.s32 8, %v308_v15  ;;  %vm312_vm0 = vcmp.eq.s32.totalorder %v308_v15, %v305_v14  ;;  %s1669_s28 = smov [#allocation18] }
  0x58   :  { %301 = vst [vmem:[#allocation13 + $0x8] sm:$0xff] %v2398_v11  ;;  %1765 = vst [vmem:[%s269_s22 + $0x8] sm:$0xff] %v274_v8  ;;  %v338_v17 = vadd.s32 8, %v328_v15  ;;  %vm332_vm1 = vcmp.eq.s32.totalorder %v328_v15, %v325_v14  ;;  %v1596_v15 = vmov %v2493_v15 }
  0x59   :  { %278 = vst [vmem:[%s276_s3] sm:$0xff] %v277_v9  ;;  %1766 = vst [vmem:[%s276_s3 + $0x8] sm:$0xff] %v281_v10  ;;  %vm319_vm2 = vcmp.eq.s32.totalorder %v318_v16, %v305_v14  ;;  %v1612_v34 = vadd.s32 8, %v1596_v15 }
  0x5a   :  { %285 = vst [vmem:[%s283_s0] sm:$0xff] %v284_v12  ;;  %1767 = vst [vmem:[%s283_s0 + $0x8] sm:$0xff] %v288_v13  ;;  %vm339_vm3 = vcmp.eq.s32.totalorder %v338_v17, %v325_v14  ;;  %v1593_v14 = vmov %v2491_v14  ;;  %v1603_v26 = vld [vmem:[%s1597_s25] sm:$0xff]  ;;  %v1772_v27 = vld [vmem:[%s1597_s25 + $0x8] sm:$0xff] }
  0x5b   :  { %vm1606_vm5 = vcmp.eq.s32.totalorder %v1596_v15, %v1593_v14  ;;  %v1619_v14 = vmov %v2491_v14  ;;  %v1604_v29 = vsel %vm1601_vm4, %v1603_v26, 0.0  ;;  %v1610_v30 = vsel %vm1601_vm4, %v1772_v27, 0.0 }
  0x5c   :  { %v309_v18 = vld [vmem:[%s302_s23] sm:$0xff]  ;;  %v1768_v19 = vld [vmem:[%s302_s23 + $0x8] sm:$0xff]  ;;  %v1605_v35 = vmul.f32 %v1604_v29, %v1604_v29  ;;  %v1611_v36 = vmul.f32 %v1610_v30, %v1610_v30  ;;  %vm1613_vm6 = vcmp.eq.s32.totalorder %v1612_v34, %v1593_v14  ;;  %v1668_v15 = vmov %v2493_v15 }
  0x5d   :  { %v313_v21 = vsel %vm312_vm0, 1.0, %v309_v18  ;;  %v320_v22 = vsel %vm319_vm2, 1.0, %v1768_v19  ;;  %v1622_v15 = vmov %v2493_v15  ;;  %v1642_v14 = vmov %v2491_v14 }
  0x5e   :  { %314 = vst [vmem:[%s302_s23] sm:$0xff] %v313_v21  ;;  %1769 = vst [vmem:[%s302_s23 + $0x8] sm:$0xff] %v320_v22  ;;  %v1616_v41 = vadd.f32 %v1611_v36, %v1605_v35  ;;  %v1607_v45 = vsel %vm1606_vm5, 0.0, %v1605_v35  ;;  %v1614_v49 = vsel %vm1613_vm6, 0.0, %v1611_v36  ;;  %v1665_v14 = vmov %v2491_v14 }
  0x5f   :  { %v329_v20 = vld [vmem:[%s322_s24] sm:$0xff]  ;;  %v1770_v24 = vld [vmem:[%s322_s24 + $0x8] sm:$0xff]  ;;  %v1615_v51 = vadd.f32 %v1614_v49, %v1607_v45  ;;  %v1645_v15 = vmov %v2493_v15  ;;  %v1686_v56 = vadd.s32 8, %v1668_v15  ;;  %vm1678_vm7 = vcmp.eq.s32.totalorder %v1668_v15, %v1665_v14 }
  0x60   :  { %v333_v23 = vsel %vm332_vm1, 1.0, %v329_v20  ;;  %v340_v25 = vsel %vm339_vm3, 1.0, %v1770_v24  ;;  %v1629_v28 = vld [vmem:[%s1623_s26] sm:$0xff]  ;;  %v1773_v32 = vld [vmem:[%s1623_s26 + $0x8] sm:$0xff] }
  0x61   :  { %334 = vst [vmem:[%s322_s24] sm:$0xff] %v333_v23  ;;  %1771 = vst [vmem:[%s322_s24 + $0x8] sm:$0xff] %v340_v25  ;;  %v1630_v31 = vsel %vm1601_vm4, %v1629_v28, 0.0  ;;  %v1652_v33 = vld [vmem:[%s1646_s27] sm:$0xff]  ;;  %v1636_v38 = vsel %vm1601_vm4, %v1773_v32, 0.0  ;;  %v1774_v39 = vld [vmem:[%s1646_s27 + $0x8] sm:$0xff]  ;;  %vm1687_vm8 = vcmp.eq.s32.totalorder %v1686_v56, %v1665_v14 }
  0x62   :  { %v1631_v37 = vmul.f32 %v1630_v31, %v1630_v31  ;;  %v1653_v40 = vsel %vm1601_vm4, %v1652_v33, 0.0  ;;  %v1637_v42 = vmul.f32 %v1636_v38, %v1636_v38  ;;  %v1675_v43 = vld [vmem:[%s1669_s28] sm:$0xff]  ;;  %v1659_v44 = vsel %vm1601_vm4, %v1774_v39, 0.0  ;;  %v1775_v48 = vld [vmem:[%s1669_s28 + $0x8] sm:$0xff] }
  0x63   :  { %v1654_v47 = vmul.f32 %v1653_v40, %v1653_v40  ;;  %v1676_v50 = vsel %vm1601_vm4, %v1675_v43, 0.0  ;;  %v1660_v53 = vmul.f32 %v1659_v44, %v1659_v44  ;;  %v1684_v54 = vsel %vm1601_vm4, %v1775_v48, 0.0 }
  0x64   :  { %v1633_v46 = vadd.f32 %v1631_v37, %v1616_v41  ;;  %v1632_v55 = vadd.f32 %v1631_v37, %v1615_v51  ;;  %v1677_v58 = vmul.f32 %v1676_v50, %v1676_v50  ;;  %v1685_v61 = vmul.f32 %v1684_v54, %v1684_v54 }
  0x66   :  { %v1639_v52 = vadd.f32 %v1637_v42, %v1633_v46  ;;  %v1638_v59 = vadd.f32 %v1637_v42, %v1632_v55  ;;  %v1679_v0 = vsel %vm1678_vm7, 0.0, %v1677_v58  ;;  %v1688_v3 = vsel %vm1687_vm8, 0.0, %v1685_v61 }
  0x68   :  { %v1656_v57 = vadd.f32 %v1654_v47, %v1639_v52  ;;  %v1655_v62 = vadd.f32 %v1654_v47, %v1638_v59 }
  0x6a   :  { %v1662_v60 = vadd.f32 %v1660_v53, %v1656_v57  ;;  %v1661_v1 = vadd.f32 %v1660_v53, %v1655_v62 }
  0x6c   :  { %v1681_v63 = vadd.f32 %v1677_v58, %v1662_v60  ;;  %v1680_v4 = vadd.f32 %v1679_v0, %v1661_v1 }
  0x6e   :  { %v1690_v2 = vadd.f32 %v1685_v61, %v1681_v63  ;;  %v1689_v5 = vadd.f32 %v1688_v3, %v1680_v4 }
  0x70   :  { %1691 = vadd.xlane.f32.xlu0 %v1690_v2 }
  0x74   :  { %1699 = vadd.xlane.f32.xlu0 %v1689_v5 }
  0xfd   :  { %v1692_v6 = vpop.xlane.xlu0 %1691 }
  0xfe   :  { %v1693_v7 = vrot.slane %v1692_v6, 4 }
 0x100   :  { %v1694_v8 = vadd.f32 %v1693_v7, %v1692_v6 }
 0x101   :  { %v1700_v9 = vpop.xlane.xlu0 %1699 }
 0x102   :  { %v1695_v10 = vrot.slane %v1694_v8, 2  ;;  %v1701_v11 = vrot.slane %v1700_v9, 4 }
 0x104   :  { %v1702_v12 = vadd.f32 %v1701_v11, %v1700_v9  ;;  %v1696_v13 = vadd.f32 %v1695_v10, %v1694_v8 }
 0x106   :  { %v1703_v16 = vrot.slane %v1702_v12, 2  ;;  %v1697_v18 = vrot.slane %v1696_v13, 1 }
 0x108   :  { %v1704_v17 = vadd.f32 %v1703_v16, %v1702_v12  ;;  %v1698_v21 = vadd.f32 %v1697_v18, %v1696_v13 }
 0x10a   :  { %v1705_v19 = vrot.slane %v1704_v17, 1 }
 0x10c   :  { %v1706_v20 = vadd.f32 %v1705_v19, %v1704_v17 }
 0x10e   :  { %1881 = vpush %v1706_v20 }
 0x10f   :  { %1883 = vpush %v1698_v21 }
 0x13f   :  { %s1882_s29 = spop %1881 }
 0x140   :  { %s1884_s30 = spop %1883 }
 0x141   :  { %s1709_s1 = smul.f32 1e-10, %s1884_s30 }
 0x143   :  { %p1710_p8 = scmp.le.f32.partialorder %s1882_s29, %s1709_s1 }
 0x144   :  { %s2525_s10 = smov (!%p1710_p8), 0  }
 0x145   :  { %1713 = sbr.rel (%p1710_p8) target bundleno = 1052 (0x41c), region = 393 }
 0x14c LB: > { %s2530_s11 = smov 0   ;;  %s2392_s10 = sphi %s2525_s10, %s2937_s10  }
 0x14d LB: >> { %s478_s12 = smov [#allocation15]  ;;  %v482_v14 = vmov %v2491_v14  ;;  %v485_v15 = vmov %v2493_v15  ;;  %s504_s13 = smov [#allocation16]  ;;  %vm1011_vm8 = vcmp.eq.s32.totalorder %v2493_v15, 0  ;;  %s2396_s11 = sphi %s2530_s11, %s477_s11  }
 0x14e   : >> { %v508_v14 = vmov %v2491_v14  ;;  %v511_v15 = vmov %v2493_v15  ;;  %v486_v22 = vld [vmem:[%s478_s12] sm:$0xff]  ;;  %vm489_vm9 = vcmp.eq.s32.totalorder %v485_v15, %v482_v14  ;;  %v1776_v23 = vld [vmem:[%s478_s12 + $0x8] sm:$0xff]  ;;  %v494_v24 = vadd.s32 8, %v485_v15  ;;  %s530_s14 = smov [#allocation18]  ;;  %s479_s15 = smov [#allocation19] }
 0x14f   : >> { %vm515_vm10 = vcmp.eq.s32.totalorder %v511_v15, %v508_v14  ;;  %v520_v25 = vadd.s32 8, %v511_v15  ;;  %v490_v26 = vsel %vm489_vm9, %v486_v22, 0.0  ;;  %v512_v27 = vld [vmem:[%s504_s13] sm:$0xff]  ;;  %v1777_v28 = vld [vmem:[%s504_s13 + $0x8] sm:$0xff]  ;;  %v534_v14 = vmov %v2491_v14  ;;  %s505_s16 = smov [#allocation20]  ;;  %s531_s17 = smov [#allocation21] }
 0x150   : >> { %v537_v15 = vmov %v2493_v15  ;;  %vm495_vm11 = vcmp.eq.s32.totalorder %v494_v24, %v482_v14  ;;  %v516_v29 = vsel %vm515_vm10, %v512_v27, 0.0  ;;  %v538_v30 = vld [vmem:[%s530_s14] sm:$0xff]  ;;  %v1778_v34 = vld [vmem:[%s530_s14 + $0x8] sm:$0xff]  ;;  %s560_s2 = smov [#allocation20]  ;;  %s558_s18 = smov [#allocation19]  ;;  %vm1035_vm9 = vcmp.eq.s32.totalorder %v2493_v15, 7 }
 0x151   : >> { %vm521_vm12 = vcmp.eq.s32.totalorder %v520_v25, %v508_v14  ;;  %vm541_vm13 = vcmp.eq.s32.totalorder %v537_v15, %v534_v14  ;;  %v496_v31 = vsel %vm495_vm11, %v1776_v23, %v490_v26  ;;  %v546_v35 = vadd.s32 8, %v537_v15  ;;  %s562_s19 = smov [#allocation21]  ;;  %s597_s20 = smov [#allocation22] }
 0x152   : >> { %v522_v32 = vsel %vm521_vm12, %v1777_v28, %v516_v29  ;;  %v542_v33 = vsel %vm541_vm13, %v538_v30, 0.0  ;;  %v497_v36 = vrot.slane %v496_v31, 4  ;;  %s599_s21 = smov [#allocation23]  ;;  %s556_s22 = smov [#allocation24]  ;;  %v627_v15 = vmov %v2493_v15 }
 0x153   : >> { %v523_v37 = vrot.slane %v522_v32, 4  ;;  %vm547_vm14 = vcmp.eq.s32.totalorder %v546_v35, %v534_v14  ;;  %s557_s3 = smov [#allocation25]  ;;  %s601_s22 = smov %s556_s22  ;;  %v658_v15 = vmov %v2493_v15  ;;  %v628_v24 = vadd.s32 8, %v627_v15 }
 0x154   : >> { %v498_v38 = vadd.f32 %v497_v36, %v496_v31  ;;  %v548_v40 = vsel %vm547_vm14, %v1778_v34, %v542_v33  ;;  %s603_s3 = smov %s557_s3  ;;  %v609_v14 = vmov %v2491_v14  ;;  %v612_v15 = vmov %v2493_v15  ;;  %s605_s0 = smov [#allocation24] }
 0x155   : >> { %v524_v39 = vadd.f32 %v523_v37, %v522_v32  ;;  %v549_v41 = vrot.slane %v548_v40, 4  ;;  %v624_v14 = vmov %v2491_v14  ;;  %v659_v25 = vadd.s32 8, %v658_v15  ;;  %s620_s23 = smov [#allocation24]  ;;  %s636_s24 = smov [#allocation25] }
 0x156   : >> { %v499_v42 = vrot.slane %v498_v38, 2  ;;  %v640_v14 = vmov %v2491_v14  ;;  %v643_v15 = vmov %v2493_v15  ;;  %vm614_vm3 = vcmp.eq.s32.totalorder %v612_v15, %v609_v14  ;;  %s651_s25 = smov [#allocation25]  ;;  %s618_s26 = smov [#allocation26] }
 0x157   : >> { %v525_v43 = vrot.slane %v524_v39, 2  ;;  %v550_v44 = vadd.f32 %v549_v41, %v548_v40  ;;  %v655_v14 = vmov %v2491_v14  ;;  %vm629_vm5 = vcmp.eq.s32.totalorder %v628_v24, %v624_v14  ;;  %s633_s27 = smov [#allocation26]  ;;  %s667_s28 = smov [#allocation26] }
 0x158   : >> { %v500_v45 = vadd.f32 %v499_v42, %v498_v38  ;;  %vm645_vm6 = vcmp.eq.s32.totalorder %v643_v15, %v640_v14  ;;  %vm660_vm7 = vcmp.eq.s32.totalorder %v659_v25, %v655_v14  ;;  %s649_s29 = smov [#allocation27]  ;;  %s2549_s30 = smov [#allocation15]  ;;  %v814_v15 = vmov %v2493_v15 }
 0x159   : >> { %v526_v46 = vadd.f32 %v525_v43, %v524_v39  ;;  %v551_v47 = vrot.slane %v550_v44, 2  ;;  %s664_s1 = smov [#allocation27]  ;;  %s2551_s12 = smov [#allocation16]  ;;  %v675_v38 = vld [vmem:[%s2549_s30] sm:$0xff]  ;;  %v792_v15 = vmov %v2493_v15  ;;  %v811_v14 = vmov %v2491_v14 }
 0x15a   : >> { %v501_v48 = vrot.slane %v500_v45, 1  ;;  %s2553_s13 = smov [#allocation17]  ;;  %s2555_s14 = smov [#allocation18]  ;;  %v676_v39 = vld [vmem:[%s2551_s12] sm:$0xff]  ;;  %v834_v15 = vmov %v2493_v15  ;;  %v789_v14 = vmov %v2491_v14  ;;  %vm818_vm10 = vcmp.eq.s32.totalorder %v814_v15, %v811_v14 }
 0x15b   : >> { %v527_v49 = vrot.slane %v526_v46, 1  ;;  %v552_v50 = vadd.f32 %v551_v47, %v550_v44  ;;  %v677_v40 = vld [vmem:[%s2553_s13] sm:$0xff]  ;;  %v855_v15 = vmov %v2493_v15  ;;  %v831_v14 = vmov %v2491_v14  ;;  %s477_s11 = sadd.s32 1, %s2396_s11  }
 0x15c   : >> { %v502_v51 = vadd.f32 %v501_v48, %v500_v45  ;;  %v678_v41 = vld [vmem:[%s2555_s14] sm:$0xff]  ;;  %v852_v14 = vmov %v2491_v14  ;;  %vm797_vm12 = vcmp.eq.s32.totalorder %v792_v15, %v789_v14  ;;  %vm838_vm14 = vcmp.eq.s32.totalorder %v834_v15, %v831_v14  ;;  %p474_p9 = scmp.ge.s32.totalorder %s477_s11, 31  }
 0x15d   : >> { %v528_v52 = vadd.f32 %v527_v49, %v526_v46  ;;  %v553_v53 = vrot.slane %v552_v50, 1  ;;  %s425_s11 = smov (%p474_p9), [#allocation18] }
 0x15e   : >> { %503 = vst [vmem:[%s479_s15] sm:$0x1] %v502_v51  ;;  %s1091_s15 = smov [#allocation26] }
 0x15f   : >> { %529 = vst [vmem:[%s505_s16] sm:$0x1] %v528_v52  ;;  %v554_v54 = vadd.f32 %v553_v53, %v552_v50  ;;  %s2557_s16 = smov [#allocation8] }
 0x160   : >> { %v1099_v42 = vld [vmem:[%s2557_s16] sm:$0xff] }
 0x161   : >> { %555 = vst [vmem:[%s531_s17] sm:$0x1] %v554_v54  ;;  %s2559_s17 = smov [#allocation10] }
 0x162   : >> { %v1100_v43 = vld [vmem:[%s2559_s17] sm:$0xff] }
 0x165   : >> { %v559_v57 = vld [vmem:[%s558_s18] sm:$0xff]  ;;  %s2564_s18 = smov [#allocation13] }
 0x166   : >> { %v561_v55 = vld [vmem:[%s560_s2] sm:$0xff]  ;;  %v582_v6 = vand.u32 2147483647, %v559_v57  ;;  %s2562_s2 = smov [#allocation12] }
 0x167   : >> { %v565_v56 = vmul.f32 2.0, %v561_v55  ;;  %v583_v11 = vand.u32 2147483647, %v561_v55  ;;  %v1101_v45 = vld [vmem:[%s2562_s2] sm:$0xff] }
 0x168   : >> { %v563_v58 = vld [vmem:[%s562_s19] sm:$0xff]  ;;  %s669_s19 = smov [#allocation27] }
 0x169   : >> { %2136 = vrcp.f32 %v565_v56  ;;  %v564_v59 = vsub.f32 %v563_v58, %v559_v57  ;;  %v584_v7 = vand.u32 2147483647, %v563_v58  ;;  %v1102_v46 = vld [vmem:[%s2564_s18] sm:$0xff] }
 0x16b   : >> { %v585_v10 = vmin.f32 %v582_v6, %v584_v7 }
 0x16d   : >> { %v586_v12 = vmul.f32 1.1920929e-08, %v585_v10 }
 0x16f   : >> { %vm587_vm2 = vcmp.le.f32.partialorder %v583_v11, %v586_v12 }
 0x173   : >> { %v2137_v60 = vpop.eup %2136 }
 0x174   : >> { %v567_v61 = vmul.f32 %v2137_v60, %v564_v59 }
 0x176   : >> { %v569_v62 = vmul.f32 %v567_v61, %v567_v61  ;;  %vm568_vm1 = vcmp.ge.f32.partialorder %v567_v61, 0.0 }
 0x178   : >> { %v570_v63 = vadd.f32 1.0, %v569_v62 }
 0x17a   : >> { %2138 = vrsqrt.f32 %v570_v63  ;;  %vm573_vm15 = vcmp.eq.f32.partialorder %v570_v63, inf  ;;  %v576_v1 = vand.u32 2147483648, %v570_v63  ;;  %vm575_vm0 = vcmp.eq.f32.partialorder %v570_v63, 0.0 }
 0x184   : >> { %v2139_v0 = vpop.eup %2138 }
 0x185   : >> { %v572_v2 = vmul.f32 %v2139_v0, %v570_v63 }
 0x187   : >> { %v574_v3 = vsel %vm573_vm15, %v570_v63, %v572_v2 }
 0x188   : >> { %v577_v4 = vsel %vm575_vm0, %v576_v1, %v574_v3  ;;  %vm860_vm0 = vcmp.eq.s32.totalorder %v855_v15, %v852_v14 }
 0x189   : >> { %v578_v5 = vxor.u32 2147483648, %v577_v4 }
 0x18b   : >> { %v579_v8 = vsel %vm568_vm1, %v577_v4, %v578_v5 }
 0x18c   : >> { %v580_v9 = vadd.f32 %v579_v8, %v567_v61 }
 0x18e   : >> { %2140 = vrcp.f32 %v580_v9 }
 0x198   : >> { %v2141_v13 = vpop.eup %2140 }
 0x199   : >> { %v588_v16 = vsel %vm587_vm2, 0.0, %v2141_v13  ;;  %vm882_vm2 = vcmp.eq.s32.totalorder %v2491_v14, 0 }
 0x19a   : >> { %v589_v17 = vmul.f32 %v588_v16, %v588_v16  ;;  %v593_v18 = vmul.f32 %v588_v16, %v561_v55 }
 0x19c   : >> { %v590_v19 = vadd.f32 1.0, %v589_v17  ;;  %v594_v20 = vsub.f32 %v559_v57, %v593_v18  ;;  %v596_v21 = vadd.f32 %v593_v18, %v563_v58 }
 0x19e   : >> { %2142 = vrsqrt.f32 %v590_v19  ;;  %598 = vst [vmem:[%s597_s20] sm:$0xff] %v594_v20  ;;  %600 = vst [vmem:[%s599_s21] sm:$0xff] %v596_v21  ;;  %s1093_s20 = smov [#allocation27]  ;;  %s695_s21 = smov [#allocation26] }
 0x1a8   : >> { %v2143_v22 = vpop.eup %2142 }
 0x1a9   : >> { %602 = vst [vmem:[%s601_s22] sm:$0xff] %v2143_v22  ;;  %v592_v23 = vmul.f32 %v2143_v22, %v588_v16  ;;  %s1119_s22 = smov [#allocation26] }
 0x1ab   : >> { %604 = vst [vmem:[%s603_s3] sm:$0xff] %v592_v23  ;;  %s698_s3 = smov [#allocation27] }
 0x1b0   : >> { %v606_v26 = vld [vmem:[%s605_s0] ss:$0 sm:$0xff]  ;;  %s2581_s0 = smov [#allocation15] }
 0x1b1   : >> { %v621_v27 = vld [vmem:[%s620_s23] ss:$0 sm:$0xff]  ;;  %v615_v28 = vsel %vm614_vm3, %v606_v26, 0.0  ;;  %s2583_s23 = smov [#allocation17]  ;;  %vm886_vm3 = vcmp.eq.s32.totalorder %v2491_v14, 1 }
 0x1b2   : >> { %v630_v29 = vsel %vm629_vm5, %v621_v27, 0.0  ;;  %616 = vadd.xlane.f32.xlu0 %v615_v28  ;;  %v637_v30 = vld [vmem:[%s636_s24] ss:$0 sm:$0xff]  ;;  %s1122_s24 = smov [#allocation27]  ;;  %vm899_vm5 = vcmp.eq.s32.totalorder %v2491_v14, 15 }
 0x1b3   : >> { %631 = vadd.xlane.f32.xlu1 %v630_v29  ;;  %v652_v31 = vld [vmem:[%s651_s25] ss:$0 sm:$0xff]  ;;  %v646_v32 = vsel %vm645_vm6, %v637_v30, 0.0  ;;  %s2585_s25 = smov [#allocation18] }
 0x1b4   : >> { %v661_v33 = vsel %vm660_vm7, %v652_v31, 0.0 }
 0x1b6   : >> { %647 = vadd.xlane.f32.xlu0 %v646_v32 }
 0x1b7   : >> { %662 = vadd.xlane.f32.xlu1 %v661_v33 }
 0x23f   : >> { %v617_v34 = vpop.xlane.xlu0 %616 }
 0x240   : >> { %v632_v35 = vpop.xlane.xlu1 %631  ;;  %619 = vst [vmem:[%s618_s26] sm:$0xff] %v617_v34  ;;  %s2587_s26 = smov [#allocation8] }
 0x241   : >> { %1779 = vst [vmem:[%s633_s27 + $0x8] sm:$0xff] %v632_v35  ;;  %s2589_s27 = smov [#allocation10] }
 0x243   : >> { %v648_v36 = vpop.xlane.xlu0 %647 }
 0x244   : >> { %v663_v37 = vpop.xlane.xlu1 %662  ;;  %650 = vst [vmem:[%s649_s29] sm:$0xff] %v648_v36  ;;  %s2593_s29 = smov [#allocation13] }
 0x245   : >> { %1780 = vst [vmem:[%s664_s1 + $0x8] sm:$0xff] %v663_v37  ;;  %s2609_s1 = smov [#allocation8] }
 0x248   : >> { %v668_v44 = vld [vmem:[%s667_s28] sm:$0xff]  ;;  %v1781_v10 = vld [vmem:[%s695_s21 + $0x8] sm:$0xff]  ;;  %s2591_s28 = smov [#allocation12]  ;;  %s759_s21 = smov [#allocation16] }
 0x249   : >> { %v1092_v47 = vld [vmem:[%s1091_s15] sm:$0xff]  ;;  %v679_v48 = vmul.f32 %v675_v38, %v668_v44  ;;  %v682_v49 = vmul.f32 %v676_v39, %v668_v44  ;;  %v686_v50 = vmul.f32 %v677_v40, %v668_v44  ;;  %v689_v51 = vmul.f32 %v678_v41, %v668_v44  ;;  %v1839_v11 = vld [vmem:[%s1119_s22 + $0x8] sm:$0xff]  ;;  %s731_s15 = smov [#allocation25]  ;;  %s761_s22 = smov [#allocation17] }
 0x24a   : >> { %v1103_v52 = vmul.f32 %v1099_v42, %v1092_v47  ;;  %v1106_v53 = vmul.f32 %v1100_v43, %v1092_v47  ;;  %v1110_v54 = vmul.f32 %v1101_v45, %v1092_v47  ;;  %v1113_v55 = vmul.f32 %v1102_v46, %v1092_v47 }
 0x24c   : >> { %v670_v56 = vld [vmem:[%s669_s19] sm:$0xff]  ;;  %v1782_v12 = vld [vmem:[%s698_s3 + $0x8] sm:$0xff]  ;;  %s2629_s19 = smov [#allocation18]  ;;  %s763_s3 = smov [#allocation18] }
 0x24d   : >> { %v1094_v57 = vld [vmem:[%s1093_s20] sm:$0xff]  ;;  %v680_v58 = vmul.f32 %v677_v40, %v670_v56  ;;  %v683_v59 = vmul.f32 %v678_v41, %v670_v56  ;;  %v685_v60 = vmul.f32 %v675_v38, %v670_v56  ;;  %v688_v61 = vmul.f32 %v676_v39, %v670_v56  ;;  %v1840_v13 = vld [vmem:[%s1122_s24 + $0x8] sm:$0xff]  ;;  %s757_s20 = smov [#allocation15]  ;;  %s808_s24 = smov [#allocation16] }
 0x24e   : >> { %v1104_v62 = vmul.f32 %v1101_v45, %v1094_v57  ;;  %v1107_v63 = vmul.f32 %v1102_v46, %v1094_v57  ;;  %v1109_v0 = vmul.f32 %v1099_v42, %v1094_v57  ;;  %v1112_v1 = vmul.f32 %v1100_v43, %v1094_v57 }
 0x24f   : >> { %v681_v2 = vsub.f32 %v679_v48, %v680_v58  ;;  %v684_v3 = vsub.f32 %v682_v49, %v683_v59  ;;  %v687_v4 = vadd.f32 %v686_v50, %v685_v60  ;;  %v690_v5 = vadd.f32 %v689_v51, %v688_v61 }
 0x250   : >> { %v1105_v6 = vsub.f32 %v1103_v52, %v1104_v62  ;;  %v1108_v7 = vsub.f32 %v1106_v53, %v1107_v63  ;;  %v1111_v8 = vadd.f32 %v1110_v54, %v1109_v0  ;;  %v1114_v9 = vadd.f32 %v1113_v55, %v1112_v1  ;;  %v2636_v52 = vld [vmem:[%s731_s15] ss:$0 sm:$0xff]  ;;  %s2737_s15 = smov [#allocation16] }
 0x251   : >> { %691 = vst [vmem:[%s2549_s30] sm:$0xff] %v681_v2  ;;  %693 = vst [vmem:[%s2553_s13] sm:$0xff] %v687_v4  ;;  %s2595_s30 = smov [#allocation16]  ;;  %s2614_s13 = smov [#allocation10] }
 0x252   : >> { %694 = vst [vmem:[%s2555_s14] sm:$0xff] %v690_v5  ;;  %692 = vst [vmem:[%s2551_s12] sm:$0xff] %v684_v3  ;;  %s2611_s12 = smov [#allocation12]  ;;  %s729_s14 = smov [#allocation24] }
 0x253   : >> { %1115 = vst [vmem:[%s2557_s16] sm:$0xff] %v1105_v6  ;;  %1116 = vst [vmem:[%s2559_s17] sm:$0xff] %v1108_v7  ;;  %s2619_s16 = smov [#allocation15]  ;;  %s2622_s17 = smov [#allocation13]  ;;  %v2634_v51 = vld [vmem:[%s729_s14] ss:$0 sm:$0xff] }
 0x254   : >> { %1117 = vst [vmem:[%s2562_s2] sm:$0xff] %v1111_v8  ;;  %1118 = vst [vmem:[%s2564_s18] sm:$0xff] %v1114_v9  ;;  %s2624_s2 = smov [#allocation16]  ;;  %s2627_s18 = smov [#allocation17] }
 0x255   : >> { %s2733_s14 = smov [#allocation18] }
 0x258   : >> { %v1783_v16 = vld [vmem:[%s2581_s0 + $0x8] sm:$0xff] }
 0x259   : >> { %v1785_v17 = vld [vmem:[%s2583_s23 + $0x8] sm:$0xff]  ;;  %v713_v19 = vmul.f32 %v1783_v16, %v1781_v10  ;;  %v719_v22 = vmul.f32 %v1783_v16, %v1782_v12 }
 0x25a   : >> { %v1786_v18 = vld [vmem:[%s2585_s25 + $0x8] sm:$0xff]  ;;  %v714_v20 = vmul.f32 %v1785_v17, %v1782_v12  ;;  %v720_v26 = vmul.f32 %v1785_v17, %v1781_v10 }
 0x25b   : >> { %v717_v21 = vmul.f32 %v1786_v18, %v1782_v12  ;;  %v1841_v23 = vld [vmem:[%s2587_s26 + $0x8] sm:$0xff]  ;;  %v723_v27 = vmul.f32 %v1786_v18, %v1781_v10 }
 0x25c   : >> { %v1842_v24 = vld [vmem:[%s2589_s27 + $0x8] sm:$0xff]  ;;  %v1137_v29 = vmul.f32 %v1841_v23, %v1839_v11  ;;  %v715_v32 = vsub.f32 %v713_v19, %v714_v20  ;;  %v1143_v35 = vmul.f32 %v1841_v23, %v1840_v13  ;;  %v721_v36 = vadd.f32 %v720_v26, %v719_v22 }
 0x25d   : >> { %v1843_v25 = vld [vmem:[%s2591_s28 + $0x8] sm:$0xff]  ;;  %v1140_v33 = vmul.f32 %v1842_v24, %v1839_v11  ;;  %v1146_v39 = vmul.f32 %v1842_v24, %v1840_v13 }
 0x25e   : >> { %v1844_v28 = vld [vmem:[%s2593_s29 + $0x8] sm:$0xff]  ;;  %v1138_v30 = vmul.f32 %v1843_v25, %v1840_v13  ;;  %v1144_v38 = vmul.f32 %v1843_v25, %v1839_v11  ;;  %1787 = vst [vmem:[%s2581_s0 + $0x8] sm:$0xff] %v715_v32  ;;  %1789 = vst [vmem:[%s2583_s23 + $0x8] sm:$0xff] %v721_v36  ;;  %s786_s0 = smov [#allocation22]  ;;  %s849_s23 = smov [#allocation23] }
 0x25f   : >> { %v1784_v31 = vld [vmem:[%s2595_s30 + $0x8] sm:$0xff]  ;;  %v1141_v34 = vmul.f32 %v1844_v28, %v1840_v13  ;;  %v1147_v41 = vmul.f32 %v1844_v28, %v1839_v11 }
 0x260   : >> { %v1139_v37 = vsub.f32 %v1137_v29, %v1138_v30  ;;  %v716_v42 = vmul.f32 %v1784_v31, %v1781_v10  ;;  %v722_v43 = vmul.f32 %v1784_v31, %v1782_v12  ;;  %v1145_v44 = vadd.f32 %v1144_v38, %v1143_v35 }
 0x261   : >> { %v1142_v40 = vsub.f32 %v1140_v33, %v1141_v34  ;;  %v1148_v45 = vadd.f32 %v1147_v41, %v1146_v39 }
 0x262   : >> { %1845 = vst [vmem:[%s2587_s26 + $0x8] sm:$0xff] %v1139_v37  ;;  %v718_v46 = vsub.f32 %v716_v42, %v717_v21  ;;  %v724_v47 = vadd.f32 %v723_v27, %v722_v43  ;;  %1847 = vst [vmem:[%s2591_s28 + $0x8] sm:$0xff] %v1145_v44  ;;  %s828_s26 = smov [#allocation17]  ;;  %s2722_s28 = smov [#allocation16] }
 0x263   : >> { %1846 = vst [vmem:[%s2589_s27 + $0x8] sm:$0xff] %v1142_v40  ;;  %1848 = vst [vmem:[%s2593_s29 + $0x8] sm:$0xff] %v1148_v45  ;;  %s848_s27 = smov [#allocation18]  ;;  %s2724_s29 = smov [#allocation15] }
 0x264   : >> { %1788 = vst [vmem:[%s2595_s30 + $0x8] sm:$0xff] %v718_v46  ;;  %1790 = vst [vmem:[%s2585_s25 + $0x8] sm:$0xff] %v724_v47  ;;  %v824_v46 = vadd.s32 8, %v814_v15  ;;  %v804_v47 = vadd.s32 8, %v792_v15  ;;  %s2710_s25 = smov [#allocation15]  ;;  %s2399_s30 = smov 1  }
 0x265   : >> { %v737_v53 = vld [vmem:[%s2619_s16] sm:$0xff] }
 0x266   : >> { %v741_v11 = vmul.f32 %v737_v53, %v2634_v51  ;;  %v744_v12 = vmul.f32 %v737_v53, %v2636_v52  ;;  %v739_v18 = vld [vmem:[%s2627_s18] sm:$0xff]  ;;  %vm825_vm11 = vcmp.eq.s32.totalorder %v824_v46, %v811_v14  ;;  %vm805_vm13 = vcmp.eq.s32.totalorder %v804_v47, %v789_v14 }
 0x267   : >> { %v747_v22 = vmul.f32 %v739_v18, %v2634_v51  ;;  %v750_v24 = vmul.f32 %v739_v18, %v2636_v52 }
 0x269   : >> { %v1155_v48 = vld [vmem:[%s2609_s1] ss:$0 sm:$0xff]  ;;  %v1850_v50 = vld [vmem:[%s2609_s1 + $0x7] ss:$0 sm:$0xff]  ;;  %v1851_v55 = vld [vmem:[%s2609_s1 + $0x7] sm:$0xfe] }
 0x26a   : >> { %v1849_v49 = vld [vmem:[%s2609_s1 - $0x1] sm:$0xfe]  ;;  %v1852_v56 = vld [vmem:[%s2609_s1 + $0xf] ss:$0 sm:$0xff]  ;;  %v1173_v58 = vsel %vm1011_vm8, %v1850_v50, %v1851_v55  ;;  %v1856_v61 = vld [vmem:[%s2611_s12 + $0x8] ss:$0 sm:$0xff] }
 0x26b   : >> { %v1162_v54 = vsel %vm1011_vm8, %v1155_v48, %v1849_v49  ;;  %v1199_v57 = vld [vmem:[%s2614_s13] ss:$0 sm:$0xff]  ;;  %v1855_v60 = vld [vmem:[%s2611_s12 + $0x9] sm:$0x7f]  ;;  %1853 = vst [vmem:[%s2609_s1 + $0x8] sm:$0xff] %v1173_v58  ;;  %v844_v48 = vadd.s32 8, %v834_v15 }
 0x26c   : >> { %1165 = vst [vmem:[%s2609_s1] sm:$0xff] %v1162_v54  ;;  %v1177_v59 = vld [vmem:[%s2611_s12] ss:$0 sm:$0xff]  ;;  %v1186_v62 = vsel %vm1035_vm9, %v1852_v56, %v1855_v60  ;;  %v1858_v63 = vld [vmem:[%s2611_s12 + $0x1] sm:$0x7f]  ;;  %v1861_v4 = vld [vmem:[%s2614_s13 + $0x7] sm:$0xfe] }
 0x26d   : >> { %1854 = vst [vmem:[%s2609_s1 + $0x1] sm:$0x1] %v1177_v59  ;;  %v1859_v0 = vld [vmem:[%s2614_s13 - $0x1] sm:$0xfe]  ;;  %v1860_v1 = vld [vmem:[%s2614_s13 + $0x7] ss:$0 sm:$0xff]  ;;  %v1194_v2 = vsel %vm1035_vm9, %v1856_v61, %v1858_v63  ;;  %vm845_vm15 = vcmp.eq.s32.totalorder %v844_v48, %v831_v14 }
 0x26e   : >> { %1857 = vst [vmem:[%s2611_s12 + $0x8] sm:$0xff] %v1186_v62  ;;  %v1206_v3 = vsel %vm1011_vm8, %v1199_v57, %v1859_v0  ;;  %v1862_v5 = vld [vmem:[%s2614_s13 + $0xf] ss:$0 sm:$0xff]  ;;  %v1221_v6 = vld [vmem:[%s2622_s17] ss:$0 sm:$0xff]  ;;  %1196 = vst [vmem:[%s2611_s12] sm:$0xff] %v1194_v2  ;;  %v1217_v7 = vsel %vm1011_vm8, %v1860_v1, %v1861_v4  ;;  %v867_v49 = vadd.s32 8, %v855_v15  ;;  %v349_v15 = vmov (%p474_p9), %v2493_v15 }
 0x26f   : >> { %1209 = vst [vmem:[%s2614_s13] sm:$0xff] %v1206_v3  ;;  %v1865_v8 = vld [vmem:[%s2622_s17 + $0x9] sm:$0x7f]  ;;  %v1866_v9 = vld [vmem:[%s2622_s17 + $0x8] ss:$0 sm:$0xff]  ;;  %v1868_v10 = vld [vmem:[%s2622_s17 + $0x1] sm:$0x7f] }
 0x270   : >> { %1863 = vst [vmem:[%s2614_s13 + $0x8] sm:$0xff] %v1217_v7  ;;  %1864 = vst [vmem:[%s2614_s13 + $0x1] sm:$0x1] %v1221_v6  ;;  %v1230_v13 = vsel %vm1035_vm9, %v1862_v5, %v1865_v8  ;;  %v1238_v16 = vsel %vm1035_vm9, %v1866_v9, %v1868_v10  ;;  %v738_v17 = vld [vmem:[%s2624_s2] sm:$0xff]  ;;  %vm868_vm1 = vcmp.eq.s32.totalorder %v867_v49, %v852_v14  ;;  %s2728_s1 = smov [#allocation15]  ;;  %s2731_s12 = smov [#allocation17]  ;;  %v346_v14 = vmov (%p474_p9), %v2491_v14 }
 0x271   : >> { %v740_v19 = vld [vmem:[%s2629_s19] sm:$0xff]  ;;  %1867 = vst [vmem:[%s2622_s17 + $0x8] sm:$0xff] %v1230_v13  ;;  %1240 = vst [vmem:[%s2622_s17] sm:$0xff] %v1238_v16  ;;  %v742_v20 = vmul.f32 %v738_v17, %v2636_v52  ;;  %v745_v21 = vmul.f32 %v738_v17, %v2634_v51  ;;  %s2400_s13 = smov 127   ;;  %s2742_s17 = smov [#allocation18]  ;;  %vm361_vm6 = vcmp.eq.s32.totalorder (%p474_p9), %v349_v15, %v346_v14  ;;  %v375_v14 = vmov (%p474_p9), %v2491_v14 }
 0x272   : >> { %v748_v23 = vmul.f32 %v740_v19, %v2636_v52  ;;  %v751_v25 = vmul.f32 %v740_v19, %v2634_v51  ;;  %v793_v50 = vld [vmem:[%s786_s0] ss:$0 sm:$0xff]  ;;  %s402_s0 = smov (%p474_p9), [#allocation17] }
 0x273   : >> { %v743_v26 = vsub.f32 %v741_v11, %v742_v20  ;;  %v746_v27 = vadd.f32 %v745_v21, %v744_v12 }
 0x274   : >> { %v749_v28 = vsub.f32 %v747_v22, %v748_v23  ;;  %v752_v29 = vadd.f32 %v751_v25, %v750_v24 }
 0x275   : >> { %753 = vst [vmem:[%s2619_s16] sm:$0xff] %v743_v26  ;;  %754 = vst [vmem:[%s2624_s2] sm:$0xff] %v746_v27  ;;  %s2740_s16 = smov [#allocation17]  ;;  %s2780_s2 = smov [#allocation15] }
 0x276   : >> { %755 = vst [vmem:[%s2627_s18] sm:$0xff] %v749_v28  ;;  %756 = vst [vmem:[%s2629_s19] sm:$0xff] %v752_v29  ;;  %s2784_s18 = smov [#allocation16]  ;;  %s2789_s19 = smov [#allocation17] }
 0x27c   : >> { %v1791_v30 = vld [vmem:[%s757_s20 + $0x8] sm:$0xff] }
 0x27d   : >> { %v1792_v31 = vld [vmem:[%s759_s21 + $0x8] sm:$0xff]  ;;  %v772_v34 = vmul.f32 %v1791_v30, %v2636_v52  ;;  %v769_v36 = vmul.f32 %v1791_v30, %v2634_v51 }
 0x27e   : >> { %v1793_v32 = vld [vmem:[%s761_s22 + $0x8] sm:$0xff]  ;;  %v770_v33 = vmul.f32 %v1792_v31, %v2636_v52  ;;  %v773_v35 = vmul.f32 %v1792_v31, %v2634_v51 }
 0x27f   : >> { %v1794_v37 = vld [vmem:[%s763_s3 + $0x8] sm:$0xff]  ;;  %v775_v38 = vmul.f32 %v1793_v32, %v2634_v51  ;;  %v778_v40 = vmul.f32 %v1793_v32, %v2636_v52 }
 0x280   : >> { %v776_v39 = vmul.f32 %v1794_v37, %v2636_v52  ;;  %v779_v41 = vmul.f32 %v1794_v37, %v2634_v51  ;;  %v774_v42 = vadd.f32 %v773_v35, %v772_v34  ;;  %v771_v43 = vsub.f32 %v769_v36, %v770_v33  ;;  %v856_v51 = vld [vmem:[%s849_s23] ss:$0 sm:$0xff] }
 0x282   : >> { %v777_v44 = vsub.f32 %v775_v38, %v776_v39  ;;  %v780_v45 = vadd.f32 %v779_v41, %v778_v40  ;;  %1796 = vst [vmem:[%s759_s21 + $0x8] sm:$0xff] %v774_v42  ;;  %1795 = vst [vmem:[%s757_s20 + $0x8] sm:$0xff] %v771_v43  ;;  %s1048_s20 = smov [#allocation18]  ;;  %s1241_s21 = sadd.s32 (%p474_p9), 1, %s2392_s10  }
 0x283   : > { %p470_p10 = scmp.ge.s32.totalorder (%p474_p9), %s1241_s21, 15  ;;  %s2937_s10 = smov (%p474_p9), %s1241_s21 }
 0x284   : >> { %1797 = vst [vmem:[%s761_s22 + $0x8] sm:$0xff] %v777_v44  ;;  %1798 = vst [vmem:[%s763_s3 + $0x8] sm:$0xff] %v780_v45  ;;  %s350_s22 = smov (%p474_p9), [#allocation15]  ;;  %s379_s3 = smov (%p474_p9), [#allocation16] }
 0x289   : >> { %v815_v52 = vld [vmem:[%s808_s24] sm:$0xff]  ;;  %v1801_v53 = vld [vmem:[%s808_s24 + $0x8] sm:$0xff] }
 0x28a   : >> { %v794_v54 = vld [vmem:[%s2710_s25] sm:$0xff]  ;;  %v819_v55 = vsel %vm818_vm10, 0.0, %v815_v52  ;;  %v826_v56 = vsel %vm825_vm11, 0.0, %v1801_v53  ;;  %v1799_v58 = vld [vmem:[%s2710_s25 + $0x8] sm:$0xff] }
 0x28b   : >> { %v798_v57 = vsel %vm797_vm12, %v793_v50, %v794_v54  ;;  %v835_v59 = vld [vmem:[%s828_s26] sm:$0xff]  ;;  %v1803_v60 = vld [vmem:[%s828_s26 + $0x8] sm:$0xff]  ;;  %820 = vst [vmem:[%s808_s24] sm:$0xff] %v819_v55  ;;  %1802 = vst [vmem:[%s808_s24 + $0x8] sm:$0xff] %v826_v56  ;;  %v806_v61 = vsel %vm805_vm13, %v793_v50, %v1799_v58 }
 0x28c   : >> { %799 = vst [vmem:[%s2710_s25] sm:$0xff] %v798_v57  ;;  %v839_v62 = vsel %vm838_vm14, 0.0, %v835_v59  ;;  %v846_v63 = vsel %vm845_vm15, 0.0, %v1803_v60  ;;  %v857_v0 = vld [vmem:[%s848_s27] sm:$0xff]  ;;  %v1805_v1 = vld [vmem:[%s848_s27 + $0x8] sm:$0xff]  ;;  %1800 = vst [vmem:[%s2710_s25 + $0x8] sm:$0xff] %v806_v61 }
 0x28d   : >> { %840 = vst [vmem:[%s828_s26] sm:$0xff] %v839_v62  ;;  %1804 = vst [vmem:[%s828_s26 + $0x8] sm:$0xff] %v846_v63  ;;  %v861_v2 = vsel %vm860_vm0, %v856_v51, %v857_v0  ;;  %v869_v3 = vsel %vm868_vm1, %v856_v51, %v1805_v1 }
 0x28e   : >> { %862 = vst [vmem:[%s848_s27] sm:$0xff] %v861_v2  ;;  %1806 = vst [vmem:[%s848_s27 + $0x8] sm:$0xff] %v869_v3 }
 0x292   : >> { %v873_v4 = vld [vmem:[%s2722_s28] sm:$0xff]  ;;  %v1807_v9 = vld [vmem:[%s2737_s15 + $0x8] sm:$0xff] }
 0x293   : >> { %874 = vrot.lane.b32.xlu1 %v873_v4, %s2399_s30  ;;  %v877_v5 = vld [vmem:[%s2724_s29] sm:$0xff]  ;;  %v1809_v6 = vld [vmem:[%s2728_s1 + $0x8] sm:$0xff] }
 0x294   : >> { %878 = vrot.lane.b32.xlu0 %v877_v5, %s2399_s30  ;;  %v943_v7 = vld [vmem:[%s2731_s12] sm:$0xff]  ;;  %v1815_v10 = vld [vmem:[%s2740_s16 + $0x8] sm:$0xff] }
 0x295   : >> { %v939_v8 = vld [vmem:[%s2733_s14] sm:$0xff]  ;;  %v1813_v11 = vld [vmem:[%s2742_s17 + $0x8] sm:$0xff] }
 0x297   : >> { %910 = vrot.lane.b32.xlu1 %v1809_v6, %s2399_s30 }
 0x298   : >> { %895 = vrot.lane.b32.xlu0 %v873_v4, %s2400_s13 }
 0x29b   : >> { %944 = vrot.lane.b32.xlu1 %v943_v7, %s2399_s30 }
 0x29c   : >> { %940 = vrot.lane.b32.xlu0 %v939_v8, %s2399_s30 }
 0x29f   : >> { %906 = vrot.lane.b32.xlu1 %v1807_v9, %s2399_s30 }
 0x2a0   : >> { %927 = vrot.lane.b32.xlu0 %v1807_v9, %s2400_s13 }
 0x2a3   : >> { %976 = vrot.lane.b32.xlu1 %v1815_v10, %s2399_s30 }
 0x2a4   : >> { %972 = vrot.lane.b32.xlu0 %v1813_v11, %s2399_s30 }
 0x2a7   : >> { %961 = vrot.lane.b32.xlu1 %v939_v8, %s2400_s13 }
 0x2ab   : >> { %993 = vrot.lane.b32.xlu1 %v1813_v11, %s2400_s13 }
 0x305   : >> { %v875_v12 = vpop.permute.xlu1 %874 }
 0x306   : >> { %v879_v13 = vpop.permute.xlu0 %878 }
 0x307   : >> { %v883_v16 = vsel %vm882_vm2, %v877_v5, %v879_v13 }
 0x308   : >> { %v887_v17 = vsel %vm886_vm3, %v875_v12, %v883_v16 }
 0x309   : >> { %v893_v18 = vsel %vm1601_vm4, %v887_v17, 0.0  ;;  %v911_v19 = vpop.permute.xlu1 %910 }
 0x30a   : >> { %v896_v20 = vpop.permute.xlu0 %895  ;;  %933 = vst [vmem:[%s2724_s29] sm:$0xff] %v893_v18  ;;  %v915_v27 = vsel %vm882_vm2, %v1809_v6, %v911_v19 }
 0x30b   : >> { %v900_v21 = vsel %vm899_vm5, %v877_v5, %v896_v20 }
 0x30c   : >> { %934 = vst [vmem:[%s2722_s28] sm:$0xff] %v900_v21 }
 0x30d   : >> { %v945_v22 = vpop.permute.xlu1 %944 }
 0x30e   : >> { %v949_v23 = vsel %vm882_vm2, %v943_v7, %v945_v22  ;;  %v941_v24 = vpop.permute.xlu0 %940 }
 0x30f   : >> { %v953_v25 = vsel %vm886_vm3, %v941_v24, %v949_v23 }
 0x310   : >> { %v959_v26 = vsel %vm1601_vm4, %v953_v25, 0.0 }
 0x311   : >> { %v907_v28 = vpop.permute.xlu1 %906  ;;  %999 = vst [vmem:[%s2731_s12] sm:$0xff] %v959_v26 }
 0x312   : >> { %v919_v29 = vsel %vm886_vm3, %v907_v28, %v915_v27  ;;  %v928_v30 = vpop.permute.xlu0 %927 }
 0x313   : >> { %v925_v31 = vsel %vm1601_vm4, %v919_v29, 0.0  ;;  %v932_v32 = vsel %vm899_vm5, %v1809_v6, %v928_v30 }
 0x314   : >> { %1811 = vst [vmem:[%s2728_s1 + $0x8] sm:$0xff] %v925_v31  ;;  %1812 = vst [vmem:[%s2737_s15 + $0x8] sm:$0xff] %v932_v32 }
 0x315   : >> { %v977_v33 = vpop.permute.xlu1 %976 }
 0x316   : >> { %v981_v34 = vsel %vm882_vm2, %v1815_v10, %v977_v33  ;;  %v973_v35 = vpop.permute.xlu0 %972 }
 0x317   : >> { %v985_v36 = vsel %vm886_vm3, %v973_v35, %v981_v34 }
 0x318   : >> { %v991_v37 = vsel %vm1601_vm4, %v985_v36, 0.0 }
 0x319   : >> { %v962_v38 = vpop.permute.xlu1 %961  ;;  %1817 = vst [vmem:[%s2740_s16 + $0x8] sm:$0xff] %v991_v37 }
 0x31a   : >> { %v966_v39 = vsel %vm899_vm5, %v943_v7, %v962_v38  ;;  %v368_v7 = vadd.s32 (%p474_p9), 8, %v349_v15  ;;  %v378_v15 = vmov (%p474_p9), %v2493_v15 }
 0x31b   : >> { %v1005_v40 = vld [vmem:[%s2780_s2] ss:$0 sm:$0xff]  ;;  %v1820_v42 = vld [vmem:[%s2780_s2 + $0x7] ss:$0 sm:$0xff]  ;;  %1000 = vst [vmem:[%s2733_s14] sm:$0xff] %v966_v39  ;;  %v1821_v44 = vld [vmem:[%s2780_s2 + $0x7] sm:$0xfe]  ;;  %v424_v15 = vmov (%p474_p9), %v2493_v15 }
 0x31c   : >> { %v1819_v41 = vld [vmem:[%s2780_s2 - $0x1] sm:$0xfe]  ;;  %v1023_v47 = vsel %vm1011_vm8, %v1820_v42, %v1821_v44  ;;  %v1830_v49 = vld [vmem:[%s2784_s18 + $0x7] ss:$0 sm:$0xff]  ;;  %v1831_v50 = vld [vmem:[%s2784_s18 + $0x7] sm:$0xfe]  ;;  %vm369_vm7 = vcmp.eq.s32.totalorder (%p474_p9), %v368_v7, %v346_v14  ;;  %v398_v14 = vmov (%p474_p9), %v2491_v14  ;;  %v401_v15 = vmov (%p474_p9), %v2493_v15 }
 0x31d   : >> { %v1012_v43 = vsel %vm1011_vm8, %v1005_v40, %v1819_v41  ;;  %v1049_v45 = vld [vmem:[%s2784_s18] ss:$0 sm:$0xff]  ;;  %v1832_v51 = vld [vmem:[%s2784_s18 + $0xf] ss:$0 sm:$0xff]  ;;  %v994_v52 = vpop.permute.xlu1 %993  ;;  %v1067_v53 = vsel %vm1011_vm8, %v1830_v49, %v1831_v50  ;;  %v421_v14 = vmov (%p474_p9), %v2491_v14  ;;  %v445_v36 = vadd.s32 (%p474_p9), 8, %v424_v15 }
 0x31e   : >> { %v1829_v46 = vld [vmem:[%s2784_s18 - $0x1] sm:$0xfe]  ;;  %1015 = vst [vmem:[%s2780_s2] sm:$0xff] %v1012_v43  ;;  %v998_v54 = vsel %vm899_vm5, %v1815_v10, %v994_v52  ;;  %v1822_v55 = vld [vmem:[%s2780_s2 + $0xf] ss:$0 sm:$0xff]  ;;  %1833 = vst [vmem:[%s2784_s18 + $0x8] sm:$0xff] %v1067_v53 }
 0x31f   : >> { %v1056_v48 = vsel %vm1011_vm8, %v1049_v45, %v1829_v46  ;;  %1818 = vst [vmem:[%s2742_s17 + $0x8] sm:$0xff] %v998_v54  ;;  %1823 = vst [vmem:[%s2780_s2 + $0x8] sm:$0xff] %v1023_v47  ;;  %vm436_vm8 = vcmp.eq.s32.totalorder (%p474_p9), %v424_v15, %v421_v14 }
 0x320   : >> { %1059 = vst [vmem:[%s2784_s18] sm:$0xff] %v1056_v48  ;;  %v1027_v56 = vld [vmem:[%s2789_s19] ss:$0 sm:$0xff]  ;;  %v1825_v57 = vld [vmem:[%s2789_s19 + $0x9] sm:$0x7f]  ;;  %v1826_v58 = vld [vmem:[%s2789_s19 + $0x8] ss:$0 sm:$0xff] }
 0x321   : >> { %1824 = vst [vmem:[%s2780_s2 + $0x1] sm:$0x1] %v1027_v56  ;;  %v1036_v59 = vsel %vm1035_vm9, %v1822_v55, %v1825_v57  ;;  %v1828_v60 = vld [vmem:[%s2789_s19 + $0x1] sm:$0x7f] }
 0x322   : >> { %1827 = vst [vmem:[%s2789_s19 + $0x8] sm:$0xff] %v1036_v59  ;;  %v1044_v61 = vsel %vm1035_vm9, %v1826_v58, %v1828_v60 }
 0x323   : >> { %1046 = vst [vmem:[%s2789_s19] sm:$0xff] %v1044_v61 }
 0x325   : > { %476 = sbr.rel (!%p474_p9) target bundleno = 333 (0x14d), region = 388 }
 0x326   : >> { %v1071_v62 = vld [vmem:[%s1048_s20] ss:$0 sm:$0xff]  ;;  %v1835_v63 = vld [vmem:[%s1048_s20 + $0x9] sm:$0x7f]  ;;  %v1836_v0 = vld [vmem:[%s1048_s20 + $0x8] ss:$0 sm:$0xff] }
 0x327   : >> { %1834 = vst [vmem:[%s2784_s18 + $0x1] sm:$0x1] %v1071_v62  ;;  %v1080_v1 = vsel %vm1035_vm9, %v1832_v51, %v1835_v63  ;;  %v1838_v2 = vld [vmem:[%s1048_s20 + $0x1] sm:$0x7f] }
 0x328   : >> { %1837 = vst [vmem:[%s1048_s20 + $0x8] sm:$0xff] %v1080_v1  ;;  %v1088_v3 = vsel %vm1035_vm9, %v1836_v0, %v1838_v2  ;;  %v356_v4 = vld [vmem:[%s350_s22] sm:$0xff] (%p474_p9)  ;;  %v1869_v5 = vld [vmem:[%s350_s22 + $0x8] sm:$0xff] (%p474_p9)  ;;  %vm446_vm9 = vcmp.eq.s32.totalorder (%p474_p9), %v445_v36, %v421_v14 }
 0x329   : >> { %1090 = vst [vmem:[%s1048_s20] sm:$0xff] %v1088_v3  ;;  %v357_v8 = vsel (%p474_p9), %vm1601_vm4, %v356_v4, 0.0  ;;  %v365_v9 = vsel (%p474_p9), %vm1601_vm4, %v1869_v5, 0.0 }
 0x32a   : > { %v408_v12 = vld [vmem:[%s402_s0] sm:$0xff] (%p474_p9)  ;;  %v358_v13 = vmul.f32 (%p474_p9), %v357_v8, %v357_v8  ;;  %v366_v16 = vmul.f32 (%p474_p9), %v365_v9, %v365_v9  ;;  %v1871_v19 = vld [vmem:[%s402_s0 + $0x8] sm:$0xff] (%p474_p9) }
 0x32b   : > { %v409_v20 = vsel (%p474_p9), %vm1601_vm4, %v408_v12, 0.0  ;;  %v415_v24 = vsel (%p474_p9), %vm1601_vm4, %v1871_v19, 0.0 }
 0x32c   : > { %v372_v21 = vadd.f32 %v366_v16, %v358_v13  ;;  %v362_v25 = vsel %vm361_vm6, 0.0, %v358_v13  ;;  %v410_v27 = vmul.f32 %v409_v20, %v409_v20  ;;  %v370_v29 = vsel %vm369_vm7, 0.0, %v366_v16 }
 0x32d   : > { %v371_v31 = vadd.f32 %v370_v29, %v362_v25  ;;  %v416_v33 = vmul.f32 %v415_v24, %v415_v24 }
 0x32e   : > { %v385_v6 = vld [vmem:[%s379_s3] sm:$0xff]  ;;  %v1870_v11 = vld [vmem:[%s379_s3 + $0x8] sm:$0xff] }
 0x32f   : > { %v386_v10 = vsel %vm1601_vm4, %v385_v6, 0.0  ;;  %v392_v18 = vsel %vm1601_vm4, %v1870_v11, 0.0 }
 0x330   : > { %v387_v17 = vmul.f32 %v386_v10, %v386_v10  ;;  %v393_v22 = vmul.f32 %v392_v18, %v392_v18  ;;  %v431_v23 = vld [vmem:[%s425_s11] sm:$0xff]  ;;  %v1872_v28 = vld [vmem:[%s425_s11 + $0x8] sm:$0xff] }
 0x331   : > { %v432_v30 = vsel %vm1601_vm4, %v431_v23, 0.0  ;;  %v442_v34 = vsel %vm1601_vm4, %v1872_v28, 0.0 }
 0x332   : > { %v389_v26 = vadd.f32 %v387_v17, %v372_v21  ;;  %v388_v35 = vadd.f32 %v387_v17, %v371_v31  ;;  %v433_v38 = vmul.f32 %v432_v30, %v432_v30  ;;  %v443_v41 = vmul.f32 %v442_v34, %v442_v34 }
 0x334   : > { %v395_v32 = vadd.f32 %v393_v22, %v389_v26  ;;  %v394_v39 = vadd.f32 %v393_v22, %v388_v35  ;;  %v437_v44 = vsel %vm436_vm8, 0.0, %v433_v38  ;;  %v447_v47 = vsel %vm446_vm9, 0.0, %v443_v41 }
 0x336   : > { %v412_v37 = vadd.f32 %v410_v27, %v395_v32  ;;  %v411_v42 = vadd.f32 %v410_v27, %v394_v39 }
 0x338   : > { %v418_v40 = vadd.f32 %v416_v33, %v412_v37  ;;  %v417_v45 = vadd.f32 %v416_v33, %v411_v42 }
 0x33a   : > { %v439_v43 = vadd.f32 %v433_v38, %v418_v40  ;;  %v438_v48 = vadd.f32 %v437_v44, %v417_v45 }
 0x33c   : > { %v449_v46 = vadd.f32 %v443_v41, %v439_v43  ;;  %v448_v49 = vadd.f32 %v447_v47, %v438_v48 }
 0x33e   : > { %450 = vadd.xlane.f32.xlu0 %v449_v46 }
 0x342   : > { %458 = vadd.xlane.f32.xlu0 %v448_v49 }
 0x3cb   : > { %v451_v50 = vpop.xlane.xlu0 %450 }
 0x3cc   : > { %v452_v51 = vrot.slane %v451_v50, 4 }
 0x3ce   : > { %v453_v52 = vadd.f32 %v452_v51, %v451_v50 }
 0x3cf   : > { %v459_v53 = vpop.xlane.xlu0 %458 }
 0x3d0   : > { %v454_v54 = vrot.slane %v453_v52, 2  ;;  %v460_v55 = vrot.slane %v459_v53, 4 }
 0x3d2   : > { %v461_v56 = vadd.f32 %v460_v55, %v459_v53  ;;  %v455_v57 = vadd.f32 %v454_v54, %v453_v52 }
 0x3d4   : > { %v462_v58 = vrot.slane %v461_v56, 2  ;;  %v456_v60 = vrot.slane %v455_v57, 1 }
 0x3d6   : > { %v463_v59 = vadd.f32 %v462_v58, %v461_v56  ;;  %v457_v63 = vadd.f32 %v456_v60, %v455_v57 }
 0x3d8   : > { %v464_v61 = vrot.slane %v463_v59, 1 }
 0x3da   : > { %v465_v62 = vadd.f32 %v464_v61, %v463_v59 }
 0x3dc   : > { %1885 = vpush %v465_v62 }
 0x3dd   : > { %1887 = vpush %v457_v63 }
 0x40d   : > { %s1886_s23 = spop %1885 }
 0x40e   : > { %s1888_s24 = spop %1887 }
 0x40f   : > { %s468_s25 = smul.f32 1e-10, %s1888_s24 }
 0x411   : > { %p469_p11 = scmp.le.f32.partialorder %s1886_s23, %s468_s25 }
 0x413   : > { %p471_p12 = por %p470_p10, %p469_p11 }
 0x415   :  { %1243 = sbr.rel (!%p471_p12) target bundleno = 332 (0x14c), region = 399 }
 0x41c PF:  { %s1244_s26 = smov [#allocation15]  ;;  %v1248_v14 = vmov %v2491_v14  ;;  %v1251_v15 = vmov %v2493_v15  ;;  %s2401_s27 = smov [#allocation10]  }
 0x41d   :  { %v1274_v14 = vmov %v2491_v14  ;;  %v1277_v15 = vmov %v2493_v15  ;;  %s1446_s28 = sshll.u32 %s2401_s27, 4  ;;  %v1252_v0 = vld [vmem:[%s1244_s26] sm:$0xff]  ;;  %vm1255_vm10 = vcmp.eq.s32.totalorder %v1251_v15, %v1248_v14  ;;  %v1873_v1 = vld [vmem:[%s1244_s26 + $0x8] sm:$0xff]  ;;  %v1260_v2 = vadd.s32 8, %v1251_v15  ;;  %s1270_s10 = smov [#allocation18]  ;;  %s1447_s28 = int_to_ptr.vmem [resolvable:$true] %s1446_s28 }
 0x41e   :  { %vm1281_vm11 = vcmp.eq.s32.totalorder %v1277_v15, %v1274_v14  ;;  %v1286_v3 = vadd.s32 8, %v1277_v15  ;;  %v1256_v4 = vsel %vm1255_vm10, %v1252_v0, 0.0  ;;  %s2144_s29 = scalar_lea.vmem %s1447_s28, 256  ;;  %p2149_p0 = scmp.lt.s32.totalorder %s1447_s28, %s1447_s28 }
 0x41f   :  { %p2145_p13 = scmp.ne.s32.totalorder %s1447_s28, %s2144_s29  ;;  %p2150_p1 = scmp.lt.s32.totalorder %s2144_s29, %s2144_s29 }
 0x421   :  { %p2151_p2 = por %p2150_p1, %p2149_p0 }
 0x423   :  { %p2152_p3 = pnand %p2151_p2, %p2145_p13 }
 0x425   :  { %2155 = shalt.err (!%p2152_p3)
}
 0x426   :  { %s2156_s12 = scalar_lea.hbm %s2934_s7, 256 }
 0x427   :  { %p2157_p4 = scmp.ne.s32.totalorder %s2934_s7, %s2156_s12  ;;  %p2160_p5 = scmp.lt.u32.totalorder %s2156_s12, %s2934_s7 }
 0x429   :  { %p2162_p6 = pnand %p2160_p5, %p2157_p4 }
 0x42b   :  { %2165 = shalt.err (!%p2162_p6)
}
 0x42c   :  { %1449 = dma.vmem_to_hbm [thread:$0]  %s1447_s28, 256, %s2934_s7, [#allocation11]   ;;  %vm1261_vm4 = vcmp.eq.s32.totalorder %v1260_v2, %v1248_v14  ;;  %v1278_v5 = vld [vmem:[%s1270_s10] sm:$0xff]  ;;  %v1874_v6 = vld [vmem:[%s1270_s10 + $0x8] sm:$0xff]  ;;  %vm1287_vm12 = vcmp.eq.s32.totalorder %v1286_v3, %v1274_v14 }
 0x42d   :  { %v1262_v7 = vsel %vm1261_vm4, %v1873_v1, %v1256_v4  ;;  %v1282_v8 = vsel %vm1281_vm11, %v1278_v5, 0.0  ;;  %s2402_s18 = smov [#allocation8]   ;;  %s2403_s20 = smov [#allocation12]  }
 0x42e   :  { %v1263_v9 = vrot.slane %v1262_v7, 4  ;;  %v1288_v10 = vsel %vm1287_vm12, %v1874_v6, %v1282_v8  ;;  %s1439_s19 = sshll.u32 %s2402_s18, 4  ;;  %s1453_s21 = sshll.u32 %s2403_s20, 4  ;;  %s1440_s19 = int_to_ptr.vmem [resolvable:$true] %s1439_s19  ;;  %s1454_s21 = int_to_ptr.vmem [resolvable:$true] %s1453_s21 }
 0x42f   :  { %v1289_v11 = vrot.slane %v1288_v10, 4  ;;  %s2166_s22 = scalar_lea.vmem %s1440_s19, 256  ;;  %p2171_p8 = scmp.lt.s32.totalorder %s1440_s19, %s1440_s19 }
 0x430   :  { %v1264_v12 = vadd.f32 %v1263_v9, %v1262_v7  ;;  %p2167_p7 = scmp.ne.s32.totalorder %s1440_s19, %s2166_s22  ;;  %p2172_p9 = scmp.lt.s32.totalorder %s2166_s22, %s2166_s22 }
 0x432   :  { %p2173_p10 = por %p2172_p9, %p2171_p8 }
 0x434   :  { %p2174_p11 = pnand %p2173_p10, %p2167_p7 }
 0x436   :  { %2177 = shalt.err (!%p2174_p11)
}
 0x437   :  { %s2178_s0 = scalar_lea.hbm %s2933_s6, 256 }
 0x438   :  { %p2179_p12 = scmp.ne.s32.totalorder %s2933_s6, %s2178_s0  ;;  %p2182_p13 = scmp.lt.u32.totalorder %s2178_s0, %s2933_s6 }
 0x43a   :  { %p2184_p0 = pnand %p2182_p13, %p2179_p12 }
 0x43c   :  { %2187 = shalt.err (!%p2184_p0)
}
 0x43d   :  { %1442 = dma.vmem_to_hbm [thread:$0]  %s1440_s19, 256, %s2933_s6, [#allocation9]   ;;  %v1290_v14 = vadd.f32 %v1289_v11, %v1288_v10  ;;  %v1265_v15 = vrot.slane %v1264_v12, 2 }
 0x43e   :  { %s2188_s28 = scalar_lea.vmem %s1454_s21, 256  ;;  %p2193_p2 = scmp.lt.s32.totalorder %s1454_s21, %s1454_s21 }
 0x43f   :  { %p2189_p1 = scmp.ne.s32.totalorder %s1454_s21, %s2188_s28  ;;  %p2194_p3 = scmp.lt.s32.totalorder %s2188_s28, %s2188_s28 }
 0x441   :  { %p2195_p4 = por %p2194_p3, %p2193_p2 }
 0x443   :  { %p2196_p5 = pnand %p2195_p4, %p2189_p1 }
 0x445   :  { %2199 = shalt.err (!%p2196_p5)
}
 0x446   :  { %s2200_s30 = scalar_lea.hbm %s2935_s8, 256 }
 0x447   :  { %p2201_p6 = scmp.ne.s32.totalorder %s2935_s8, %s2200_s30  ;;  %p2204_p7 = scmp.lt.u32.totalorder %s2200_s30, %s2935_s8 }
 0x449   :  { %p2206_p8 = pnand %p2204_p7, %p2201_p6 }
 0x44b   :  { %2209 = shalt.err (!%p2206_p8)
}
 0x44c   :  { %1456 = dma.vmem_to_hbm [thread:$0]  %s1454_s21, 256, %s2935_s8, [#allocation11]   ;;  %v1291_v13 = vrot.slane %v1290_v14, 2  ;;  %v1266_v16 = vadd.f32 %v1265_v15, %v1264_v12 }
 0x44d   :  { %s2404_s16 = smov [#allocation13]  }
 0x44e   :  { %s1460_s17 = sshll.u32 %s2404_s16, 4  ;;  %v1292_v17 = vadd.f32 %v1291_v13, %v1290_v14  ;;  %s1461_s17 = int_to_ptr.vmem [resolvable:$true] %s1460_s17 }
 0x44f   :  { %s2210_s2 = scalar_lea.vmem %s1461_s17, 256  ;;  %p2215_p10 = scmp.lt.s32.totalorder %s1461_s17, %s1461_s17 }
 0x450   :  { %p2211_p9 = scmp.ne.s32.totalorder %s1461_s17, %s2210_s2  ;;  %p2216_p11 = scmp.lt.s32.totalorder %s2210_s2, %s2210_s2 }
 0x452   :  { %p2217_p12 = por %p2216_p11, %p2215_p10 }
 0x454   :  { %p2218_p13 = pnand %p2217_p12, %p2211_p9 }
 0x456   :  { %2221 = shalt.err (!%p2218_p13)
}
 0x457   :  { %s2222_s20 = scalar_lea.hbm %s2936_s9, 256 }
 0x458   :  { %p2223_p0 = scmp.ne.s32.totalorder %s2936_s9, %s2222_s20  ;;  %p2226_p1 = scmp.lt.u32.totalorder %s2222_s20, %s2936_s9 }
 0x45a   :  { %p2228_p2 = pnand %p2226_p1, %p2223_p0 }
 0x45c   :  { %2231 = shalt.err (!%p2228_p2)
}
 0x45d   :  { %1463 = dma.vmem_to_hbm [thread:$0]  %s1461_s17, 256, %s2936_s9, [#allocation14]   ;;  %v1267_v18 = vrot.slane %v1266_v16, 1  ;;  %v1293_v19 = vrot.slane %v1292_v17, 1 }
 0x45e   :  { %s1245_s11 = smov [#allocation4]  ;;  %s1271_s23 = smov [#allocation6] }
 0x45f   :  { %v1268_v20 = vadd.f32 %v1267_v18, %v1266_v16  ;;  %v1294_v21 = vadd.f32 %v1293_v19, %v1292_v17 }
 0x461   :  { %1269 = vst [vmem:[%s1245_s11] sm:$0x1] %v1268_v20  ;;  %1295 = vst [vmem:[%s1271_s23] sm:$0x1] %v1294_v21 }
 0x468   :  { %v1299_v22 = vld [vmem:[#allocation4] sm:$0x1]  ;;  %v1305_v23 = vld [vmem:[#allocation6] sm:$0x1] }
 0x469   :  { %1301 = vst [vmem:[#allocation5] sm:$0x1] %v1299_v22  ;;  %1307 = vst [vmem:[#allocation7] sm:$0x1] %v1305_v23 }
 0x470   :  { %v1370_v24 = vld [vmem:[#allocation5] sm:$0x1]  ;;  %v1434_v25 = vld [vmem:[#allocation7] sm:$0x1] }
 0x471   :  { %1371 = vst [vmem:[%s2931_s4] sm:$0x1] %v1370_v24  ;;  %1435 = vst [vmem:[%s2932_s5] sm:$0x1] %v1434_v25 }
 0x472   :  { %2352 = dma.done.wait [#allocation9], 256  }
 0x473   :  { %2353 = vsyncadd [#allocation9], 4294967040 }
 0x474   :  { %2354 = dma.done.wait [#allocation11], 512  }
 0x475   :  { %2355 = vsyncadd [#allocation11], 4294966784 }
 0x476   :  { %2356 = dma.done.wait [#allocation14], 256  }
 0x477   :  { %2357 = vsyncadd [#allocation14], 4294967040 }
 0x478   :  { %1472 = vsyncpa [#allocation9], 1 }
 0x479   :  { %1473 = vsyncpa [#allocation11], 1 }
 0x47a   :  { %1474 = vsyncpa [#allocation14], 1 }

// kernel: custom-call.19
= control target key start
LH: loop header
LB: loop body
LE: loop exit
PB: predicated region body
PF: predicated region fallthrough
CT: control target
= control target key end

     0   :  { %v1561_v0 = vmov 0.0   ;;  %vm53_vm0 = vcmask 7168   ;;  %vm110_vm1 = vcmask 15368   ;;  %vm127_vm2 = vcmask 1047553   ;;  %s1900_s0 = inlined_call_operand.vmem [shape: f32[32,32], index: 0, kind: input, shape index: {}]   ;;  %s1901_s1 = inlined_call_operand.vmem [shape: f32[32,32], index: 1, kind: output, shape index: {}]  }
   0x1   :  { %46 = vst [vmem:[#allocation1] sm:$0xff] %v1561_v0  ;;  %v1575_v4 = vld [vmem:[%s1900_s0] sm:$0xff]  ;;  %v1581_v5 = vld [vmem:[%s1900_s0 + $0x8] sm:$0xff]  ;;  %v1601_v22 = vld [vmem:[%s1900_s0 + $0x10] sm:$0xff]  ;;  %vm171_vm4 = vcmask 23568   ;;  %vm188_vm5 = vcmask 1047554  }
   0x2   :  { %36 = vst [vmem:[#allocation0] sm:$0xff] %v1575_v4  ;;  %38 = vst [vmem:[#allocation0 + $0x8] sm:$0xff] %v1581_v5  ;;  %v1626_v46 = vld [vmem:[%s1900_s0 + $0x18] sm:$0xff]  ;;  %vm232_vm7 = vcmask 31768   ;;  %vm249_vm8 = vcmask 1047555   ;;  %vm293_vm10 = vcmask 39968  }
   0x3   :  { %40 = vst [vmem:[#allocation0 + $0x10] sm:$0xff] %v1601_v22  ;;  %vm128_vm3 = vmand %vm110_vm1, %vm127_vm2  ;;  %vm310_vm11 = vcmask 1047556   ;;  %vm354_vm13 = vcmask 48168   ;;  %vm371_vm14 = vcmask 1047557  }
   0x4   :  { %42 = vst [vmem:[#allocation0 + $0x18] sm:$0xff] %v1626_v46  ;;  %vm189_vm6 = vmand %vm171_vm4, %vm188_vm5 }
   0x5   :  { %vm250_vm9 = vmand %vm232_vm7, %vm249_vm8 }
   0x6   :  { %vm311_vm12 = vmand %vm293_vm10, %vm310_vm11 }
   0x7   :  { %vm372_vm15 = vmand %vm354_vm13, %vm371_vm14 }
   0x8   :  { %v54_v1 = vld [vmem:[#allocation1] ss:$0 sm:$0xff] }
   0x9   :  { %v56_v2 = vmul.f32 %v54_v1, %v54_v1  ;;  %v75_v3 = vmul.f32 0.0, %v54_v1  ;;  %v55_v6 = vld [vmem:[#allocation0] ss:$0 sm:$0xff]  ;;  %v114_v23 = vld [vmem:[#allocation0 + $0x1] ss:$0 sm:$0xff] }
   0xa   :  { %v175_v47 = vld [vmem:[#allocation0 + $0x2] ss:$0 sm:$0xff] }
   0xb   :  { %57 = vadd.xlane.f32.xlu0 %v56_v2  ;;  %76 = vadd.xlane.f32.xlu1 %v75_v3 }
   0xf   :  { %64 = vadd.xlane.f32.xlu0 %v75_v3 }
  0x98   :  { %v58_v7 = vpop.xlane.xlu0 %57  ;;  %v77_v13 = vpop.xlane.xlu1 %76 }
  0x99   :  { %v59_v8 = vsub.f32 %v55_v6, %v58_v7  ;;  %v78_v15 = vsub.f32 %v1581_v5, %v77_v13 }
  0x9b   :  { %1496 = vrsqrt.f32 %v59_v8 }
  0x9c   :  { %v65_v9 = vpop.xlane.xlu0 %64 }
  0x9d   :  { %v66_v10 = vsub.f32 %v1575_v4, %v65_v9 }
  0xa5   :  { %v1585_v11 = vpop.eup %1496 }
  0xa6   :  { %v67_v12 = vmul.f32 %v1585_v11, %v66_v10  ;;  %v79_v16 = vmul.f32 %v1585_v11, %v78_v15 }
  0xa8   :  { %v68_v14 = vsel %vm53_vm0, %v67_v12, 0.0  ;;  %v80_v17 = vsel %vm53_vm0, %v79_v16, 0.0 }
  0xa9   :  { %70 = vst [vmem:[#allocation1] sm:$0xff] %v68_v14 }
  0xb0   :  { %v1592_v18 = vld [vmem:[#allocation1 + $0x1] ss:$0 sm:$0xff] }
  0xb1   :  { %v122_v19 = vmul.f32 %v1592_v18, %v68_v14  ;;  %v115_v20 = vmul.f32 %v1592_v18, %v1592_v18  ;;  %v136_v21 = vmul.f32 %v1592_v18, %v80_v17 }
  0xb3   :  { %123 = vadd.xlane.f32.xlu0 %v122_v19  ;;  %116 = vadd.xlane.f32.xlu1 %v115_v20 }
  0xb7   :  { %137 = vadd.xlane.f32.xlu0 %v136_v21  ;;  %89 = vadd.xlane.f32.xlu1 %v75_v3 }
 0x140   :  { %v117_v24 = vpop.xlane.xlu1 %116  ;;  %v124_v26 = vpop.xlane.xlu0 %123 }
 0x141   :  { %v118_v25 = vsub.f32 %v114_v23, %v117_v24  ;;  %v125_v27 = vsub.f32 %v1575_v4, %v124_v26 }
 0x143   :  { %1498 = vrsqrt.f32 %v118_v25 }
 0x144   :  { %v90_v29 = vpop.xlane.xlu1 %89  ;;  %v138_v35 = vpop.xlane.xlu0 %137 }
 0x145   :  { %v91_v32 = vsub.f32 %v1601_v22, %v90_v29  ;;  %v139_v36 = vsub.f32 %v1581_v5, %v138_v35 }
 0x147   :  { %v92_v34 = vmul.f32 %v1585_v11, %v91_v32 }
 0x149   :  { %v93_v37 = vsel %vm53_vm0, %v92_v34, 0.0 }
 0x14a   :  { %v149_v43 = vmul.f32 %v1592_v18, %v93_v37 }
 0x14d   :  { %v1605_v28 = vpop.eup %1498 }
 0x14e   :  { %v126_v30 = vmul.f32 %v1605_v28, %v125_v27  ;;  %v140_v38 = vmul.f32 %v1605_v28, %v139_v36 }
 0x150   :  { %v129_v31 = vsel %vm128_vm3, %v126_v30, 0.0  ;;  %v141_v42 = vsel %vm110_vm1, %v140_v38, 0.0 }
 0x151   :  { %v130_v33 = vadd.f32 %v129_v31, %v68_v14  ;;  %v142_v44 = vadd.f32 %v141_v42, %v80_v17  ;;  %v236_v14 = vld [vmem:[#allocation0 + $0x3] ss:$0 sm:$0xff] }
 0x153   :  { %131 = vst [vmem:[#allocation1] sm:$0xff] %v130_v33 }
 0x15a   :  { %v1615_v39 = vld [vmem:[#allocation1 + $0x2] ss:$0 sm:$0xff] }
 0x15b   :  { %v183_v40 = vmul.f32 %v1615_v39, %v130_v33  ;;  %v176_v41 = vmul.f32 %v1615_v39, %v1615_v39  ;;  %v197_v45 = vmul.f32 %v1615_v39, %v142_v44 }
 0x15d   :  { %184 = vadd.xlane.f32.xlu0 %v183_v40  ;;  %177 = vadd.xlane.f32.xlu1 %v176_v41 }
 0x161   :  { %102 = vadd.xlane.f32.xlu1 %v75_v3  ;;  %150 = vadd.xlane.f32.xlu0 %v149_v43 }
 0x165   :  { %198 = vadd.xlane.f32.xlu1 %v197_v45 }
 0x1ea   :  { %v178_v48 = vpop.xlane.xlu1 %177  ;;  %v185_v50 = vpop.xlane.xlu0 %184 }
 0x1eb   :  { %v179_v49 = vsub.f32 %v175_v47, %v178_v48  ;;  %v186_v51 = vsub.f32 %v1575_v4, %v185_v50  ;;  %v297_v47 = vld [vmem:[#allocation0 + $0x4] ss:$0 sm:$0xff] }
 0x1ed   :  { %1500 = vrsqrt.f32 %v179_v49 }
 0x1ee   :  { %v151_v53 = vpop.xlane.xlu0 %150  ;;  %v103_v54 = vpop.xlane.xlu1 %102 }
 0x1ef   :  { %v152_v56 = vsub.f32 %v1601_v22, %v151_v53  ;;  %v104_v57 = vsub.f32 %v1626_v46, %v103_v54 }
 0x1f1   :  { %v153_v60 = vmul.f32 %v1605_v28, %v152_v56  ;;  %v105_v61 = vmul.f32 %v1585_v11, %v104_v57 }
 0x1f2   :  { %v199_v62 = vpop.xlane.xlu1 %198 }
 0x1f3   :  { %v154_v63 = vsel %vm110_vm1, %v153_v60, 0.0  ;;  %v106_v0 = vsel %vm53_vm0, %v105_v61, 0.0  ;;  %v200_v1 = vsub.f32 %v1581_v5, %v199_v62  ;;  %vm415_vm0 = vcmask 56368  }
 0x1f4   :  { %v155_v6 = vadd.f32 %v154_v63, %v93_v37  ;;  %v162_v11 = vmul.f32 %v1592_v18, %v106_v0 }
 0x1f6   :  { %v210_v10 = vmul.f32 %v1615_v39, %v155_v6 }
 0x1f7   :  { %v1630_v52 = vpop.eup %1500 }
 0x1f8   :  { %v187_v55 = vmul.f32 %v1630_v52, %v186_v51  ;;  %v201_v2 = vmul.f32 %v1630_v52, %v200_v1 }
 0x1fa   :  { %v190_v58 = vsel %vm189_vm6, %v187_v55, 0.0  ;;  %v202_v9 = vsel %vm171_vm4, %v201_v2, 0.0  ;;  %vm537_vm6 = vcmask 72768  }
 0x1fb   :  { %v191_v59 = vadd.f32 %v190_v58, %v130_v33  ;;  %v203_v12 = vadd.f32 %v202_v9, %v142_v44 }
 0x1fd   :  { %192 = vst [vmem:[#allocation1] sm:$0xff] %v191_v59 }
 0x204   :  { %v1643_v3 = vld [vmem:[#allocation1 + $0x3] ss:$0 sm:$0xff] }
 0x205   :  { %v244_v7 = vmul.f32 %v1643_v3, %v191_v59  ;;  %v237_v8 = vmul.f32 %v1643_v3, %v1643_v3  ;;  %v258_v13 = vmul.f32 %v1643_v3, %v203_v12 }
 0x207   :  { %245 = vadd.xlane.f32.xlu1 %v244_v7  ;;  %238 = vadd.xlane.f32.xlu0 %v237_v8 }
 0x20b   :  { %211 = vadd.xlane.f32.xlu1 %v210_v10  ;;  %163 = vadd.xlane.f32.xlu0 %v162_v11 }
 0x20f   :  { %259 = vadd.xlane.f32.xlu0 %v258_v13 }
 0x294   :  { %v239_v15 = vpop.xlane.xlu0 %238  ;;  %v246_v17 = vpop.xlane.xlu1 %245 }
 0x295   :  { %v240_v16 = vsub.f32 %v236_v14, %v239_v15  ;;  %v247_v19 = vsub.f32 %v1575_v4, %v246_v17  ;;  %v358_v15 = vld [vmem:[#allocation0 + $0x5] ss:$0 sm:$0xff] }
 0x297   :  { %1502 = vrsqrt.f32 %v240_v16 }
 0x298   :  { %v164_v18 = vpop.xlane.xlu0 %163  ;;  %v212_v21 = vpop.xlane.xlu1 %211 }
 0x299   :  { %v165_v25 = vsub.f32 %v1626_v46, %v164_v18  ;;  %v213_v26 = vsub.f32 %v1601_v22, %v212_v21 }
 0x29b   :  { %v166_v29 = vmul.f32 %v1605_v28, %v165_v25  ;;  %v214_v30 = vmul.f32 %v1630_v52, %v213_v26 }
 0x29c   :  { %v260_v31 = vpop.xlane.xlu0 %259 }
 0x29d   :  { %v167_v32 = vsel %vm110_vm1, %v166_v29, 0.0  ;;  %v215_v33 = vsel %vm171_vm4, %v214_v30, 0.0  ;;  %v261_v34 = vsub.f32 %v1581_v5, %v260_v31  ;;  %vm432_vm1 = vcmask 1047558  }
 0x29e   :  { %v168_v37 = vadd.f32 %v167_v32, %v106_v0  ;;  %v216_v38 = vadd.f32 %v215_v33, %v155_v6  ;;  %vm433_vm3 = vmand %vm415_vm0, %vm432_vm1 }
 0x2a0   :  { %v223_v42 = vmul.f32 %v1615_v39, %v168_v37  ;;  %v271_v43 = vmul.f32 %v1643_v3, %v216_v38 }
 0x2a1   :  { %v1653_v20 = vpop.eup %1502 }
 0x2a2   :  { %v248_v23 = vmul.f32 %v1653_v20, %v247_v19  ;;  %v262_v35 = vmul.f32 %v1653_v20, %v261_v34 }
 0x2a4   :  { %v251_v24 = vsel %vm250_vm9, %v248_v23, 0.0  ;;  %v263_v41 = vsel %vm232_vm7, %v262_v35, 0.0 }
 0x2a5   :  { %v252_v27 = vadd.f32 %v251_v24, %v191_v59  ;;  %v264_v44 = vadd.f32 %v263_v41, %v203_v12 }
 0x2a7   :  { %253 = vst [vmem:[#allocation1] sm:$0xff] %v252_v27 }
 0x2ae   :  { %v1666_v36 = vld [vmem:[#allocation1 + $0x4] ss:$0 sm:$0xff] }
 0x2af   :  { %v305_v40 = vmul.f32 %v1666_v36, %v252_v27  ;;  %v298_v28 = vmul.f32 %v1666_v36, %v1666_v36  ;;  %v319_v45 = vmul.f32 %v1666_v36, %v264_v44 }
 0x2b1   :  { %306 = vadd.xlane.f32.xlu0 %v305_v40  ;;  %299 = vadd.xlane.f32.xlu1 %v298_v28 }
 0x2b5   :  { %224 = vadd.xlane.f32.xlu1 %v223_v42  ;;  %272 = vadd.xlane.f32.xlu0 %v271_v43 }
 0x2b9   :  { %320 = vadd.xlane.f32.xlu1 %v319_v45 }
 0x33e   :  { %v300_v48 = vpop.xlane.xlu1 %299  ;;  %v307_v50 = vpop.xlane.xlu0 %306 }
 0x33f   :  { %v301_v49 = vsub.f32 %v297_v47, %v300_v48  ;;  %v308_v51 = vsub.f32 %v1575_v4, %v307_v50  ;;  %v419_v48 = vld [vmem:[#allocation0 + $0x6] ss:$0 sm:$0xff] }
 0x341   :  { %1504 = vrsqrt.f32 %v301_v49 }
 0x342   :  { %v273_v39 = vpop.xlane.xlu0 %272  ;;  %v225_v54 = vpop.xlane.xlu1 %224 }
 0x343   :  { %v274_v56 = vsub.f32 %v1601_v22, %v273_v39  ;;  %v226_v57 = vsub.f32 %v1626_v46, %v225_v54 }
 0x345   :  { %v275_v60 = vmul.f32 %v1653_v20, %v274_v56  ;;  %v227_v61 = vmul.f32 %v1630_v52, %v226_v57 }
 0x346   :  { %v321_v62 = vpop.xlane.xlu1 %320 }
 0x347   :  { %v276_v63 = vsel %vm232_vm7, %v275_v60, 0.0  ;;  %v228_v0 = vsel %vm171_vm4, %v227_v61, 0.0  ;;  %v322_v1 = vsub.f32 %v1581_v5, %v321_v62  ;;  %vm476_vm4 = vcmask 64568  }
 0x348   :  { %v277_v7 = vadd.f32 %v276_v63, %v216_v38  ;;  %v229_v8 = vadd.f32 %v228_v0, %v168_v37 }
 0x34a   :  { %v332_v11 = vmul.f32 %v1666_v36, %v277_v7  ;;  %v284_v12 = vmul.f32 %v1643_v3, %v229_v8 }
 0x34b   :  { %v1676_v53 = vpop.eup %1504 }
 0x34c   :  { %v309_v55 = vmul.f32 %v1676_v53, %v308_v51  ;;  %v323_v2 = vmul.f32 %v1676_v53, %v322_v1 }
 0x34e   :  { %v312_v58 = vsel %vm311_vm12, %v309_v55, 0.0  ;;  %v324_v52 = vsel %vm293_vm10, %v323_v2, 0.0 }
 0x34f   :  { %v313_v59 = vadd.f32 %v312_v58, %v252_v27  ;;  %v325_v13 = vadd.f32 %v324_v52, %v264_v44 }
 0x351   :  { %314 = vst [vmem:[#allocation1] sm:$0xff] %v313_v59 }
 0x358   :  { %v1689_v6 = vld [vmem:[#allocation1 + $0x5] ss:$0 sm:$0xff] }
 0x359   :  { %v366_v9 = vmul.f32 %v1689_v6, %v313_v59  ;;  %v359_v10 = vmul.f32 %v1689_v6, %v1689_v6  ;;  %v380_v14 = vmul.f32 %v1689_v6, %v325_v13 }
 0x35b   :  { %367 = vadd.xlane.f32.xlu1 %v366_v9  ;;  %360 = vadd.xlane.f32.xlu0 %v359_v10 }
 0x35f   :  { %333 = vadd.xlane.f32.xlu1 %v332_v11  ;;  %285 = vadd.xlane.f32.xlu0 %v284_v12 }
 0x363   :  { %381 = vadd.xlane.f32.xlu0 %v380_v14 }
 0x3e8   :  { %v361_v16 = vpop.xlane.xlu0 %360  ;;  %v368_v19 = vpop.xlane.xlu1 %367 }
 0x3e9   :  { %v362_v17 = vsub.f32 %v358_v15, %v361_v16  ;;  %v369_v18 = vsub.f32 %v1575_v4, %v368_v19 }
 0x3eb   :  { %1506 = vrsqrt.f32 %v362_v17 }
 0x3ec   :  { %v286_v3 = vpop.xlane.xlu0 %285  ;;  %v334_v23 = vpop.xlane.xlu1 %333 }
 0x3ed   :  { %v287_v26 = vsub.f32 %v1626_v46, %v286_v3  ;;  %v335_v27 = vsub.f32 %v1601_v22, %v334_v23 }
 0x3ef   :  { %v288_v30 = vmul.f32 %v1653_v20, %v287_v26  ;;  %v336_v31 = vmul.f32 %v1676_v53, %v335_v27 }
 0x3f0   :  { %v382_v32 = vpop.xlane.xlu0 %381 }
 0x3f1   :  { %v289_v33 = vsel %vm232_vm7, %v288_v30, 0.0  ;;  %v337_v34 = vsel %vm293_vm10, %v336_v31, 0.0  ;;  %v383_v35 = vsub.f32 %v1581_v5, %v382_v32  ;;  %vm586_vm7 = vcmask 80968  }
 0x3f2   :  { %v290_v40 = vadd.f32 %v289_v33, %v229_v8  ;;  %v338_v28 = vadd.f32 %v337_v34, %v277_v7  ;;  %vm606_vm9 = vmand %vm586_vm7, %vm127_vm2 }
 0x3f4   :  { %v345_v43 = vmul.f32 %v1666_v36, %v290_v40  ;;  %v393_v44 = vmul.f32 %v1689_v6, %v338_v28 }
 0x3f5   :  { %v1699_v21 = vpop.eup %1506 }
 0x3f6   :  { %v370_v24 = vmul.f32 %v1699_v21, %v369_v18  ;;  %v384_v37 = vmul.f32 %v1699_v21, %v383_v35  ;;  %v480_v18 = vld [vmem:[#allocation0 + $0x7] ss:$0 sm:$0xff] }
 0x3f8   :  { %v373_v25 = vsel %vm372_vm15, %v370_v24, 0.0  ;;  %v385_v20 = vsel %vm354_vm13, %v384_v37, 0.0 }
 0x3f9   :  { %v374_v29 = vadd.f32 %v373_v25, %v313_v59  ;;  %v386_v45 = vadd.f32 %v385_v20, %v325_v13 }
 0x3fb   :  { %375 = vst [vmem:[#allocation1] sm:$0xff] %v374_v29 }
 0x402   :  { %v417_v38 = vld [vmem:[#allocation1 + $0x6] ss:$0 sm:$0xff] }
 0x403   :  { %v427_v41 = vmul.f32 %v417_v38, %v374_v29  ;;  %v420_v42 = vmul.f32 %v417_v38, %v417_v38  ;;  %v441_v47 = vmul.f32 %v417_v38, %v386_v45 }
 0x405   :  { %428 = vadd.xlane.f32.xlu0 %v427_v41  ;;  %421 = vadd.xlane.f32.xlu1 %v420_v42 }
 0x409   :  { %346 = vadd.xlane.f32.xlu1 %v345_v43  ;;  %394 = vadd.xlane.f32.xlu0 %v393_v44 }
 0x40d   :  { %442 = vadd.xlane.f32.xlu1 %v441_v47 }
 0x492   :  { %v422_v49 = vpop.xlane.xlu1 %421  ;;  %v429_v54 = vpop.xlane.xlu0 %428 }
 0x493   :  { %v423_v50 = vsub.f32 %v419_v48, %v422_v49  ;;  %v430_v57 = vsub.f32 %v1575_v4, %v429_v54 }
 0x495   :  { %1508 = vrsqrt.f32 %v423_v50 }
 0x496   :  { %v347_v51 = vpop.xlane.xlu1 %346  ;;  %v395_v60 = vpop.xlane.xlu0 %394 }
 0x497   :  { %v348_v39 = vsub.f32 %v1626_v46, %v347_v51  ;;  %v396_v63 = vsub.f32 %v1601_v22, %v395_v60 }
 0x499   :  { %v349_v55 = vmul.f32 %v1676_v53, %v348_v39  ;;  %v397_v4 = vmul.f32 %v1699_v21, %v396_v63  ;;  %v541_v39 = vld [vmem:[#allocation0 + $0x8] ss:$0 sm:$0xff] }
 0x49a   :  { %v443_v61 = vpop.xlane.xlu1 %442 }
 0x49b   :  { %v350_v56 = vsel %vm293_vm10, %v349_v55, 0.0  ;;  %v444_v0 = vsub.f32 %v1581_v5, %v443_v61  ;;  %v398_v7 = vsel %vm354_vm13, %v397_v4, 0.0  ;;  %vm637_vm10 = vcmask 89168  }
 0x49c   :  { %v351_v36 = vadd.f32 %v350_v56, %v290_v40  ;;  %v399_v10 = vadd.f32 %v398_v7, %v338_v28  ;;  %vm657_vm12 = vmand %vm637_vm10, %vm188_vm5 }
 0x49e   :  { %v406_v58 = vmul.f32 %v1689_v6, %v351_v36  ;;  %v454_v12 = vmul.f32 %v417_v38, %v399_v10 }
 0x49f   :  { %v1509_v59 = vpop.eup %1508 }
 0x4a0   :  { %v431_v62 = vmul.f32 %v1509_v59, %v430_v57  ;;  %407 = vadd.xlane.f32.xlu1 %v406_v58  ;;  %v445_v2 = vmul.f32 %v1509_v59, %v444_v0 }
 0x4a2   :  { %v434_v53 = vsel %vm433_vm3, %v431_v62, 0.0  ;;  %v446_v6 = vsel %vm415_vm0, %v445_v2, 0.0 }
 0x4a3   :  { %v435_v1 = vadd.f32 %v434_v53, %v374_v29  ;;  %v447_v8 = vadd.f32 %v446_v6, %v386_v45 }
 0x4a5   :  { %436 = vst [vmem:[#allocation1] sm:$0xff] %v435_v1 }
 0x4ac   :  { %v478_v9 = vld [vmem:[#allocation1 + $0x7] ss:$0 sm:$0xff] }
 0x4ad   :  { %v481_v52 = vmul.f32 %v478_v9, %v478_v9  ;;  %v502_v11 = vmul.f32 %v478_v9, %v447_v8 }
 0x4af   :  { %482 = vadd.xlane.f32.xlu0 %v481_v52  ;;  %503 = vadd.xlane.f32.xlu1 %v502_v11 }
 0x4b3   :  { %455 = vadd.xlane.f32.xlu0 %v454_v12  ;;  %v590_v12 = vld [vmem:[#allocation0 + $0x9] ss:$0 sm:$0xff] }
 0x52d   :  { %v408_v13 = vpop.xlane.xlu1 %407 }
 0x52e   :  { %v409_v14 = vsub.f32 %v1626_v46, %v408_v13 }
 0x530   :  { %v410_v15 = vmul.f32 %v1699_v21, %v409_v14 }
 0x532   :  { %v411_v16 = vsel %vm354_vm13, %v410_v15, 0.0  ;;  %vm688_vm13 = vcmask 97368  }
 0x533   :  { %v412_v17 = vadd.f32 %v411_v16, %v351_v36  ;;  %vm708_vm15 = vmand %vm688_vm13, %vm249_vm8 }
 0x535   :  { %v467_v19 = vmul.f32 %v417_v38, %v412_v17 }
 0x537   :  { %468 = vadd.xlane.f32.xlu0 %v467_v19 }
 0x53c   :  { %v483_v3 = vpop.xlane.xlu0 %482  ;;  %v504_v27 = vpop.xlane.xlu1 %503 }
 0x53d   :  { %v484_v23 = vsub.f32 %v480_v18, %v483_v3  ;;  %v505_v31 = vsub.f32 %v1581_v5, %v504_v27 }
 0x53f   :  { %1510 = vrsqrt.f32 %v484_v23 }
 0x540   :  { %v456_v24 = vpop.xlane.xlu0 %455 }
 0x541   :  { %v457_v25 = vsub.f32 %v1601_v22, %v456_v24 }
 0x543   :  { %v458_v26 = vmul.f32 %v1509_v59, %v457_v25 }
 0x545   :  { %v459_v29 = vsel %vm415_vm0, %v458_v26, 0.0 }
 0x546   :  { %v460_v30 = vadd.f32 %v459_v29, %v399_v10 }
 0x548   :  { %v515_v21 = vmul.f32 %v478_v9, %v460_v30 }
 0x549   :  { %v1733_v32 = vpop.eup %1510 }
 0x54a   :  { %v506_v33 = vmul.f32 %v1733_v32, %v505_v31  ;;  %516 = vadd.xlane.f32.xlu1 %v515_v21 }
 0x54c   :  { %v507_v34 = vsel %vm476_vm4, %v506_v33, 0.0 }
 0x54d   :  { %v508_v35 = vadd.f32 %v507_v34, %v447_v8 }
 0x54f   :  { %510 = vst [vmem:[#allocation1 + $0x8] sm:$0xff] %v508_v35 }
 0x556   :  { %v539_v37 = vld [vmem:[#allocation1 + $0x8] ss:$0 sm:$0xff] }
 0x557   :  { %v551_v38 = vmul.f32 %v539_v37, %v508_v35  ;;  %v542_v40 = vmul.f32 %v539_v37, %v539_v37 }
 0x559   :  { %552 = vadd.xlane.f32.xlu1 %v551_v38  ;;  %543 = vadd.xlane.f32.xlu0 %v542_v40 }
 0x5c4   :  { %v469_v28 = vpop.xlane.xlu0 %468 }
 0x5c5   :  { %v470_v41 = vsub.f32 %v1626_v46, %v469_v28  ;;  %v641_v28 = vld [vmem:[#allocation0 + $0xa] ss:$0 sm:$0xff] }
 0x5c7   :  { %v471_v42 = vmul.f32 %v1509_v59, %v470_v41 }
 0x5c9   :  { %v472_v20 = vsel %vm415_vm0, %v471_v42, 0.0  ;;  %vm739_vm0 = vcmask 105568  }
 0x5ca   :  { %v473_v43 = vadd.f32 %v472_v20, %v412_v17  ;;  %vm759_vm3 = vmand %vm739_vm0, %vm310_vm11 }
 0x5cc   :  { %v528_v44 = vmul.f32 %v478_v9, %v473_v43 }
 0x5ce   :  { %529 = vadd.xlane.f32.xlu0 %v528_v44 }
 0x5d7   :  { %v517_v45 = vpop.xlane.xlu1 %516 }
 0x5d8   :  { %v518_v47 = vsub.f32 %v1601_v22, %v517_v45 }
 0x5da   :  { %v519_v48 = vmul.f32 %v1733_v32, %v518_v47 }
 0x5dc   :  { %v520_v49 = vsel %vm476_vm4, %v519_v48, 0.0 }
 0x5dd   :  { %v521_v50 = vadd.f32 %v520_v49, %v460_v30 }
 0x5df   :  { %v564_v51 = vmul.f32 %v539_v37, %v521_v50 }
 0x5e1   :  { %565 = vadd.xlane.f32.xlu1 %v564_v51 }
 0x5e6   :  { %v544_v54 = vpop.xlane.xlu0 %543  ;;  %v553_v56 = vpop.xlane.xlu1 %552 }
 0x5e7   :  { %v545_v55 = vsub.f32 %v541_v39, %v544_v54  ;;  %v554_v36 = vsub.f32 %v1581_v5, %v553_v56 }
 0x5e9   :  { %1512 = vrsqrt.f32 %v545_v55 }
 0x5f3   :  { %v1513_v57 = vpop.eup %1512 }
 0x5f4   :  { %v555_v58 = vmul.f32 %v1513_v57, %v554_v36 }
 0x5f6   :  { %v556_v59 = vsel %vm537_vm6, %v555_v58, 0.0 }
 0x5f7   :  { %v557_v60 = vadd.f32 %v556_v59, %v508_v35 }
 0x5f9   :  { %559 = vst [vmem:[#allocation1 + $0x8] sm:$0xff] %v557_v60 }
 0x600   :  { %v588_v61 = vld [vmem:[#allocation1 + $0x9] ss:$0 sm:$0xff] }
 0x601   :  { %v600_v62 = vmul.f32 %v588_v61, %v557_v60  ;;  %v591_v63 = vmul.f32 %v588_v61, %v588_v61 }
 0x603   :  { %601 = vadd.xlane.f32.xlu1 %v600_v62  ;;  %592 = vadd.xlane.f32.xlu0 %v591_v63 }
 0x65b   :  { %v530_v53 = vpop.xlane.xlu0 %529 }
 0x65c   :  { %v531_v0 = vsub.f32 %v1626_v46, %v530_v53  ;;  %v692_v53 = vld [vmem:[#allocation0 + $0xb] ss:$0 sm:$0xff] }
 0x65e   :  { %v532_v1 = vmul.f32 %v1733_v32, %v531_v0 }
 0x660   :  { %v533_v2 = vsel %vm476_vm4, %v532_v1, 0.0 }
 0x661   :  { %v534_v4 = vadd.f32 %v533_v2, %v473_v43 }
 0x663   :  { %v577_v6 = vmul.f32 %v539_v37, %v534_v4 }
 0x665   :  { %578 = vadd.xlane.f32.xlu0 %v577_v6 }
 0x66e   :  { %v566_v7 = vpop.xlane.xlu1 %565 }
 0x66f   :  { %v567_v8 = vsub.f32 %v1601_v22, %v566_v7 }
 0x671   :  { %v568_v9 = vmul.f32 %v1513_v57, %v567_v8 }
 0x673   :  { %v569_v10 = vsel %vm537_vm6, %v568_v9, 0.0 }
 0x674   :  { %v570_v52 = vadd.f32 %v569_v10, %v521_v50 }
 0x676   :  { %v615_v11 = vmul.f32 %v588_v61, %v570_v52 }
 0x678   :  { %616 = vadd.xlane.f32.xlu1 %v615_v11 }
 0x690   :  { %v593_v13 = vpop.xlane.xlu0 %592  ;;  %v602_v15 = vpop.xlane.xlu1 %601 }
 0x691   :  { %v594_v14 = vsub.f32 %v590_v12, %v593_v13  ;;  %v603_v16 = vsub.f32 %v1581_v5, %v602_v15 }
 0x693   :  { %1514 = vrsqrt.f32 %v594_v14 }
 0x69d   :  { %v1515_v17 = vpop.eup %1514 }
 0x69e   :  { %v604_v19 = vmul.f32 %v1515_v17, %v603_v16 }
 0x6a0   :  { %v607_v18 = vsel %vm606_vm9, %v604_v19, 0.0  ;;  %vm841_vm9 = vcmask 121968  }
 0x6a1   :  { %v608_v3 = vadd.f32 %v607_v18, %v557_v60 }
 0x6a3   :  { %610 = vst [vmem:[#allocation1 + $0x8] sm:$0xff] %v608_v3 }
 0x6aa   :  { %v639_v23 = vld [vmem:[#allocation1 + $0xa] ss:$0 sm:$0xff] }
 0x6ab   :  { %v651_v24 = vmul.f32 %v639_v23, %v608_v3  ;;  %v642_v25 = vmul.f32 %v639_v23, %v639_v23 }
 0x6ad   :  { %652 = vadd.xlane.f32.xlu1 %v651_v24  ;;  %643 = vadd.xlane.f32.xlu0 %v642_v25  ;;  %v743_v25 = vld [vmem:[#allocation0 + $0xc] ss:$0 sm:$0xff] }
 0x6f2   :  { %v579_v26 = vpop.xlane.xlu0 %578 }
 0x6f3   :  { %v580_v27 = vsub.f32 %v1626_v46, %v579_v26 }
 0x6f5   :  { %v581_v29 = vmul.f32 %v1513_v57, %v580_v27 }
 0x6f7   :  { %v582_v30 = vsel %vm537_vm6, %v581_v29, 0.0  ;;  %v1770_v29 = vld [vmem:[#allocation0 + $0x8] sm:$0xff]  ;;  %vm790_vm6 = vcmask 113768  }
 0x6f8   :  { %v583_v31 = vadd.f32 %v582_v30, %v534_v4 }
 0x6fa   :  { %v628_v21 = vmul.f32 %v588_v61, %v583_v31 }
 0x6fc   :  { %629 = vadd.xlane.f32.xlu0 %v628_v21 }
 0x705   :  { %v617_v33 = vpop.xlane.xlu1 %616 }
 0x706   :  { %v618_v34 = vsub.f32 %v1601_v22, %v617_v33 }
 0x708   :  { %v619_v35 = vmul.f32 %v1515_v17, %v618_v34 }
 0x70a   :  { %v620_v37 = vsel %vm586_vm7, %v619_v35, 0.0 }
 0x70b   :  { %v621_v38 = vadd.f32 %v620_v37, %v570_v52 }
 0x70d   :  { %v666_v40 = vmul.f32 %v639_v23, %v621_v38 }
 0x70f   :  { %667 = vadd.xlane.f32.xlu1 %v666_v40 }
 0x73a   :  { %v644_v41 = vpop.xlane.xlu0 %643  ;;  %v653_v20 = vpop.xlane.xlu1 %652 }
 0x73b   :  { %v645_v42 = vsub.f32 %v641_v28, %v644_v41  ;;  %v654_v43 = vsub.f32 %v1581_v5, %v653_v20 }
 0x73d   :  { %1516 = vrsqrt.f32 %v645_v42 }
 0x747   :  { %v1517_v44 = vpop.eup %1516 }
 0x748   :  { %v655_v45 = vmul.f32 %v1517_v44, %v654_v43 }
 0x74a   :  { %v658_v47 = vsel %vm657_vm12, %v655_v45, 0.0  ;;  %vm892_vm12 = vcmask 130168  }
 0x74b   :  { %v659_v48 = vadd.f32 %v658_v47, %v608_v3 }
 0x74d   :  { %661 = vst [vmem:[#allocation1 + $0x8] sm:$0xff] %v659_v48 }
 0x754   :  { %v690_v49 = vld [vmem:[#allocation1 + $0xb] ss:$0 sm:$0xff] }
 0x755   :  { %v702_v50 = vmul.f32 %v690_v49, %v659_v48  ;;  %v693_v51 = vmul.f32 %v690_v49, %v690_v49 }
 0x757   :  { %703 = vadd.xlane.f32.xlu1 %v702_v50  ;;  %694 = vadd.xlane.f32.xlu0 %v693_v51 }
 0x789   :  { %v630_v39 = vpop.xlane.xlu0 %629 }
 0x78a   :  { %v631_v54 = vsub.f32 %v1626_v46, %v630_v39  ;;  %v794_v39 = vld [vmem:[#allocation0 + $0xd] ss:$0 sm:$0xff] }
 0x78c   :  { %v632_v55 = vmul.f32 %v1515_v17, %v631_v54 }
 0x78e   :  { %v633_v56 = vsel %vm586_vm7, %v632_v55, 0.0  ;;  %vm810_vm7 = vmand %vm790_vm6, %vm371_vm14 }
 0x78f   :  { %v634_v36 = vadd.f32 %v633_v56, %v583_v31 }
 0x791   :  { %v679_v57 = vmul.f32 %v639_v23, %v634_v36 }
 0x793   :  { %680 = vadd.xlane.f32.xlu0 %v679_v57 }
 0x79c   :  { %v668_v58 = vpop.xlane.xlu1 %667 }
 0x79d   :  { %v669_v59 = vsub.f32 %v1601_v22, %v668_v58 }
 0x79f   :  { %v670_v60 = vmul.f32 %v1517_v44, %v669_v59 }
 0x7a1   :  { %v671_v61 = vsel %vm637_vm10, %v670_v60, 0.0  ;;  %v1784_v60 = vld [vmem:[#allocation0 + $0x18] sm:$0xff] }
 0x7a2   :  { %v672_v62 = vadd.f32 %v671_v61, %v621_v38 }
 0x7a4   :  { %v717_v63 = vmul.f32 %v690_v49, %v672_v62 }
 0x7a6   :  { %718 = vadd.xlane.f32.xlu1 %v717_v63 }
 0x7e4   :  { %v695_v0 = vpop.xlane.xlu0 %694  ;;  %v704_v2 = vpop.xlane.xlu1 %703 }
 0x7e5   :  { %v696_v1 = vsub.f32 %v692_v53, %v695_v0  ;;  %v705_v4 = vsub.f32 %v1581_v5, %v704_v2 }
 0x7e7   :  { %1518 = vrsqrt.f32 %v696_v1 }
 0x7f1   :  { %v1519_v6 = vpop.eup %1518 }
 0x7f2   :  { %v706_v7 = vmul.f32 %v1519_v6, %v705_v4 }
 0x7f4   :  { %v709_v8 = vsel %vm708_vm15, %v706_v7, 0.0  ;;  %vm979_vm15 = vcmask 146568  }
 0x7f5   :  { %v710_v9 = vadd.f32 %v709_v8, %v659_v48 }
 0x7f7   :  { %712 = vst [vmem:[#allocation1 + $0x8] sm:$0xff] %v710_v9 }
 0x7fe   :  { %v741_v10 = vld [vmem:[#allocation1 + $0xc] ss:$0 sm:$0xff] }
 0x7ff   :  { %v753_v52 = vmul.f32 %v741_v10, %v710_v9  ;;  %v744_v11 = vmul.f32 %v741_v10, %v741_v10 }
 0x801   :  { %754 = vadd.xlane.f32.xlu1 %v753_v52  ;;  %745 = vadd.xlane.f32.xlu0 %v744_v11 }
 0x820   :  { %v681_v12 = vpop.xlane.xlu0 %680 }
 0x821   :  { %v682_v13 = vsub.f32 %v1626_v46, %v681_v12  ;;  %v845_v12 = vld [vmem:[#allocation0 + $0xe] ss:$0 sm:$0xff] }
 0x823   :  { %v683_v14 = vmul.f32 %v1517_v44, %v682_v13  ;;  %v1777_v44 = vld [vmem:[#allocation0 + $0x10] sm:$0xff] }
 0x825   :  { %v684_v15 = vsel %vm637_vm10, %v683_v14, 0.0  ;;  %vm861_vm10 = vmand %vm841_vm9, %vm432_vm1 }
 0x826   :  { %v685_v5 = vadd.f32 %v684_v15, %v634_v36 }
 0x828   :  { %v730_v16 = vmul.f32 %v690_v49, %v685_v5 }
 0x82a   :  { %731 = vadd.xlane.f32.xlu0 %v730_v16 }
 0x833   :  { %v719_v17 = vpop.xlane.xlu1 %718 }
 0x834   :  { %v720_v19 = vsub.f32 %v1601_v22, %v719_v17 }
 0x836   :  { %v721_v18 = vmul.f32 %v1519_v6, %v720_v19 }
 0x838   :  { %v722_v3 = vsel %vm688_vm13, %v721_v18, 0.0 }
 0x839   :  { %v723_v23 = vadd.f32 %v722_v3, %v672_v62 }
 0x83b   :  { %v768_v24 = vmul.f32 %v741_v10, %v723_v23 }
 0x83d   :  { %769 = vadd.xlane.f32.xlu1 %v768_v24 }
 0x88e   :  { %v746_v26 = vpop.xlane.xlu0 %745  ;;  %v755_v30 = vpop.xlane.xlu1 %754 }
 0x88f   :  { %v747_v27 = vsub.f32 %v743_v25, %v746_v26  ;;  %v756_v31 = vsub.f32 %v1770_v29, %v755_v30 }
 0x891   :  { %1520 = vrsqrt.f32 %v747_v27 }
 0x89b   :  { %v1521_v21 = vpop.eup %1520 }
 0x89c   :  { %v757_v22 = vmul.f32 %v1521_v21, %v756_v31 }
 0x89e   :  { %v760_v33 = vsel %vm759_vm3, %v757_v22, 0.0  ;;  %vm1017_vm3 = vcmask 154768  }
 0x89f   :  { %v761_v34 = vadd.f32 %v760_v33, %v710_v9 }
 0x8a1   :  { %763 = vst [vmem:[#allocation1 + $0x8] sm:$0xff] %v761_v34 }
 0x8a8   :  { %v792_v35 = vld [vmem:[#allocation1 + $0xd] ss:$0 sm:$0xff] }
 0x8a9   :  { %v804_v37 = vmul.f32 %v792_v35, %v761_v34  ;;  %v795_v38 = vmul.f32 %v792_v35, %v792_v35 }
 0x8ab   :  { %805 = vadd.xlane.f32.xlu1 %v804_v37  ;;  %796 = vadd.xlane.f32.xlu0 %v795_v38 }
 0x8b7   :  { %v732_v40 = vpop.xlane.xlu0 %731 }
 0x8b8   :  { %v733_v28 = vsub.f32 %v1626_v46, %v732_v40 }
 0x8ba   :  { %v734_v41 = vmul.f32 %v1519_v6, %v733_v28 }
 0x8bc   :  { %v735_v42 = vsel %vm688_vm13, %v734_v41, 0.0  ;;  %vm943_vm13 = vcmask 138368  }
 0x8bd   :  { %v736_v20 = vadd.f32 %v735_v42, %v685_v5 }
 0x8bf   :  { %v781_v43 = vmul.f32 %v741_v10, %v736_v20 }
 0x8c1   :  { %782 = vadd.xlane.f32.xlu0 %v781_v43 }
 0x8ca   :  { %v770_v45 = vpop.xlane.xlu1 %769 }
 0x8cb   :  { %v771_v47 = vsub.f32 %v1777_v44, %v770_v45 }
 0x8cd   :  { %v772_v48 = vmul.f32 %v1521_v21, %v771_v47 }
 0x8cf   :  { %v773_v49 = vsel %vm739_vm0, %v772_v48, 0.0 }
 0x8d0   :  { %v774_v50 = vadd.f32 %v773_v49, %v723_v23 }
 0x8d2   :  { %v819_v51 = vmul.f32 %v792_v35, %v774_v50 }
 0x8d4   :  { %820 = vadd.xlane.f32.xlu1 %v819_v51 }
 0x938   :  { %v797_v54 = vpop.xlane.xlu0 %796  ;;  %v806_v55 = vpop.xlane.xlu1 %805 }
 0x939   :  { %v798_v46 = vsub.f32 %v794_v39, %v797_v54  ;;  %v807_v56 = vsub.f32 %v1770_v29, %v806_v55 }
 0x93b   :  { %1522 = vrsqrt.f32 %v798_v46 }
 0x945   :  { %v1523_v36 = vpop.eup %1522 }
 0x946   :  { %v808_v57 = vmul.f32 %v1523_v36, %v807_v56 }
 0x948   :  { %v811_v58 = vsel %vm810_vm7, %v808_v57, 0.0  ;;  %vm1055_vm7 = vcmask 162968  }
 0x949   :  { %v812_v59 = vadd.f32 %v811_v58, %v761_v34 }
 0x94b   :  { %814 = vst [vmem:[#allocation1 + $0x8] sm:$0xff] %v812_v59 }
 0x94e   :  { %v783_v61 = vpop.xlane.xlu0 %782 }
 0x94f   :  { %v784_v62 = vsub.f32 %v1784_v60, %v783_v61 }
 0x951   :  { %v785_v63 = vmul.f32 %v1521_v21, %v784_v62  ;;  %v947_v62 = vld [vmem:[#allocation0 + $0x10] ss:$0 sm:$0xff] }
 0x952   :  { %v843_v53 = vld [vmem:[#allocation1 + $0xe] ss:$0 sm:$0xff] }
 0x953   :  { %v855_v0 = vmul.f32 %v843_v53, %v812_v59  ;;  %v846_v1 = vmul.f32 %v843_v53, %v843_v53  ;;  %v786_v2 = vsel %vm739_vm0, %v785_v63, 0.0  ;;  %vm999_vm0 = vmand %vm979_vm15, %vm127_vm2 }
 0x954   :  { %v787_v4 = vadd.f32 %v786_v2, %v736_v20  ;;  %v896_v20 = vld [vmem:[#allocation0 + $0xf] ss:$0 sm:$0xff] }
 0x955   :  { %856 = vadd.xlane.f32.xlu1 %v855_v0  ;;  %847 = vadd.xlane.f32.xlu0 %v846_v1 }
 0x956   :  { %v832_v6 = vmul.f32 %v792_v35, %v787_v4 }
 0x959   :  { %833 = vadd.xlane.f32.xlu0 %v832_v6 }
 0x961   :  { %v821_v7 = vpop.xlane.xlu1 %820 }
 0x962   :  { %v822_v8 = vsub.f32 %v1777_v44, %v821_v7 }
 0x964   :  { %v823_v9 = vmul.f32 %v1523_v36, %v822_v8 }
 0x966   :  { %v824_v10 = vsel %vm790_vm6, %v823_v9, 0.0 }
 0x967   :  { %v825_v52 = vadd.f32 %v824_v10, %v774_v50 }
 0x969   :  { %v870_v11 = vmul.f32 %v843_v53, %v825_v52 }
 0x96b   :  { %871 = vadd.xlane.f32.xlu1 %v870_v11 }
 0x9e2   :  { %v848_v13 = vpop.xlane.xlu0 %847  ;;  %v857_v17 = vpop.xlane.xlu1 %856 }
 0x9e3   :  { %v849_v14 = vsub.f32 %v845_v12, %v848_v13  ;;  %v858_v3 = vsub.f32 %v1770_v29, %v857_v17 }
 0x9e5   :  { %1524 = vrsqrt.f32 %v849_v14 }
 0x9e6   :  { %v834_v15 = vpop.xlane.xlu0 %833 }
 0x9e7   :  { %v835_v5 = vsub.f32 %v1784_v60, %v834_v15 }
 0x9e9   :  { %v836_v16 = vmul.f32 %v1523_v36, %v835_v5  ;;  %v983_v5 = vld [vmem:[#allocation0 + $0x11] ss:$0 sm:$0xff] }
 0x9eb   :  { %v837_v19 = vsel %vm790_vm6, %v836_v16, 0.0  ;;  %vm1037_vm6 = vmand %vm1017_vm3, %vm188_vm5 }
 0x9ec   :  { %v838_v18 = vadd.f32 %v837_v19, %v787_v4 }
 0x9ee   :  { %v883_v23 = vmul.f32 %v843_v53, %v838_v18 }
 0x9ef   :  { %v1525_v24 = vpop.eup %1524 }
 0x9f0   :  { %v859_v25 = vmul.f32 %v1525_v24, %v858_v3  ;;  %884 = vadd.xlane.f32.xlu1 %v883_v23 }
 0x9f2   :  { %v862_v26 = vsel %vm861_vm10, %v859_v25, 0.0  ;;  %vm1093_vm10 = vcmask 171168  }
 0x9f3   :  { %v1795_v27 = vadd.f32 %v862_v26, %v812_v59 }
 0x9f5   :  { %865 = vst [vmem:[#allocation1 + $0x8] sm:$0xff] %v1795_v27 }
 0x9f8   :  { %v872_v30 = vpop.xlane.xlu1 %871 }
 0x9f9   :  { %v873_v31 = vsub.f32 %v1777_v44, %v872_v30 }
 0x9fb   :  { %v874_v21 = vmul.f32 %v1525_v24, %v873_v31 }
 0x9fc   :  { %v1799_v22 = vld [vmem:[#allocation1 + $0xf] ss:$0 sm:$0xff] }
 0x9fd   :  { %v897_v29 = vmul.f32 %v1799_v22, %v1799_v22  ;;  %v875_v33 = vsel %vm841_vm9, %v874_v21, 0.0 }
 0x9fe   :  { %v876_v34 = vadd.f32 %v875_v33, %v825_v52 }
 0x9ff   :  { %898 = vadd.xlane.f32.xlu0 %v897_v29 }
 0xa00   :  { %v921_v35 = vmul.f32 %v1799_v22, %v876_v34 }
 0xa03   :  { %922 = vadd.xlane.f32.xlu0 %v921_v35 }
 0xa7d   :  { %v885_v37 = vpop.xlane.xlu1 %884 }
 0xa7e   :  { %v886_v38 = vsub.f32 %v1784_v60, %v885_v37 }
 0xa80   :  { %v887_v40 = vmul.f32 %v1525_v24, %v886_v38  ;;  %v1021_v38 = vld [vmem:[#allocation0 + $0x12] ss:$0 sm:$0xff] }
 0xa82   :  { %v888_v28 = vsel %vm841_vm9, %v887_v40, 0.0  ;;  %vm1075_vm9 = vmand %vm1055_vm7, %vm249_vm8 }
 0xa83   :  { %v889_v41 = vadd.f32 %v888_v28, %v838_v18 }
 0xa85   :  { %v934_v42 = vmul.f32 %v1799_v22, %v889_v41 }
 0xa87   :  { %935 = vadd.xlane.f32.xlu1 %v934_v42 }
 0xa8c   :  { %v899_v43 = vpop.xlane.xlu0 %898 }
 0xa8d   :  { %v900_v45 = vsub.f32 %v896_v20, %v899_v43 }
 0xa8f   :  { %1526 = vrsqrt.f32 %v900_v45 }
 0xa90   :  { %v923_v47 = vpop.xlane.xlu0 %922 }
 0xa91   :  { %v924_v48 = vsub.f32 %v1777_v44, %v923_v47 }
 0xa99   :  { %v1809_v49 = vpop.eup %1526 }
 0xa9a   :  { %v925_v50 = vmul.f32 %v1809_v49, %v924_v48 }
 0xa9c   :  { %v926_v51 = vsel %vm892_vm12, %v925_v50, 0.0 }
 0xa9d   :  { %v927_v39 = vadd.f32 %v926_v51, %v876_v34 }
 0xa9f   :  { %929 = vst [vmem:[#allocation1 + $0x10] sm:$0xff] %v927_v39 }
 0xaa6   :  { %v945_v54 = vld [vmem:[#allocation1 + $0x10] ss:$0 sm:$0xff] }
 0xaa7   :  { %v948_v46 = vmul.f32 %v945_v54, %v945_v54  ;;  %v957_v55 = vmul.f32 %v945_v54, %v927_v39 }
 0xaa9   :  { %949 = vadd.xlane.f32.xlu0 %v948_v46  ;;  %958 = vadd.xlane.f32.xlu1 %v957_v55 }
 0xb14   :  { %v936_v56 = vpop.xlane.xlu1 %935 }
 0xb15   :  { %v937_v36 = vsub.f32 %v1784_v60, %v936_v56 }
 0xb17   :  { %v938_v57 = vmul.f32 %v1809_v49, %v937_v36 }
 0xb19   :  { %v939_v58 = vsel %vm892_vm12, %v938_v57, 0.0  ;;  %v1059_v57 = vld [vmem:[#allocation0 + $0x13] ss:$0 sm:$0xff] }
 0xb1a   :  { %v940_v59 = vadd.f32 %v939_v58, %v889_v41 }
 0xb1c   :  { %v970_v61 = vmul.f32 %v945_v54, %v940_v59 }
 0xb1e   :  { %971 = vadd.xlane.f32.xlu0 %v970_v61 }
 0xb36   :  { %v950_v63 = vpop.xlane.xlu0 %949  ;;  %v959_v0 = vpop.xlane.xlu1 %958 }
 0xb37   :  { %v951_v53 = vsub.f32 %v947_v62, %v950_v63  ;;  %v960_v1 = vsub.f32 %v1777_v44, %v959_v0 }
 0xb39   :  { %1528 = vrsqrt.f32 %v951_v53 }
 0xb43   :  { %v1529_v2 = vpop.eup %1528 }
 0xb44   :  { %v961_v4 = vmul.f32 %v1529_v2, %v960_v1 }
 0xb46   :  { %v962_v6 = vsel %vm943_vm13, %v961_v4, 0.0 }
 0xb47   :  { %v963_v7 = vadd.f32 %v962_v6, %v927_v39 }
 0xb49   :  { %965 = vst [vmem:[#allocation1 + $0x10] sm:$0xff] %v963_v7 }
 0xb50   :  { %v981_v8 = vld [vmem:[#allocation1 + $0x11] ss:$0 sm:$0xff] }
 0xb51   :  { %v993_v9 = vmul.f32 %v981_v8, %v963_v7  ;;  %v984_v10 = vmul.f32 %v981_v8, %v981_v8 }
 0xb53   :  { %994 = vadd.xlane.f32.xlu0 %v993_v9  ;;  %985 = vadd.xlane.f32.xlu1 %v984_v10 }
 0xbab   :  { %v972_v52 = vpop.xlane.xlu0 %971 }
 0xbac   :  { %v973_v11 = vsub.f32 %v1784_v60, %v972_v52 }
 0xbae   :  { %v974_v12 = vmul.f32 %v1529_v2, %v973_v11 }
 0xbb0   :  { %v975_v13 = vsel %vm943_vm13, %v974_v12, 0.0  ;;  %v1097_v12 = vld [vmem:[#allocation0 + $0x14] ss:$0 sm:$0xff]  ;;  %vm1113_vm13 = vmand %vm1093_vm10, %vm310_vm11 }
 0xbb1   :  { %v976_v14 = vadd.f32 %v975_v13, %v940_v59 }
 0xbb3   :  { %v1008_v15 = vmul.f32 %v981_v8, %v976_v14 }
 0xbb5   :  { %1009 = vadd.xlane.f32.xlu1 %v1008_v15 }
 0xbe0   :  { %v986_v16 = vpop.xlane.xlu1 %985  ;;  %v995_v19 = vpop.xlane.xlu0 %994 }
 0xbe1   :  { %v987_v17 = vsub.f32 %v983_v5, %v986_v16  ;;  %v996_v18 = vsub.f32 %v1777_v44, %v995_v19 }
 0xbe3   :  { %1530 = vrsqrt.f32 %v987_v17 }
 0xbed   :  { %v1531_v3 = vpop.eup %1530 }
 0xbee   :  { %v997_v23 = vmul.f32 %v1531_v3, %v996_v18 }
 0xbf0   :  { %v1000_v24 = vsel %vm999_vm0, %v997_v23, 0.0 }
 0xbf1   :  { %v1001_v25 = vadd.f32 %v1000_v24, %v963_v7 }
 0xbf3   :  { %1003 = vst [vmem:[#allocation1 + $0x10] sm:$0xff] %v1001_v25 }
 0xbfa   :  { %v1019_v26 = vld [vmem:[#allocation1 + $0x12] ss:$0 sm:$0xff] }
 0xbfb   :  { %v1031_v30 = vmul.f32 %v1019_v26, %v1001_v25  ;;  %v1022_v31 = vmul.f32 %v1019_v26, %v1019_v26 }
 0xbfd   :  { %1032 = vadd.xlane.f32.xlu1 %v1031_v30  ;;  %1023 = vadd.xlane.f32.xlu0 %v1022_v31 }
 0xc42   :  { %v1010_v21 = vpop.xlane.xlu1 %1009 }
 0xc43   :  { %v1011_v29 = vsub.f32 %v1784_v60, %v1010_v21 }
 0xc45   :  { %v1012_v33 = vmul.f32 %v1531_v3, %v1011_v29 }
 0xc47   :  { %v1013_v34 = vsel %vm979_vm15, %v1012_v33, 0.0  ;;  %v1135_v33 = vld [vmem:[#allocation0 + $0x15] ss:$0 sm:$0xff]  ;;  %vm1131_vm15 = vcmask 179368  }
 0xc48   :  { %v1014_v35 = vadd.f32 %v1013_v34, %v976_v14  ;;  %vm1151_vm0 = vmand %vm1131_vm15, %vm371_vm14 }
 0xc4a   :  { %v1046_v37 = vmul.f32 %v1019_v26, %v1014_v35 }
 0xc4c   :  { %1047 = vadd.xlane.f32.xlu0 %v1046_v37 }
 0xc8a   :  { %v1024_v40 = vpop.xlane.xlu0 %1023  ;;  %v1033_v41 = vpop.xlane.xlu1 %1032 }
 0xc8b   :  { %v1025_v28 = vsub.f32 %v1021_v38, %v1024_v40  ;;  %v1034_v42 = vsub.f32 %v1777_v44, %v1033_v41 }
 0xc8d   :  { %1532 = vrsqrt.f32 %v1025_v28 }
 0xc97   :  { %v1533_v20 = vpop.eup %1532 }
 0xc98   :  { %v1035_v43 = vmul.f32 %v1533_v20, %v1034_v42 }
 0xc9a   :  { %v1038_v45 = vsel %vm1037_vm6, %v1035_v43, 0.0 }
 0xc9b   :  { %v1039_v47 = vadd.f32 %v1038_v45, %v1001_v25 }
 0xc9d   :  { %1041 = vst [vmem:[#allocation1 + $0x10] sm:$0xff] %v1039_v47 }
 0xca4   :  { %v1057_v48 = vld [vmem:[#allocation1 + $0x13] ss:$0 sm:$0xff] }
 0xca5   :  { %v1069_v50 = vmul.f32 %v1057_v48, %v1039_v47  ;;  %v1060_v51 = vmul.f32 %v1057_v48, %v1057_v48 }
 0xca7   :  { %1070 = vadd.xlane.f32.xlu0 %v1069_v50  ;;  %1061 = vadd.xlane.f32.xlu1 %v1060_v51 }
 0xcd9   :  { %v1048_v39 = vpop.xlane.xlu0 %1047 }
 0xcda   :  { %v1049_v54 = vsub.f32 %v1784_v60, %v1048_v39 }
 0xcdc   :  { %v1050_v46 = vmul.f32 %v1533_v20, %v1049_v54 }
 0xcde   :  { %v1051_v55 = vsel %vm1017_vm3, %v1050_v46, 0.0  ;;  %v1173_v46 = vld [vmem:[#allocation0 + $0x16] ss:$0 sm:$0xff]  ;;  %vm1169_vm3 = vcmask 187568  }
 0xcdf   :  { %v1052_v56 = vadd.f32 %v1051_v55, %v1014_v35  ;;  %vm1189_vm6 = vmand %vm1169_vm3, %vm432_vm1 }
 0xce1   :  { %v1084_v36 = vmul.f32 %v1057_v48, %v1052_v56 }
 0xce3   :  { %1085 = vadd.xlane.f32.xlu1 %v1084_v36 }
 0xd34   :  { %v1062_v58 = vpop.xlane.xlu1 %1061  ;;  %v1071_v61 = vpop.xlane.xlu0 %1070 }
 0xd35   :  { %v1063_v59 = vsub.f32 %v1059_v57, %v1062_v58  ;;  %v1072_v62 = vsub.f32 %v1777_v44, %v1071_v61 }
 0xd37   :  { %1534 = vrsqrt.f32 %v1063_v59 }
 0xd41   :  { %v1535_v63 = vpop.eup %1534 }
 0xd42   :  { %v1073_v53 = vmul.f32 %v1535_v63, %v1072_v62 }
 0xd44   :  { %v1076_v0 = vsel %vm1075_vm9, %v1073_v53, 0.0  ;;  %vm1245_vm9 = vcmask 203968  }
 0xd45   :  { %v1077_v1 = vadd.f32 %v1076_v0, %v1039_v47 }
 0xd47   :  { %1079 = vst [vmem:[#allocation1 + $0x10] sm:$0xff] %v1077_v1 }
 0xd4e   :  { %v1095_v2 = vld [vmem:[#allocation1 + $0x14] ss:$0 sm:$0xff] }
 0xd4f   :  { %v1107_v4 = vmul.f32 %v1095_v2, %v1077_v1  ;;  %v1098_v6 = vmul.f32 %v1095_v2, %v1095_v2 }
 0xd51   :  { %1108 = vadd.xlane.f32.xlu1 %v1107_v4  ;;  %1099 = vadd.xlane.f32.xlu0 %v1098_v6 }
 0xd70   :  { %v1086_v7 = vpop.xlane.xlu1 %1085 }
 0xd71   :  { %v1087_v8 = vsub.f32 %v1784_v60, %v1086_v7 }
 0xd73   :  { %v1088_v9 = vmul.f32 %v1535_v63, %v1087_v8  ;;  %v1211_v8 = vld [vmem:[#allocation0 + $0x17] ss:$0 sm:$0xff] }
 0xd75   :  { %v1089_v10 = vsel %vm1055_vm7, %v1088_v9, 0.0  ;;  %vm1207_vm7 = vcmask 195768  }
 0xd76   :  { %v1090_v52 = vadd.f32 %v1089_v10, %v1052_v56 }
 0xd78   :  { %v1122_v11 = vmul.f32 %v1095_v2, %v1090_v52 }
 0xd7a   :  { %1123 = vadd.xlane.f32.xlu0 %v1122_v11 }
 0xdde   :  { %v1100_v13 = vpop.xlane.xlu0 %1099  ;;  %v1109_v15 = vpop.xlane.xlu1 %1108 }
 0xddf   :  { %v1101_v14 = vsub.f32 %v1097_v12, %v1100_v13  ;;  %v1110_v5 = vsub.f32 %v1777_v44, %v1109_v15 }
 0xde1   :  { %1536 = vrsqrt.f32 %v1101_v14 }
 0xdeb   :  { %v1537_v16 = vpop.eup %1536 }
 0xdec   :  { %v1111_v17 = vmul.f32 %v1537_v16, %v1110_v5 }
 0xdee   :  { %v1114_v19 = vsel %vm1113_vm13, %v1111_v17, 0.0 }
 0xdef   :  { %v1115_v18 = vadd.f32 %v1114_v19, %v1077_v1  ;;  %v1249_v19 = vld [vmem:[#allocation0 + $0x18] ss:$0 sm:$0xff] }
 0xdf1   :  { %1117 = vst [vmem:[#allocation1 + $0x10] sm:$0xff] %v1115_v18 }
 0xdf8   :  { %v1133_v3 = vld [vmem:[#allocation1 + $0x15] ss:$0 sm:$0xff] }
 0xdf9   :  { %v1145_v23 = vmul.f32 %v1133_v3, %v1115_v18  ;;  %v1136_v24 = vmul.f32 %v1133_v3, %v1133_v3 }
 0xdfb   :  { %1146 = vadd.xlane.f32.xlu0 %v1145_v23  ;;  %1137 = vadd.xlane.f32.xlu1 %v1136_v24 }
 0xe07   :  { %v1124_v25 = vpop.xlane.xlu0 %1123 }
 0xe08   :  { %v1125_v26 = vsub.f32 %v1784_v60, %v1124_v25 }
 0xe0a   :  { %v1126_v30 = vmul.f32 %v1537_v16, %v1125_v26 }
 0xe0c   :  { %v1127_v31 = vsel %vm1093_vm10, %v1126_v30, 0.0  ;;  %vm1268_vm10 = vcmask 212168  }
 0xe0d   :  { %v1128_v21 = vadd.f32 %v1127_v31, %v1090_v52  ;;  %vm1288_vm13 = vmand %vm1268_vm10, %vm127_vm2  ;;  %vm1393_vm10 = vcmask 253168  }
 0xe0f   :  { %v1160_v29 = vmul.f32 %v1133_v3, %v1128_v21 }
 0xe11   :  { %1161 = vadd.xlane.f32.xlu1 %v1160_v29 }
 0xe88   :  { %v1138_v34 = vpop.xlane.xlu1 %1137  ;;  %v1147_v37 = vpop.xlane.xlu0 %1146 }
 0xe89   :  { %v1139_v35 = vsub.f32 %v1135_v33, %v1138_v34  ;;  %v1148_v38 = vsub.f32 %v1777_v44, %v1147_v37  ;;  %v1272_v34 = vld [vmem:[#allocation0 + $0x19] ss:$0 sm:$0xff] }
 0xe8b   :  { %1538 = vrsqrt.f32 %v1139_v35 }
 0xe95   :  { %v1539_v40 = vpop.eup %1538 }
 0xe96   :  { %v1149_v28 = vmul.f32 %v1539_v40, %v1148_v38 }
 0xe98   :  { %v1152_v41 = vsel %vm1151_vm0, %v1149_v28, 0.0  ;;  %vm1318_vm0 = vcmask 228568  }
 0xe99   :  { %v1153_v42 = vadd.f32 %v1152_v41, %v1115_v18 }
 0xe9b   :  { %1155 = vst [vmem:[#allocation1 + $0x10] sm:$0xff] %v1153_v42 }
 0xe9e   :  { %v1162_v20 = vpop.xlane.xlu1 %1161 }
 0xe9f   :  { %v1163_v43 = vsub.f32 %v1784_v60, %v1162_v20 }
 0xea1   :  { %v1164_v45 = vmul.f32 %v1539_v40, %v1163_v43 }
 0xea2   :  { %v1171_v47 = vld [vmem:[#allocation1 + $0x16] ss:$0 sm:$0xff] }
 0xea3   :  { %v1183_v48 = vmul.f32 %v1171_v47, %v1153_v42  ;;  %v1174_v50 = vmul.f32 %v1171_v47, %v1171_v47  ;;  %v1165_v51 = vsel %vm1131_vm15, %v1164_v45, 0.0  ;;  %vm1293_vm15 = vcmask 220368  }
 0xea4   :  { %v1166_v39 = vadd.f32 %v1165_v51, %v1128_v21  ;;  %vm1313_vm2 = vmand %vm1293_vm15, %vm188_vm5 }
 0xea5   :  { %1184 = vadd.xlane.f32.xlu1 %v1183_v48  ;;  %1175 = vadd.xlane.f32.xlu0 %v1174_v50  ;;  %v1297_v48 = vld [vmem:[#allocation0 + $0x1a] ss:$0 sm:$0xff]  ;;  %vm1338_vm5 = vmand %vm1318_vm0, %vm249_vm8 }
 0xea6   :  { %v1198_v54 = vmul.f32 %v1171_v47, %v1166_v39 }
 0xea9   :  { %1199 = vadd.xlane.f32.xlu0 %v1198_v54 }
 0xf32   :  { %v1176_v55 = vpop.xlane.xlu0 %1175  ;;  %v1185_v36 = vpop.xlane.xlu1 %1184 }
 0xf33   :  { %v1177_v56 = vsub.f32 %v1173_v46, %v1176_v55  ;;  %v1186_v57 = vsub.f32 %v1777_v44, %v1185_v36 }
 0xf35   :  { %1540 = vrsqrt.f32 %v1177_v56 }
 0xf36   :  { %v1200_v59 = vpop.xlane.xlu0 %1199 }
 0xf37   :  { %v1201_v63 = vsub.f32 %v1784_v60, %v1200_v59 }
 0xf3f   :  { %v1541_v58 = vpop.eup %1540 }
 0xf40   :  { %v1187_v61 = vmul.f32 %v1541_v58, %v1186_v57  ;;  %v1202_v0 = vmul.f32 %v1541_v58, %v1201_v63 }
 0xf42   :  { %v1190_v62 = vsel %vm1189_vm6, %v1187_v61, 0.0  ;;  %v1203_v1 = vsel %vm1169_vm3, %v1202_v0, 0.0  ;;  %v1322_v61 = vld [vmem:[#allocation0 + $0x1b] ss:$0 sm:$0xff]  ;;  %vm1343_vm3 = vcmask 236768   ;;  %vm1368_vm6 = vcmask 244968  }
 0xf43   :  { %v1844_v53 = vadd.f32 %v1190_v62, %v1153_v42  ;;  %v1204_v2 = vadd.f32 %v1203_v1, %v1166_v39  ;;  %vm1363_vm8 = vmand %vm1343_vm3, %vm310_vm11 }
 0xf44   :  { %vm1388_vm11 = vmand %vm1368_vm6, %vm371_vm14  ;;  %vm493_vm14 = vcmask 1047559  }
 0xf45   :  { %1193 = vst [vmem:[#allocation1 + $0x10] sm:$0xff] %v1844_v53 }
 0xf4c   :  { %v1847_v4 = vld [vmem:[#allocation1 + $0x17] ss:$0 sm:$0xff] }
 0xf4d   :  { %v1212_v6 = vmul.f32 %v1847_v4, %v1847_v4  ;;  %v1236_v7 = vmul.f32 %v1847_v4, %v1204_v2 }
 0xf4f   :  { %1213 = vadd.xlane.f32.xlu1 %v1212_v6  ;;  %1237 = vadd.xlane.f32.xlu0 %v1236_v7 }
 0xfdc   :  { %v1214_v9 = vpop.xlane.xlu1 %1213  ;;  %v1238_v52 = vpop.xlane.xlu0 %1237 }
 0xfdd   :  { %v1215_v10 = vsub.f32 %v1211_v8, %v1214_v9  ;;  %v1239_v11 = vsub.f32 %v1784_v60, %v1238_v52 }
 0xfdf   :  { %1542 = vrsqrt.f32 %v1215_v10 }
 0xfe9   :  { %v1853_v12 = vpop.eup %1542 }
 0xfea   :  { %v1240_v13 = vmul.f32 %v1853_v12, %v1239_v11  ;;  %v1347_v11 = vld [vmem:[#allocation0 + $0x1c] ss:$0 sm:$0xff] }
 0xfec   :  { %v1241_v14 = vsel %vm1207_vm7, %v1240_v13, 0.0 }
 0xfed   :  { %v1242_v15 = vadd.f32 %v1241_v14, %v1204_v2 }
 0xfef   :  { %1244 = vst [vmem:[#allocation1 + $0x18] sm:$0xff] %v1242_v15 }
 0xff6   :  { %v1247_v5 = vld [vmem:[#allocation1 + $0x18] ss:$0 sm:$0xff] }
 0xff7   :  { %v1259_v16 = vmul.f32 %v1247_v5, %v1242_v15  ;;  %v1250_v17 = vmul.f32 %v1247_v5, %v1247_v5 }
 0xff9   :  { %1260 = vadd.xlane.f32.xlu0 %v1259_v16  ;;  %1251 = vadd.xlane.f32.xlu1 %v1250_v17 }
0x1086   :  { %v1252_v18 = vpop.xlane.xlu1 %1251  ;;  %v1261_v23 = vpop.xlane.xlu0 %1260 }
0x1087   :  { %v1253_v3 = vsub.f32 %v1249_v19, %v1252_v18  ;;  %v1262_v24 = vsub.f32 %v1784_v60, %v1261_v23 }
0x1089   :  { %1544 = vrsqrt.f32 %v1253_v3 }
0x1093   :  { %v1545_v25 = vpop.eup %1544 }
0x1094   :  { %v1263_v26 = vmul.f32 %v1545_v25, %v1262_v24  ;;  %v1372_v25 = vld [vmem:[#allocation0 + $0x1d] ss:$0 sm:$0xff] }
0x1096   :  { %v1264_v30 = vsel %vm1245_vm9, %v1263_v26, 0.0  ;;  %vm494_vm9 = vmand %vm476_vm4, %vm493_vm14 }
0x1097   :  { %v1265_v31 = vadd.f32 %v1264_v30, %v1242_v15  ;;  %vm1413_vm4 = vmand %vm1393_vm10, %vm432_vm1 }
0x1098   :  { %vm912_vm1 = vmand %vm892_vm12, %vm493_vm14 }
0x1099   :  { %1267 = vst [vmem:[#allocation1 + $0x18] sm:$0xff] %v1265_v31 }
0x10a0   :  { %v1270_v21 = vld [vmem:[#allocation1 + $0x19] ss:$0 sm:$0xff] }
0x10a1   :  { %v1282_v29 = vmul.f32 %v1270_v21, %v1265_v31  ;;  %v1273_v33 = vmul.f32 %v1270_v21, %v1270_v21 }
0x10a3   :  { %1283 = vadd.xlane.f32.xlu0 %v1282_v29  ;;  %1274 = vadd.xlane.f32.xlu1 %v1273_v33 }
0x1130   :  { %v1275_v35 = vpop.xlane.xlu1 %1274  ;;  %v1284_v38 = vpop.xlane.xlu0 %1283 }
0x1131   :  { %v1276_v37 = vsub.f32 %v1272_v34, %v1275_v35  ;;  %v1285_v40 = vsub.f32 %v1784_v60, %v1284_v38 }
0x1133   :  { %1546 = vrsqrt.f32 %v1276_v37 }
0x113d   :  { %v1547_v28 = vpop.eup %1546 }
0x113e   :  { %v1286_v41 = vmul.f32 %v1547_v28, %v1285_v40  ;;  %v487_v28 = vld [vmem:[#allocation1] sm:$0xff] }
0x1140   :  { %v1289_v42 = vsel %vm1288_vm13, %v1286_v41, 0.0  ;;  %v1560_v41 = vld [vmem:[#allocation1 + $0x7] ss:$0 sm:$0xff]  ;;  %vm1227_vm13 = vmand %vm1207_vm7, %vm493_vm14  ;;  %vm1418_vm7 = vcmask 261368  }
0x1141   :  { %v1290_v20 = vadd.f32 %v1289_v42, %v1265_v31  ;;  %v488_v42 = vmul.f32 %v1560_v41, %v487_v28  ;;  %vm1438_vm15 = vmand %vm1418_vm7, %vm493_vm14 }
0x1143   :  { %1292 = vst [vmem:[#allocation1 + $0x18] sm:$0xff] %v1290_v20 }
0x114a   :  { %v1295_v43 = vld [vmem:[#allocation1 + $0x1a] ss:$0 sm:$0xff] }
0x114b   :  { %v1307_v45 = vmul.f32 %v1295_v43, %v1290_v20  ;;  %v1298_v47 = vmul.f32 %v1295_v43, %v1295_v43  ;;  %v1397_v43 = vld [vmem:[#allocation0 + $0x1e] ss:$0 sm:$0xff] }
0x114d   :  { %1308 = vadd.xlane.f32.xlu0 %v1307_v45  ;;  %1299 = vadd.xlane.f32.xlu1 %v1298_v47 }
0x11da   :  { %v1300_v50 = vpop.xlane.xlu1 %1299  ;;  %v1309_v39 = vpop.xlane.xlu0 %1308 }
0x11db   :  { %v1301_v51 = vsub.f32 %v1297_v48, %v1300_v50  ;;  %v1310_v54 = vsub.f32 %v1784_v60, %v1309_v39  ;;  %v486_v50 = vld [vmem:[#allocation0] sm:$0xff] }
0x11dd   :  { %1548 = vrsqrt.f32 %v1301_v51 }
0x11e7   :  { %v1549_v46 = vpop.eup %1548 }
0x11e8   :  { %v1311_v55 = vmul.f32 %v1549_v46, %v1310_v54 }
0x11ea   :  { %v1314_v56 = vsel %vm1313_vm2, %v1311_v55, 0.0 }
0x11eb   :  { %v1315_v36 = vadd.f32 %v1314_v56, %v1290_v20  ;;  %v1221_v20 = vmul.f32 %v1847_v4, %v1844_v53 }
0x11ed   :  { %1317 = vst [vmem:[#allocation1 + $0x18] sm:$0xff] %v1315_v36 }
0x11f4   :  { %v1320_v57 = vld [vmem:[#allocation1 + $0x1b] ss:$0 sm:$0xff] }
0x11f5   :  { %v1332_v58 = vmul.f32 %v1320_v57, %v1315_v36  ;;  %v1323_v59 = vmul.f32 %v1320_v57, %v1320_v57 }
0x11f7   :  { %1333 = vadd.xlane.f32.xlu0 %v1332_v58  ;;  %1324 = vadd.xlane.f32.xlu1 %v1323_v59 }
0x1284   :  { %v1325_v62 = vpop.xlane.xlu1 %1324  ;;  %v1334_v0 = vpop.xlane.xlu0 %1333 }
0x1285   :  { %v1326_v63 = vsub.f32 %v1322_v61, %v1325_v62  ;;  %v1335_v1 = vsub.f32 %v1784_v60, %v1334_v0  ;;  %v906_v0 = vmul.f32 %v1799_v22, %v1795_v27 }
0x1287   :  { %1550 = vrsqrt.f32 %v1326_v63 }
0x1291   :  { %v1551_v2 = vpop.eup %1550 }
0x1292   :  { %v1336_v6 = vmul.f32 %v1551_v2, %v1335_v1  ;;  %v1422_v2 = vld [vmem:[#allocation0 + $0x1f] ss:$0 sm:$0xff] }
0x1294   :  { %v1339_v7 = vsel %vm1338_vm5, %v1336_v6, 0.0 }
0x1295   :  { %v1340_v8 = vadd.f32 %v1339_v7, %v1315_v36  ;;  %v903_v7 = vld [vmem:[#allocation0 + $0x8] sm:$0xff] }
0x1297   :  { %1342 = vst [vmem:[#allocation1 + $0x18] sm:$0xff] %v1340_v8 }
0x129e   :  { %v1345_v9 = vld [vmem:[#allocation1 + $0x1c] ss:$0 sm:$0xff] }
0x129f   :  { %v1357_v10 = vmul.f32 %v1345_v9, %v1340_v8  ;;  %v1348_v52 = vmul.f32 %v1345_v9, %v1345_v9 }
0x12a1   :  { %1358 = vadd.xlane.f32.xlu0 %v1357_v10  ;;  %1349 = vadd.xlane.f32.xlu1 %v1348_v52 }
0x132e   :  { %v1350_v13 = vpop.xlane.xlu1 %1349  ;;  %v1359_v15 = vpop.xlane.xlu0 %1358 }
0x132f   :  { %v1351_v14 = vsub.f32 %v1347_v11, %v1350_v13  ;;  %v1360_v5 = vsub.f32 %v1784_v60, %v1359_v15 }
0x1331   :  { %1552 = vrsqrt.f32 %v1351_v14 }
0x133b   :  { %v1553_v16 = vpop.eup %1552 }
0x133c   :  { %v1361_v17 = vmul.f32 %v1553_v16, %v1360_v5 }
0x133e   :  { %v1364_v19 = vsel %vm1363_vm8, %v1361_v17, 0.0 }
0x133f   :  { %v1365_v18 = vadd.f32 %v1364_v19, %v1340_v8 }
0x1341   :  { %1367 = vst [vmem:[#allocation1 + $0x18] sm:$0xff] %v1365_v18 }
0x1348   :  { %v1370_v3 = vld [vmem:[#allocation1 + $0x1d] ss:$0 sm:$0xff] }
0x1349   :  { %v1382_v23 = vmul.f32 %v1370_v3, %v1365_v18  ;;  %v1373_v24 = vmul.f32 %v1370_v3, %v1370_v3 }
0x134b   :  { %1383 = vadd.xlane.f32.xlu0 %v1382_v23  ;;  %1374 = vadd.xlane.f32.xlu1 %v1373_v24 }
0x13d8   :  { %v1375_v26 = vpop.xlane.xlu1 %1374  ;;  %v1384_v31 = vpop.xlane.xlu0 %1383 }
0x13d9   :  { %v1376_v30 = vsub.f32 %v1372_v25, %v1375_v26  ;;  %v1385_v21 = vsub.f32 %v1784_v60, %v1384_v31 }
0x13db   :  { %1554 = vrsqrt.f32 %v1376_v30 }
0x13e5   :  { %v1555_v29 = vpop.eup %1554 }
0x13e6   :  { %v1386_v33 = vmul.f32 %v1555_v29, %v1385_v21 }
0x13e8   :  { %v1389_v34 = vsel %vm1388_vm11, %v1386_v33, 0.0 }
0x13e9   :  { %v1390_v35 = vadd.f32 %v1389_v34, %v1365_v18 }
0x13eb   :  { %1392 = vst [vmem:[#allocation1 + $0x18] sm:$0xff] %v1390_v35 }
0x13f2   :  { %v1395_v37 = vld [vmem:[#allocation1 + $0x1e] ss:$0 sm:$0xff] }
0x13f3   :  { %v1407_v38 = vmul.f32 %v1395_v37, %v1390_v35  ;;  %v1398_v40 = vmul.f32 %v1395_v37, %v1395_v37 }
0x13f5   :  { %1408 = vadd.xlane.f32.xlu0 %v1407_v38  ;;  %1399 = vadd.xlane.f32.xlu1 %v1398_v40 }
0x13f9   :  { %489 = vadd.xlane.f32.xlu0 %v488_v42 }
0x13fd   :  { %1222 = vadd.xlane.f32.xlu0 %v1221_v20 }
0x1482   :  { %v1409_v45 = vpop.xlane.xlu0 %1408  ;;  %v1400_v47 = vpop.xlane.xlu1 %1399 }
0x1483   :  { %v1401_v48 = vsub.f32 %v1397_v43, %v1400_v47  ;;  %v1410_v57 = vsub.f32 %v1784_v60, %v1409_v45 }
0x1485   :  { %1556 = vrsqrt.f32 %v1401_v48 }
0x1486   :  { %v490_v51 = vpop.xlane.xlu0 %489 }
0x1487   :  { %v491_v39 = vsub.f32 %v486_v50, %v490_v51 }
0x1489   :  { %v492_v54 = vmul.f32 %v1733_v32, %v491_v39 }
0x148a   :  { %v1223_v46 = vpop.xlane.xlu0 %1222 }
0x148b   :  { %v495_v55 = vsel %vm494_vm9, %v492_v54, 0.0  ;;  %v1224_v56 = vsub.f32 %v1777_v44, %v1223_v46 }
0x148c   :  { %v496_v4 = vadd.f32 %v495_v55, %v487_v28 }
0x148d   :  { %v1225_v36 = vmul.f32 %v1853_v12, %v1224_v56 }
0x148e   :  { %497 = vst [vmem:[#allocation1] sm:$0xff] %v496_v4  ;;  %1477 = vst [vmem:[%s1901_s1] sm:$0xff] %v496_v4 }
0x148f   :  { %v1557_v58 = vpop.eup %1556  ;;  %v1228_v32 = vsel %vm1227_vm13, %v1225_v36, 0.0 }
0x1490   :  { %v1411_v59 = vmul.f32 %v1557_v58, %v1410_v57  ;;  %v1229_v44 = vadd.f32 %v1228_v32, %v1844_v53 }
0x1492   :  { %v1414_v61 = vsel %vm1413_vm4, %v1411_v59, 0.0  ;;  %1231 = vst [vmem:[#allocation1 + $0x10] sm:$0xff] %v1229_v44  ;;  %1481 = vst [vmem:[%s1901_s1 + $0x10] sm:$0xff] %v1229_v44 }
0x1493   :  { %v1415_v12 = vadd.f32 %v1414_v61, %v1390_v35 }
0x1495   :  { %1417 = vst [vmem:[#allocation1 + $0x18] sm:$0xff] %v1415_v12 }
0x149c   :  { %v1420_v62 = vld [vmem:[#allocation1 + $0x1f] ss:$0 sm:$0xff] }
0x149d   :  { %v1423_v63 = vmul.f32 %v1420_v62, %v1420_v62  ;;  %v1432_v1 = vmul.f32 %v1420_v62, %v1415_v12 }
0x149f   :  { %1424 = vadd.xlane.f32.xlu1 %v1423_v63 }
0x14a3   :  { %907 = vadd.xlane.f32.xlu1 %v906_v0 }
0x14a7   :  { %1433 = vadd.xlane.f32.xlu1 %v1432_v1 }
0x152c   :  { %v1425_v6 = vpop.xlane.xlu1 %1424 }
0x152d   :  { %v1426_v53 = vsub.f32 %v1422_v2, %v1425_v6 }
0x152f   :  { %1558 = vrsqrt.f32 %v1426_v53 }
0x1530   :  { %v908_v8 = vpop.xlane.xlu1 %907 }
0x1531   :  { %v909_v9 = vsub.f32 %v903_v7, %v908_v8 }
0x1533   :  { %v910_v10 = vmul.f32 %v1809_v49, %v909_v9 }
0x1534   :  { %v1434_v11 = vpop.xlane.xlu1 %1433 }
0x1535   :  { %v913_v52 = vsel %vm912_vm1, %v910_v10, 0.0  ;;  %v1435_v22 = vsub.f32 %v1784_v60, %v1434_v11 }
0x1536   :  { %v914_v13 = vadd.f32 %v913_v52, %v1795_v27 }
0x1538   :  { %916 = vst [vmem:[#allocation1 + $0x8] sm:$0xff] %v914_v13  ;;  %1479 = vst [vmem:[%s1901_s1 + $0x8] sm:$0xff] %v914_v13 }
0x1539   :  { %v1559_v14 = vpop.eup %1558 }
0x153a   :  { %v1436_v15 = vmul.f32 %v1559_v14, %v1435_v22 }
0x153c   :  { %v1439_v5 = vsel %vm1438_vm15, %v1436_v15, 0.0 }
0x153d   :  { %v1440_v16 = vadd.f32 %v1439_v5, %v1415_v12 }
0x153f   :  { %1442 = vst [vmem:[#allocation1 + $0x18] sm:$0xff] %v1440_v16  ;;  %1483 = vst [vmem:[%s1901_s1 + $0x18] sm:$0xff] %v1440_v16 }

// kernel: dcca_loss.1
= control target key start
LH: loop header
LB: loop body
LE: loop exit
PB: predicated region body
PF: predicated region fallthrough
CT: control target
= control target key end

     0   :  { %s1502_s15 = smov 0   ;;  %s1604_s0 = inlined_call_operand.vmem [shape: f32[128,32], index: 0, kind: input, shape index: {}]   ;;  %s1605_s1 = inlined_call_operand.vmem [shape: f32[128,16], index: 1, kind: input, shape index: {}]   ;;  %s1606_s2 = inlined_call_operand.vmem [shape: f32[32,32], index: 2, kind: output, shape index: {0}]   ;;  %s1607_s3 = inlined_call_operand.vmem [shape: f32[16,16], index: 3, kind: output, shape index: {1}]   ;;  %s1608_s4 = inlined_call_operand.vmem [shape: f32[32,16], index: 4, kind: output, shape index: {2}]  }
   0x1 LB: > { %s1508_s16 = sadd.s32 4294967295, %s1469_s15   ;;  %p1248_p0 = scmp.ge.s32.totalorder %s1469_s15, 1  ;;  %s1469_s15 = sphi %s1502_s15, %s15_s15  }
   0x2   : > { %p164_p1 = scmp.lt.s32.totalorder %s1469_s15, 5 }
   0x4   : > { %p165_p2 = pnand %p1248_p0, %p164_p1 }
   0x5   : > { %s1249_s17 = sshll.u32 (!%p165_p2), %s1508_s16, 2  ;;  %p1253_p4 = scmp.ne.s32.totalorder (!%p165_p2), %s1508_s16, 0 }
   0x6   : > { %168 = sbr.rel (%p165_p2) target bundleno = 769 (0x301), region = 28  ;;  %p191_p3 = scmp.lt.s32.totalorder (!%p165_p2), %s1249_s17, 15 }
   0xd   : > { %s1610_s17 = smov (!%p191_p3, %s1249_s17), 15  ;;  %205 = sbr.rel (%p1253_p4) target bundleno = 22 (0x16), region = 32 }
   0xe   : > { %s1250_s18 = sshll.u32 %s1610_s17, 3  ;;  %vm206_vm0 = vcmask (!%p1253_p4), 261120   ;;  %vm211_vm1 = vcmask (!%p1253_p4), 130048   ;;  %vm218_vm2 = vcmask (!%p1253_p4), 253952   ;;  %v1471_v0 = vmov (!%p1253_p4), 0.0  }
   0xf   : > { %s194_s21 = scalar_lea.vmem %s1604_s0, %s1250_s18  ;;  %s1519_s24 = scalar_lea.vmem %s1605_s1, %s1250_s18  ;;  %207 = vst.msk [vmem:[#allocation2] sm:$0xff] (!%p1253_p4), %vm206_vm0, %v1471_v0  ;;  %208 = vst.msk [vmem:[#allocation2 + $0x8] sm:$0xff] (!%p1253_p4), %vm206_vm0, %v1471_v0  ;;  %vm220_vm3 = vcmask (!%p1253_p4), 122880  }
  0x10   : > { %209 = vst.msk [vmem:[#allocation2 + $0x10] sm:$0xff] (!%p1253_p4), %vm206_vm0, %v1471_v0  ;;  %210 = vst.msk [vmem:[#allocation2 + $0x18] sm:$0xff] (!%p1253_p4), %vm206_vm0, %v1471_v0 }
  0x11   : > { %212 = vst.msk [vmem:[#allocation3] sm:$0xff] (!%p1253_p4), %vm211_vm1, %v1471_v0  ;;  %213 = vst.msk [vmem:[#allocation3 + $0x8] sm:$0xff] (!%p1253_p4), %vm211_vm1, %v1471_v0 }
  0x12   : > { %214 = vst.msk [vmem:[#allocation4] sm:$0xff] (!%p1253_p4), %vm211_vm1, %v1471_v0  ;;  %215 = vst.msk [vmem:[#allocation4 + $0x8] sm:$0xff] (!%p1253_p4), %vm211_vm1, %v1471_v0 }
  0x13   : > { %216 = vst.msk [vmem:[#allocation4 + $0x10] sm:$0xff] (!%p1253_p4), %vm211_vm1, %v1471_v0  ;;  %217 = vst.msk [vmem:[#allocation4 + $0x18] sm:$0xff] (!%p1253_p4), %vm211_vm1, %v1471_v0 }
  0x14   : > { %219 = vst.msk [vmem:[#allocation5] sm:$0x1] %vm218_vm2, %v1471_v0 }
  0x15   : > { %221 = vst.msk [vmem:[#allocation6] sm:$0x1] %vm220_vm3, %v1471_v0 }
  0x16 PF: > { %v222_v1 = vld [vmem:[%s194_s21] sm:$0xff]  ;;  %v223_v2 = vld [vmem:[%s194_s21 + $0x8] sm:$0xff]  ;;  %v224_v3 = vld [vmem:[%s194_s21 + $0x10] sm:$0xff]  ;;  %v1472_v13 = vmov 0.0|0.0   ;;  %v1473_v14 = vmov 1.0   ;;  %vm266_vm4 = vcmask 261120  }
  0x17   : > { %234 = vxpose.xlu0.b32.start [1/4] (short) (narrow) %v222_v1, 32  ;;  %v1413_v4 = vpack.c.bf16 %v223_v2, %v222_v1  ;;  %v226_v5 = vld [vmem:[%s1519_s24] sm:$0xff]  ;;  %v225_v6 = vld [vmem:[%s194_s21 + $0x18] sm:$0xff]  ;;  %v227_v7 = vld [vmem:[%s1519_s24 + $0x8] sm:$0xff]  ;;  %vm1474_vm5 = vmmov 0   ;;  %v1475_v20 = vmov 0.0  }
  0x18   : > { %374 = vxpose.xlu1.b32.start [1/4] (short) (narrow) %v226_v5, 16  ;;  %v1417_v8 = vpack.c.bf16 %v225_v6, %v224_v3  ;;  %v1421_v9 = vpack.c.bf16 %v227_v7, %v226_v5  ;;  %v228_v10 = vld [vmem:[%s1519_s24 + $0x10] sm:$0xff]  ;;  %v229_v11 = vld [vmem:[%s1519_s24 + $0x18] sm:$0xff]  ;;  %v231_v23 = vld [vmem:[#allocation2 + $0x8] sm:$0xff]  ;;  %vm489_vm6 = vcmask 130048   ;;  %vm696_vm7 = vcmask 253952  }
  0x19   : > { %v1425_v12 = vpack.c.bf16 %v229_v11, %v228_v10  ;;  %1414 = vmatprep.subr.bf16.mxu0 %v1413_v4  ;;  %v230_v24 = vld [vmem:[#allocation2] sm:$0xff]  ;;  %v233_v35 = vld [vmem:[#allocation2 + $0x18] sm:$0xff]  ;;  %v232_v36 = vld [vmem:[#allocation2 + $0x10] sm:$0xff]  ;;  %vm770_vm8 = vcmask 122880   ;;  %p1266_p5 = scmp.ne.s32.totalorder %s1508_s16, 3 }
  0x1a   : > { %1416 = vmatpush3.bf16.msra.mxu0 %v1413_v4  ;;  %1422 = vmatprep.subr.bf16.mxu1 %v1421_v9  ;;  %v373_v25 = vld [vmem:[#allocation3 + $0x8] sm:$0xff]  ;;  %v372_v27 = vld [vmem:[#allocation3] sm:$0xff]  ;;  %vm823_vm9 = vcmask (!%p1266_p5), 1040384   ;;  %vm810_vm10 = vcmask (!%p1266_p5), 7168   ;;  %v1136_v5 = vlaneseq (!%p1266_p5) }
  0x1b   : > { %235 = vxpose.xlu0.b32.cont [2/4] (short) (narrow) %v223_v2, 32  ;;  %1418 = vmatprep.subr.bf16.mxu0 %v1417_v8  ;;  %v493_v41 = vld [vmem:[#allocation4 + $0x8] sm:$0xff]  ;;  %v492_v43 = vld [vmem:[#allocation4] sm:$0xff] }
  0x1c   : > { %375 = vxpose.xlu1.b32.cont [2/4] (short) (narrow) %v227_v7, 16  ;;  %1424 = vmatpush3.bf16.msra.mxu1 %v1421_v9  ;;  %v495_v51 = vld [vmem:[#allocation4 + $0x18] sm:$0xff]  ;;  %v494_v52 = vld [vmem:[#allocation4 + $0x10] sm:$0xff]  ;;  %v698_v57 = vld [vmem:[#allocation6] sm:$0x1] }
  0x1d   : > { %1426 = vmatprep.subr.bf16.mxu1 %v1425_v12  ;;  %v589_v42 = vld [vmem:[#allocation5] sm:$0x1] }
  0x1e   : > { %1420 = vmatpush3.bf16.msra.mxu0 %v1417_v8 }
  0x1f   : > { %236 = vxpose.xlu0.b32.cont [3/4] (short) (narrow) %v224_v3, 32  ;;  %1430 = vmatprep.subr.bf16.mxu0 %v1421_v9 }
  0x20   : > { %376 = vxpose.xlu1.b32.cont [3/4] (short) (narrow) %v228_v10, 16  ;;  %1428 = vmatpush3.bf16.msra.mxu1 %v1425_v12  ;;  %v1476_v10 = vmov (!%p1266_p5), 0.0  }
  0x21   : > { %1437 = vmatprep.subr.bf16.mxu1 %v1472_v13 }
  0x23   : > { %237 = vxpose.xlu0.b32.end [4/4] (short) (narrow) %v225_v6, 32  ;;  %v1137_v6 = vshrl.u32 (!%p1266_p5), %v1136_v5, 7 }
  0x24   : > { %377 = vxpose.xlu1.b32.end [4/4] (short) (narrow) %v229_v11, 16 }
  0x25   : > { %v1138_v7 = vadd.s32 (!%p1266_p5), 8, %v1137_v6 }
  0x27   : > { %590 = vxpose.xlu0.b32.start [1/4] (short) (narrow) %v1473_v14, 8 }
  0x2b   : > { %591 = vxpose.xlu0.b32.cont [2/4] (short) (narrow) %v1473_v14, 8 }
  0x2f   : > { %592 = vxpose.xlu0.b32.cont [3/4] (short) (narrow) %v1473_v14, 8 }
  0x33   : > { %593 = vxpose.xlu0.b32.end [4/4] (short) (narrow) %v1473_v14, 8 }
  0x97   : > { %v250_v15 = vpop.trf.xlu0 }
  0x98   : > { %1339 = vmatprep.mubr.msk.f32.mxu0 %vm266_vm4, %v250_v15  ;;  %v390_v16 = vpop.trf.xlu1 }
  0x99   : > { %1353 = vmatprep.mubr.msk.f32.mxu1 %vm266_vm4, %v390_v16 }
  0x9b   : > { %v251_v17 = vpop.trf.xlu0 }
  0x9c   : > { %1340 = vmatmul.mubr.msk.f32.vlgmr.msra.gmra.mrb[0].mxu0 %vm266_vm4, %v251_v17  ;;  %v391_v18 = vpop.trf.xlu1 }
  0x9d   : > { %1432 = vmatpush3.bf16.msra.mxu0 %v1421_v9  ;;  %1354 = vmatmul.mubr.msk.f32.vlgmr.msra.gmra.mrb[0].mxu1 %vm266_vm4, %v391_v18 }
  0x9e   : > { %1434 = vmatprep.subr.bf16.mxu0 %v1425_v12  ;;  %1439 = vmatpush3.bf16.msra.mxu1 %v1413_v4 }
  0x9f   : > { %v252_v19 = vpop.trf.xlu0  ;;  %1440 = vmatprep.subr.bf16.mxu1 %v1472_v13  ;;  %1378 = vmatprep.mubr.msk.f32.mxu1 %vm1474_vm5, %v1475_v20 }
  0xa0   : > { %1342 = vmatprep.mubr.msk.f32.mxu0 %vm266_vm4, %v252_v19 }
  0xa1   : > { %1436 = vmatpush3.bf16.msra.mxu0 %v1425_v12 }
  0xa2   : > { %1443 = vmatprep.subr.bf16.mxu0 %v1472_v13  ;;  %1442 = vmatpush3.bf16.msra.mxu1 %v1417_v8  ;;  %v1142_v8 = vand.u32 (!%p1266_p5), 127, %v1136_v5 }
  0xa3   : > { %v253_v21 = vpop.trf.xlu0 }
  0xa4   : > { %1343 = vmatmul.mubr.msk.f32.gmra.mrb[2].mxu0 %vm266_vm4, %v253_v21  ;;  %vm1144_vm11 = vcmp.eq.s32.totalorder (!%p1266_p5), %v1138_v7, %v1142_v8  ;;  %vm1143_vm12 = vcmp.eq.s32.totalorder (!%p1266_p5), %v1137_v6, %v1142_v8 }
  0xa5   : > { %1364 = vmatprep.mubr.msk.f32.mxu0 %vm266_vm4, %v250_v15  ;;  %v1281_v11 = vsel (!%p1266_p5), %vm1144_vm11, 1.0, %v1476_v10  ;;  %v1280_v15 = vsel (!%p1266_p5), %vm1143_vm12, 1.0, %v1476_v10 }
  0xa6   : > { %v1156_v18 = vmul.f32 (!%p1266_p5), 0.001, %v1281_v11 }
  0xa7   : > { %v606_v22 = vpop.trf.xlu0 }
  0xa8   : > { %1365 = vmatmul.mubr.msk.f32.vlgmr.msra.gmra.mrb[4].mxu0 %vm266_vm4, %v251_v17  ;;  %1379 = vmatmul.mubr.msk.f32.vlgmr.msra.gmra.mrb[2].mxu1 %vm266_vm4, %v606_v22 }
  0xa9   : > { %1445 = vmatpush3.bf16.msra.mxu0 %v1421_v9  ;;  %1367 = vmatprep.mubr.msk.f32.mxu0 %vm266_vm4, %v252_v19 }
  0xaa   : > { %1446 = vmatprep.subr.bf16.mxu0 %v1472_v13 }
  0xac   : > { %1368 = vmatmul.mubr.msk.f32.gmra.mrb[6].mxu0 %vm266_vm4, %v253_v21 }
  0xad   : > { %1448 = vmatpush3.bf16.msra.mxu0 %v1425_v12  ;;  %1389 = vmatprep.mubr.msk.f32.mxu0 %vm1474_vm5, %v1475_v20  ;;  %v1155_v20 = vmul.f32 (!%p1266_p5), 0.001, %v1280_v15 }
  0xb0   : > { %1390 = vmatmul.mubr.msk.f32.vlgmr.msra.gmra.mrb[8].mxu0 %vm266_vm4, %v606_v22 }
 0x16f   : > { %v1341_v26 = vpop.f32.mrb[0].mxu0 }
 0x170   : > { %v365_v28 = vadd.f32 %v1341_v26, %v231_v23  ;;  %v345_v29 = vpop.f32.mrb[1].mxu0  ;;  %v1355_v30 = vpop.f32.mrb[0].mxu1 }
 0x171   : > { %v364_v31 = vadd.f32 %v345_v29, %v230_v24  ;;  %v488_v32 = vadd.f32 %v1355_v30, %v373_v25  ;;  %v478_v33 = vpop.f32.mrb[1].mxu1 }
 0x172   : > { %369 = vst.msk [vmem:[#allocation2 + $0x8] sm:$0xff] %vm266_vm4, %v365_v28  ;;  %v487_v34 = vadd.f32 %v478_v33, %v372_v27 }
 0x173   : > { %368 = vst.msk [vmem:[#allocation2] sm:$0xff] %vm266_vm4, %v364_v31 }
 0x174   : > { %491 = vst.msk [vmem:[#allocation3 + $0x8] sm:$0xff] %vm489_vm6, %v488_v32  ;;  %490 = vst.msk [vmem:[#allocation3] sm:$0xff] %vm489_vm6, %v487_v34 }
 0x177   : > { %v1344_v37 = vpop.f32.mrb[2].mxu0 }
 0x178   : > { %v367_v38 = vadd.f32 %v1344_v37, %v233_v35  ;;  %v355_v39 = vpop.f32.mrb[3].mxu0 }
 0x179   : > { %v366_v40 = vadd.f32 %v355_v39, %v232_v36  ;;  %v1125_v27 = vld [vmem:[#allocation2 + $0x8] sm:$0xff] (!%p1266_p5)  ;;  %v1140_v36 = vadd.s32 (!%p1266_p5), 24, %v1137_v6  ;;  %v1139_v39 = vadd.s32 (!%p1266_p5), 16, %v1137_v6 }
 0x17a   : > { %371 = vst.msk [vmem:[#allocation2 + $0x18] sm:$0xff] %vm266_vm4, %v367_v38  ;;  %v1124_v30 = vld [vmem:[#allocation2] sm:$0xff] (!%p1266_p5) }
 0x17b   : > { %370 = vst.msk [vmem:[#allocation2 + $0x10] sm:$0xff] %vm266_vm4, %v366_v40  ;;  %v1366_v44 = vpop.f32.mrb[4].mxu0  ;;  %v691_v45 = vpop.f32.mrb[2].mxu1  ;;  %v1168_v12 = vld [vmem:[#allocation3 + $0x8] sm:$0xff] (!%p1266_p5)  ;;  %v1167_v16 = vld [vmem:[#allocation3] sm:$0xff] (!%p1266_p5)  ;;  %vm1146_vm13 = vcmp.eq.s32.totalorder (!%p1266_p5), %v1140_v36, %v1142_v8  ;;  %vm1145_vm14 = vcmp.eq.s32.totalorder (!%p1266_p5), %v1139_v39, %v1142_v8 }
 0x17c   : > { %v582_v46 = vadd.f32 %v1366_v44, %v493_v41  ;;  %v562_v47 = vpop.f32.mrb[5].mxu0  ;;  %v695_v48 = vadd.f32 %v691_v45, %v589_v42  ;;  %v1380_v49 = vpop.f32.mrb[3].mxu1 }
 0x17d   : > { %v581_v50 = vadd.f32 %v562_v47, %v492_v43 }
 0x17e   : > { %586 = vst.msk [vmem:[#allocation4 + $0x8] sm:$0xff] %vm489_vm6, %v582_v46 }
 0x17f   : > { %697 = vst.msk [vmem:[#allocation5] sm:$0x1] %vm696_vm7, %v695_v48  ;;  %v1369_v53 = vpop.f32.mrb[6].mxu0 }
 0x180   : > { %585 = vst.msk [vmem:[#allocation4] sm:$0xff] %vm489_vm6, %v581_v50  ;;  %v584_v54 = vadd.f32 %v1369_v53, %v495_v51  ;;  %v572_v55 = vpop.f32.mrb[7].mxu0  ;;  %775 = sbr.rel (%p1266_p5) target bundleno = 769 (0x301), region = 36 }
 0x181   : > { %v583_v56 = vadd.f32 %v572_v55, %v494_v52  ;;  %v1127_v51 = vld [vmem:[#allocation2 + $0x18] sm:$0xff] (!%p1266_p5)  ;;  %v1283_v52 = vsel (!%p1266_p5), %vm1146_vm13, 1.0, %v1476_v10 }
 0x182   : > { %588 = vst.msk [vmem:[#allocation4 + $0x18] sm:$0xff] %vm489_vm6, %v584_v54  ;;  %v1126_v55 = vld [vmem:[#allocation2 + $0x10] sm:$0xff] (!%p1266_p5) }
 0x183   : > { %587 = vst.msk [vmem:[#allocation4 + $0x10] sm:$0xff] %vm489_vm6, %v583_v56  ;;  %v765_v58 = vpop.f32.mrb[8].mxu0 }
 0x184   : > { %v769_v59 = vadd.f32 %v765_v58, %v698_v57  ;;  %v1391_v60 = vpop.f32.mrb[9].mxu0 }
 0x185   : > { %v1178_v29 = vld [vmem:[#allocation4 + $0x8] sm:$0xff] (!%p1266_p5) }
 0x186   : > { %771 = vst.msk [vmem:[#allocation6] sm:$0x1] %vm770_vm8, %v769_v59  ;;  %v776_v62 = vld [vmem:[#allocation5] sm:$0x1] (!%p1266_p5)  ;;  %v1282_v59 = vsel (!%p1266_p5), %vm1145_vm14, 1.0, %v1476_v10 }
 0x187   : > { %1392 = vmatprep.subr.msk.mxu0 %vm823_vm9, %v776_v62  ;;  %v1177_v35 = vld [vmem:[#allocation4] sm:$0xff] }
 0x188   : > { %1393 = vmatpush3.msk.msra.mxu0 %vm823_vm9, %v776_v62 }
 0x189   : > { %v1180_v54 = vld [vmem:[#allocation4 + $0x18] sm:$0xff] }
 0x18d   : > { %v777_v61 = vld [vmem:[#allocation6] sm:$0x1] }
 0x18e   : > { %917 = vxpose.xlu0.b32.start.end [1/1] (short) (narrow) %v777_v61, 16  ;;  %1400 = vmatprep.subr.msk.mxu1 %vm823_vm9, %v777_v61 }
 0x18f   : > { %1401 = vmatpush3.msk.msra.mxu1 %vm823_vm9, %v777_v61 }
 0x190   : > { %1405 = vmatprep.subr.msk.mxu1 %vm823_vm9, %v777_v61 }
 0x193   : > { %778 = vxpose.xlu0.b32.start.end [1/1] (short) (narrow) %v776_v62, 32 }
 0x20e   : > { %v933_v63 = vpop.trf.xlu0 }
 0x20f   : > { %1402 = vmatprep.mubr.msk.f32.mxu1 %vm810_vm10, %v933_v63 }
 0x212   : > { %v934_v0 = vpop.trf.xlu0 }
 0x213   : > { %1403 = vmatmul.mubr.msk.f32.vlgmr.msra.gmra.mrb[0].mxu1 %vm810_vm10, %v934_v0 }
 0x214   : > { %1406 = vmatpush3.msk.msra.mxu1 %vm823_vm9, %v777_v61  ;;  %v1179_v61 = vld [vmem:[#allocation4 + $0x10] sm:$0xff] }
 0x216   : > { %v794_v1 = vpop.trf.xlu0 }
 0x217   : > { %1394 = vmatprep.mubr.msk.f32.mxu0 %vm810_vm10, %v794_v1  ;;  %1407 = vmatprep.mubr.msk.f32.mxu1 %vm810_vm10, %v794_v1  ;;  %v1158_v1 = vmul.f32 0.001, %v1283_v52 }
 0x21a   : > { %v795_v2 = vpop.trf.xlu0 }
 0x21b   : > { %1395 = vmatmul.mubr.msk.f32.vlgmr.msra.gmra.mrb[0].mxu0 %vm810_vm10, %v795_v2  ;;  %1408 = vmatmul.mubr.msk.f32.vlgmr.msra.gmra.mrb[2].mxu1 %vm810_vm10, %v795_v2 }
 0x21e   : > { %v796_v3 = vpop.trf.xlu0 }
 0x21f   : > { %1397 = vmatprep.mubr.msk.f32.mxu0 %vm810_vm10, %v796_v3  ;;  %1410 = vmatprep.mubr.msk.f32.mxu1 %vm810_vm10, %v796_v3 }
 0x222   : > { %v797_v4 = vpop.trf.xlu0 }
 0x223   : > { %1398 = vmatmul.mubr.msk.f32.gmra.mrb[2].mxu0 %vm810_vm10, %v797_v4  ;;  %1411 = vmatmul.mubr.msk.f32.gmra.mrb[4].mxu1 %vm810_vm10, %v797_v4  ;;  %v1157_v4 = vmul.f32 0.001, %v1282_v59 }
 0x2e6   : > { %v1404_v9 = vpop.f32.mrb[0].mxu1 }
 0x2e7   : > { %v1034_v13 = vmul.f32 0.0078125, %v1404_v9  ;;  %v1024_v14 = vpop.f32.mrb[1].mxu1 }
 0x2e8   : > { %v1033_v17 = vmul.f32 0.0078125, %v1024_v14 }
 0x2e9   : > { %v1170_v19 = vsub.f32 %v1168_v12, %v1034_v13 }
 0x2ea   : > { %v1169_v21 = vsub.f32 %v1167_v16, %v1033_v17 }
 0x2eb   : > { %v1172_v22 = vmul.f32 0.007874016, %v1170_v19 }
 0x2ec   : > { %v1171_v23 = vmul.f32 0.007874016, %v1169_v21 }
 0x2ed   : > { %v1174_v24 = vadd.f32 %v1172_v22, %v1156_v18 }
 0x2ee   : > { %v1173_v25 = vadd.f32 %v1171_v23, %v1155_v20  ;;  %v1396_v26 = vpop.f32.mrb[0].mxu0  ;;  %v1409_v28 = vpop.f32.mrb[2].mxu1 }
 0x2ef   : > { %1176 = vst.msk [vmem:[%s1607_s3 + $0x8] sm:$0xff] %vm489_vm6, %v1174_v24  ;;  %v914_v31 = vmul.f32 0.0078125, %v1396_v26  ;;  %v1121_v32 = vmul.f32 0.0078125, %v1409_v28  ;;  %v893_v33 = vpop.f32.mrb[1].mxu0  ;;  %v1101_v34 = vpop.f32.mrb[3].mxu1 }
 0x2f0   : > { %1175 = vst.msk [vmem:[%s1607_s3] sm:$0xff] %vm489_vm6, %v1173_v25  ;;  %v913_v37 = vmul.f32 0.0078125, %v893_v33  ;;  %v1120_v38 = vmul.f32 0.0078125, %v1101_v34 }
 0x2f1   : > { %v1129_v40 = vsub.f32 %v1125_v27, %v914_v31  ;;  %v1182_v41 = vsub.f32 %v1178_v29, %v1121_v32 }
 0x2f2   : > { %v1128_v42 = vsub.f32 %v1124_v30, %v913_v37  ;;  %v1181_v43 = vsub.f32 %v1177_v35, %v1120_v38 }
 0x2f3   : > { %v1133_v44 = vmul.f32 0.007874016, %v1129_v40  ;;  %v1186_v45 = vmul.f32 0.007874016, %v1182_v41 }
 0x2f4   : > { %v1132_v46 = vmul.f32 0.007874016, %v1128_v42  ;;  %v1185_v47 = vmul.f32 0.007874016, %v1181_v43 }
 0x2f5   : > { %v1160_v48 = vadd.f32 %v1156_v18, %v1133_v44  ;;  %1190 = vst.msk [vmem:[%s1608_s4 + $0x8] sm:$0xff] %vm489_vm6, %v1186_v45 }
 0x2f6   : > { %v1159_v49 = vadd.f32 %v1155_v20, %v1132_v46  ;;  %1189 = vst.msk [vmem:[%s1608_s4] sm:$0xff] %vm489_vm6, %v1185_v47  ;;  %v1399_v50 = vpop.f32.mrb[2].mxu0  ;;  %v1412_v53 = vpop.f32.mrb[4].mxu1 }
 0x2f7   : > { %1164 = vst.msk [vmem:[%s1606_s2 + $0x8] sm:$0xff] %vm266_vm4, %v1160_v48  ;;  %v916_v56 = vmul.f32 0.0078125, %v1399_v50  ;;  %v1123_v57 = vmul.f32 0.0078125, %v1412_v53  ;;  %v903_v58 = vpop.f32.mrb[3].mxu0  ;;  %v1111_v60 = vpop.f32.mrb[5].mxu1 }
 0x2f8   : > { %1163 = vst.msk [vmem:[%s1606_s2] sm:$0xff] %vm266_vm4, %v1159_v49  ;;  %v915_v62 = vmul.f32 0.0078125, %v903_v58  ;;  %v1122_v63 = vmul.f32 0.0078125, %v1111_v60 }
 0x2f9   : > { %v1131_v0 = vsub.f32 %v1127_v51, %v916_v56  ;;  %v1184_v2 = vsub.f32 %v1180_v54, %v1123_v57 }
 0x2fa   : > { %v1130_v3 = vsub.f32 %v1126_v55, %v915_v62  ;;  %v1183_v5 = vsub.f32 %v1179_v61, %v1122_v63 }
 0x2fb   : > { %v1135_v6 = vmul.f32 0.007874016, %v1131_v0  ;;  %v1188_v7 = vmul.f32 0.007874016, %v1184_v2 }
 0x2fc   : > { %v1134_v8 = vmul.f32 0.007874016, %v1130_v3  ;;  %v1187_v9 = vmul.f32 0.007874016, %v1183_v5 }
 0x2fd   : > { %v1162_v10 = vadd.f32 %v1158_v1, %v1135_v6  ;;  %1192 = vst.msk [vmem:[%s1608_s4 + $0x18] sm:$0xff] %vm489_vm6, %v1188_v7 }
 0x2fe   : > { %v1161_v11 = vadd.f32 %v1157_v4, %v1134_v8  ;;  %1191 = vst.msk [vmem:[%s1608_s4 + $0x10] sm:$0xff] %vm489_vm6, %v1187_v9 }
 0x2ff   : > { %1166 = vst.msk [vmem:[%s1606_s2 + $0x18] sm:$0xff] %vm266_vm4, %v1162_v10 }
 0x300   : > { %1165 = vst.msk [vmem:[%s1606_s2 + $0x10] sm:$0xff] %vm266_vm4, %v1161_v11 }
 0x301 PF: > { %s15_s15 = sadd.s32 1, %s1469_s15  }
 0x302   : > { %p12_p6 = scmp.ge.s32.totalorder %s15_s15, 6  }
 0x304   :  { %14 = sbr.rel (!%p12_p6) target bundleno = 1 (0x1), region = 81 }

// kernel: custom-call.20
= control target key start
LH: loop header
LB: loop body
LE: loop exit
PB: predicated region body
PF: predicated region fallthrough
CT: control target
= control target key end

     0   :  { %v46_v0 = vlaneseq  ;;  %v729_v10 = vmov -1.0   ;;  %v730_v48 = vmov 0.0   ;;  %s1003_s0 = inlined_call_operand.vmem [shape: f32[1,32,32], index: 0, kind: input, shape index: {}]   ;;  %s1004_s1 = inlined_call_operand.vmem [shape: f32[1,32,32], index: 1, kind: output, shape index: {}]  }
   0x1   :  { %v41_v3 = vld [vmem:[%s1003_s0 + $0x18] sm:$0xff]  ;;  %v39_v37 = vld [vmem:[%s1003_s0 + $0x10] sm:$0xff] }
   0x2   :  { %v741_v1 = vand.u32 127, %v46_v0  ;;  %v743_v2 = vshrl.u32 %v46_v0, 7 }
   0x4   :  { %vm48_vm0 = vcmp.lt.s32.totalorder %v741_v1, 32  ;;  %v99_v4 = vadd.s32 24, %v743_v2  ;;  %vm140_vm4 = vcmp.eq.s32.totalorder %v741_v1, 31  ;;  %vm148_vm6 = vcmp.eq.s32.totalorder %v741_v1, 30 }
   0x5   :  { %v141_v11 = vsel %vm140_vm4, 1.0, %v729_v10  ;;  %vm158_vm7 = vcmp.eq.s32.totalorder %v741_v1, 29  ;;  %vm168_vm8 = vcmp.eq.s32.totalorder %v741_v1, 28  ;;  %vm178_vm9 = vcmp.eq.s32.totalorder %v741_v1, 27 }
   0x6   :  { %vm100_vm1 = vcmp.eq.s32.totalorder %v99_v4, %v741_v1  ;;  %vm105_vm2 = vcmp.le.s32.totalorder %v99_v4, %v741_v1  ;;  %vm137_vm5 = vcmp.eq.s32.totalorder %v741_v1, %v99_v4  ;;  %v83_v32 = vadd.s32 16, %v743_v2 }
   0x7   :  { %v102_v5 = vsel %vm100_vm1, %v41_v3, 0.0  ;;  %vm106_vm3 = vmand %vm105_vm2, %vm48_vm0  ;;  %v142_v12 = vsel %vm137_vm5, %v141_v11, 0.0  ;;  %vm188_vm11 = vcmp.eq.s32.totalorder %v741_v1, 26  ;;  %vm198_vm15 = vcmp.eq.s32.totalorder %v741_v1, 25 }
   0x8   :  { %v107_v6 = vsel %vm106_vm3, %v41_v3, 0.0  ;;  %103 = vadd.xlane.f32.xlu0 %v102_v5  ;;  %vm84_vm10 = vcmp.eq.s32.totalorder %v83_v32, %v741_v1  ;;  %vm89_vm12 = vcmp.le.s32.totalorder %v83_v32, %v741_v1  ;;  %vm130_vm14 = vcmp.eq.s32.totalorder %v741_v1, %v83_v32 }
   0x9   :  { %v86_v38 = vsel %vm84_vm10, %v39_v37, 0.0  ;;  %vm90_vm13 = vmand %vm89_vm12, %vm48_vm0  ;;  %v131_v49 = vsel %vm130_vm14, -1.0, %v730_v48  ;;  %vm218_vm1 = vcmp.eq.s32.totalorder %v741_v1, 23  ;;  %vm208_vm2 = vcmp.eq.s32.totalorder %v741_v1, 24 }
   0xa   :  { %v91_v45 = vsel %vm90_vm13, %v39_v37, 0.0  ;;  %vm232_vm3 = vcmp.eq.s32.totalorder %v741_v1, 22  ;;  %vm246_vm4 = vcmp.eq.s32.totalorder %v741_v1, 21  ;;  %vm260_vm5 = vcmp.eq.s32.totalorder %v741_v1, 20 }
   0xb   :  { %vm316_vm13 = vcmp.eq.s32.totalorder %v741_v1, 16  ;;  %vm330_vm14 = vcmp.eq.s32.totalorder %v741_v1, 15 }
  0x95   :  { %v754_v7 = vpop.xlane.xlu0 %103 }
  0x96   :  { %721 = vrcp.f32 %v754_v7 }
  0xa0   :  { %v757_v8 = vpop.eup %721 }
  0xa1   :  { %v109_v9 = vmul.f32 %v757_v8, %v107_v6 }
  0xa3   :  { %110 = vst [vmem:[#allocation2 + $0x18] sm:$0xff] %v109_v9 }
  0xaa   :  { %v144_v13 = vld [vmem:[#allocation2 + $0x1e] ss:$0 sm:$0xff]  ;;  %v154_v16 = vld [vmem:[#allocation2 + $0x1d] ss:$0 sm:$0xff]  ;;  %v164_v21 = vld [vmem:[#allocation2 + $0x1c] ss:$0 sm:$0xff] }
  0xab   :  { %v145_v14 = vxor.u32 2147483648, %v144_v13  ;;  %v155_v18 = vxor.u32 2147483648, %v154_v16  ;;  %v165_v23 = vxor.u32 2147483648, %v164_v21  ;;  %v174_v26 = vld [vmem:[#allocation2 + $0x1b] ss:$0 sm:$0xff] }
  0xac   :  { %v175_v28 = vxor.u32 2147483648, %v174_v26  ;;  %v184_v31 = vld [vmem:[#allocation2 + $0x1a] ss:$0 sm:$0xff]  ;;  %v194_v39 = vld [vmem:[#allocation2 + $0x19] ss:$0 sm:$0xff] }
  0xad   :  { %v149_v15 = vmul.f32 %v145_v14, %v142_v12  ;;  %v185_v34 = vxor.u32 2147483648, %v184_v31  ;;  %v195_v41 = vxor.u32 2147483648, %v194_v39  ;;  %v204_v53 = vld [vmem:[#allocation2 + $0x18] ss:$0 sm:$0xff]  ;;  %v67_v39 = vadd.s32 8, %v743_v2 }
  0xae   :  { %v205_v55 = vxor.u32 2147483648, %v204_v53 }
  0xaf   :  { %150 = vadd.xlane.f32.xlu0 %v149_v15  ;;  %vm123_vm12 = vcmp.eq.s32.totalorder %v741_v1, %v67_v39 }
 0x13c   :  { %v151_v17 = vpop.xlane.xlu0 %150 }
 0x13d   :  { %v152_v19 = vsel %vm148_vm6, %v151_v17, %v142_v12  ;;  %vm274_vm6 = vcmp.eq.s32.totalorder %v741_v1, 19 }
 0x13e   :  { %v159_v20 = vmul.f32 %v155_v18, %v152_v19 }
 0x140   :  { %160 = vadd.xlane.f32.xlu1 %v159_v20 }
 0x1cd   :  { %v161_v22 = vpop.xlane.xlu1 %160 }
 0x1ce   :  { %v162_v24 = vsel %vm158_vm7, %v161_v22, %v152_v19  ;;  %vm288_vm7 = vcmp.eq.s32.totalorder %v741_v1, 18 }
 0x1cf   :  { %v169_v25 = vmul.f32 %v165_v23, %v162_v24 }
 0x1d1   :  { %170 = vadd.xlane.f32.xlu1 %v169_v25 }
 0x25e   :  { %v171_v27 = vpop.xlane.xlu1 %170 }
 0x25f   :  { %v172_v29 = vsel %vm168_vm8, %v171_v27, %v162_v24  ;;  %vm68_vm8 = vcmp.eq.s32.totalorder %v67_v39, %v741_v1 }
 0x260   :  { %v179_v30 = vmul.f32 %v175_v28, %v172_v29 }
 0x262   :  { %180 = vadd.xlane.f32.xlu0 %v179_v30 }
 0x2ef   :  { %v181_v33 = vpop.xlane.xlu0 %180 }
 0x2f0   :  { %v182_v35 = vsel %vm178_vm9, %v181_v33, %v172_v29  ;;  %vm73_vm9 = vcmp.le.s32.totalorder %v67_v39, %v741_v1 }
 0x2f1   :  { %v189_v36 = vmul.f32 %v185_v34, %v182_v35  ;;  %vm74_vm10 = vmand %vm73_vm9, %vm48_vm0  ;;  %vm116_vm9 = vcmp.eq.s32.totalorder %v741_v1, %v743_v2 }
 0x2f3   :  { %190 = vadd.xlane.f32.xlu1 %v189_v36 }
 0x2f7   :  { %87 = vadd.xlane.f32.xlu1 %v86_v38 }
 0x380   :  { %v191_v40 = vpop.xlane.xlu1 %190 }
 0x381   :  { %v192_v42 = vsel %vm188_vm11, %v191_v40, %v182_v35  ;;  %vm302_vm11 = vcmp.eq.s32.totalorder %v741_v1, 17 }
 0x382   :  { %v199_v43 = vmul.f32 %v195_v41, %v192_v42 }
 0x384   :  { %200 = vadd.xlane.f32.xlu0 %v199_v43  ;;  %v772_v44 = vpop.xlane.xlu1 %87 }
 0x385   :  { %723 = vrcp.f32 %v772_v44 }
 0x38f   :  { %v778_v46 = vpop.eup %723 }
 0x390   :  { %v93_v47 = vmul.f32 %v778_v46, %v91_v45  ;;  %v37_v45 = vld [vmem:[%s1003_s0 + $0x8] sm:$0xff] }
 0x392   :  { %94 = vst [vmem:[#allocation2 + $0x10] sm:$0xff] %v93_v47  ;;  %v70_v47 = vsel %vm68_vm8, %v37_v45, 0.0 }
 0x399   :  { %v214_v50 = vld [vmem:[#allocation2 + $0x17] ss:$0 sm:$0xff]  ;;  %v228_v58 = vld [vmem:[#allocation2 + $0x16] ss:$0 sm:$0xff]  ;;  %v242_v4 = vld [vmem:[#allocation2 + $0x15] ss:$0 sm:$0xff] }
 0x39a   :  { %v215_v51 = vxor.u32 2147483648, %v214_v50  ;;  %v229_v59 = vxor.u32 2147483648, %v228_v58  ;;  %v243_v6 = vxor.u32 2147483648, %v242_v4  ;;  %v256_v14 = vld [vmem:[#allocation2 + $0x14] ss:$0 sm:$0xff] }
 0x39b   :  { %v257_v16 = vxor.u32 2147483648, %v256_v14  ;;  %v270_v22 = vld [vmem:[#allocation2 + $0x13] ss:$0 sm:$0xff]  ;;  %v284_v30 = vld [vmem:[#allocation2 + $0x12] ss:$0 sm:$0xff] }
 0x39c   :  { %v219_v52 = vmul.f32 %v215_v51, %v131_v49  ;;  %v271_v24 = vxor.u32 2147483648, %v270_v22  ;;  %v285_v32 = vxor.u32 2147483648, %v284_v30  ;;  %v298_v38 = vld [vmem:[#allocation2 + $0x11] ss:$0 sm:$0xff] }
 0x39d   :  { %v299_v41 = vxor.u32 2147483648, %v298_v38 }
 0x39e   :  { %220 = vadd.xlane.f32.xlu1 %v219_v52 }
 0x411   :  { %v201_v54 = vpop.xlane.xlu0 %200 }
 0x412   :  { %v202_v56 = vsel %vm198_vm15, %v201_v54, %v192_v42  ;;  %v75_v54 = vsel %vm74_vm10, %v37_v45, 0.0  ;;  %vm348_vm15 = vcmp.eq.s32.totalorder %v741_v1, 14  ;;  %vm474_vm10 = vcmp.eq.s32.totalorder %v741_v1, 7 }
 0x413   :  { %v209_v57 = vmul.f32 %v205_v55, %v202_v56 }
 0x415   :  { %210 = vadd.xlane.f32.xlu0 %v209_v57 }
 0x42b   :  { %v221_v60 = vpop.xlane.xlu1 %220 }
 0x42c   :  { %v222_v61 = vsel %vm218_vm1, %v221_v60, %v131_v49 }
 0x42d   :  { %v233_v62 = vmul.f32 %v229_v59, %v222_v61 }
 0x42f   :  { %234 = vadd.xlane.f32.xlu1 %v233_v62 }
 0x4a2   :  { %v211_v63 = vpop.xlane.xlu0 %210 }
 0x4a3   :  { %v212_v0 = vsel %vm208_vm2, %v211_v63, %v202_v56  ;;  %vm384_vm2 = vcmp.eq.s32.totalorder %v741_v1, 12 }
 0x4a4   :  { %v223_v3 = vmul.f32 %v215_v51, %v212_v0 }
 0x4a6   :  { %224 = vadd.xlane.f32.xlu0 %v223_v3  ;;  %v124_v3 = vsel %vm123_vm12, -1.0, %v730_v48  ;;  %vm518_vm12 = vcmp.eq.s32.totalorder %v741_v1, 5 }
 0x4bc   :  { %v235_v5 = vpop.xlane.xlu1 %234 }
 0x4bd   :  { %v236_v9 = vsel %vm232_vm3, %v235_v5, %v222_v61 }
 0x4be   :  { %v247_v10 = vmul.f32 %v243_v6, %v236_v9 }
 0x4c0   :  { %248 = vadd.xlane.f32.xlu1 %v247_v10 }
 0x533   :  { %v225_v11 = vpop.xlane.xlu0 %224 }
 0x534   :  { %v226_v12 = vsel %vm218_vm1, %v225_v11, %v212_v0  ;;  %vm366_vm1 = vcmp.eq.s32.totalorder %v741_v1, 13 }
 0x535   :  { %v237_v13 = vmul.f32 %v229_v59, %v226_v12  ;;  %v312_v59 = vld [vmem:[#allocation2 + $0x10] ss:$0 sm:$0xff] }
 0x536   :  { %v313_v63 = vxor.u32 2147483648, %v312_v59 }
 0x537   :  { %238 = vadd.xlane.f32.xlu0 %v237_v13 }
 0x54d   :  { %v249_v15 = vpop.xlane.xlu1 %248 }
 0x54e   :  { %v250_v17 = vsel %vm246_vm4, %v249_v15, %v236_v9 }
 0x54f   :  { %v261_v18 = vmul.f32 %v257_v16, %v250_v17 }
 0x551   :  { %262 = vadd.xlane.f32.xlu1 %v261_v18 }
 0x5c4   :  { %v239_v19 = vpop.xlane.xlu0 %238 }
 0x5c5   :  { %v240_v20 = vsel %vm232_vm3, %v239_v19, %v226_v12  ;;  %vm402_vm3 = vcmp.eq.s32.totalorder %v741_v1, 11 }
 0x5c6   :  { %v251_v21 = vmul.f32 %v243_v6, %v240_v20 }
 0x5c8   :  { %252 = vadd.xlane.f32.xlu0 %v251_v21 }
 0x5de   :  { %v263_v23 = vpop.xlane.xlu1 %262 }
 0x5df   :  { %v264_v25 = vsel %vm260_vm5, %v263_v23, %v250_v17 }
 0x5e0   :  { %v275_v26 = vmul.f32 %v271_v24, %v264_v25 }
 0x5e2   :  { %276 = vadd.xlane.f32.xlu1 %v275_v26 }
 0x655   :  { %v253_v27 = vpop.xlane.xlu0 %252 }
 0x656   :  { %v254_v28 = vsel %vm246_vm4, %v253_v27, %v240_v20  ;;  %vm420_vm4 = vcmp.eq.s32.totalorder %v741_v1, 10 }
 0x657   :  { %v265_v29 = vmul.f32 %v257_v16, %v254_v28 }
 0x659   :  { %266 = vadd.xlane.f32.xlu0 %v265_v29 }
 0x66f   :  { %v277_v31 = vpop.xlane.xlu1 %276 }
 0x670   :  { %v278_v33 = vsel %vm274_vm6, %v277_v31, %v264_v25 }
 0x671   :  { %v289_v34 = vmul.f32 %v285_v32, %v278_v33 }
 0x673   :  { %290 = vadd.xlane.f32.xlu1 %v289_v34 }
 0x6e6   :  { %v267_v35 = vpop.xlane.xlu0 %266 }
 0x6e7   :  { %v268_v36 = vsel %vm260_vm5, %v267_v35, %v254_v28  ;;  %vm52_vm5 = vcmp.eq.s32.totalorder %v743_v2, %v741_v1 }
 0x6e8   :  { %v279_v37 = vmul.f32 %v271_v24, %v268_v36 }
 0x6ea   :  { %280 = vadd.xlane.f32.xlu0 %v279_v37 }
 0x700   :  { %v291_v40 = vpop.xlane.xlu1 %290 }
 0x701   :  { %v292_v42 = vsel %vm288_vm7, %v291_v40, %v278_v33 }
 0x702   :  { %v303_v43 = vmul.f32 %v299_v41, %v292_v42 }
 0x704   :  { %304 = vadd.xlane.f32.xlu1 %v303_v43 }
 0x708   :  { %71 = vadd.xlane.f32.xlu1 %v70_v47 }
 0x777   :  { %v281_v49 = vpop.xlane.xlu0 %280 }
 0x778   :  { %v282_v50 = vsel %vm274_vm6, %v281_v49, %v268_v36  ;;  %vm438_vm6 = vcmp.eq.s32.totalorder %v741_v1, 9 }
 0x779   :  { %v293_v51 = vmul.f32 %v285_v32, %v282_v50 }
 0x77b   :  { %294 = vadd.xlane.f32.xlu0 %v293_v51 }
 0x791   :  { %v305_v52 = vpop.xlane.xlu1 %304 }
 0x792   :  { %v306_v62 = vsel %vm302_vm11, %v305_v52, %v292_v42 }
 0x793   :  { %v317_v4 = vmul.f32 %v313_v63, %v306_v62 }
 0x795   :  { %v818_v53 = vpop.xlane.xlu1 %71 }
 0x796   :  { %725 = vrcp.f32 %v818_v53 }
 0x7a0   :  { %v824_v55 = vpop.eup %725 }
 0x7a1   :  { %v77_v56 = vmul.f32 %v824_v55, %v75_v54 }
 0x7a3   :  { %78 = vst [vmem:[#allocation2 + $0x8] sm:$0xff] %v77_v56 }
 0x7aa   :  { %v326_v60 = vld [vmem:[#allocation2 + $0xf] ss:$0 sm:$0xff]  ;;  %v344_v11 = vld [vmem:[#allocation2 + $0xe] ss:$0 sm:$0xff]  ;;  %v362_v24 = vld [vmem:[#allocation2 + $0xd] ss:$0 sm:$0xff] }
 0x7ab   :  { %v327_v0 = vxor.u32 2147483648, %v326_v60  ;;  %v345_v15 = vxor.u32 2147483648, %v344_v11  ;;  %v363_v27 = vxor.u32 2147483648, %v362_v24  ;;  %v380_v35 = vld [vmem:[#allocation2 + $0xc] ss:$0 sm:$0xff] }
 0x7ac   :  { %v381_v38 = vxor.u32 2147483648, %v380_v35  ;;  %v398_v49 = vld [vmem:[#allocation2 + $0xb] ss:$0 sm:$0xff] }
 0x7ad   :  { %v331_v5 = vmul.f32 %v327_v0, %v124_v3  ;;  %v399_v52 = vxor.u32 2147483648, %v398_v49 }
 0x808   :  { %v295_v57 = vpop.xlane.xlu0 %294 }
 0x809   :  { %v296_v58 = vsel %vm288_vm7, %v295_v57, %v282_v50  ;;  %vm57_vm7 = vcmp.le.s32.totalorder %v743_v2, %v741_v1 }
 0x80a   :  { %v307_v61 = vmul.f32 %v299_v41, %v296_v58  ;;  %vm58_vm8 = vmand %vm57_vm7, %vm48_vm0  ;;  %vm456_vm0 = vcmp.eq.s32.totalorder %v741_v1, 8 }
 0x80c   :  { %308 = vadd.xlane.f32.xlu0 %v307_v61 }
 0x810   :  { %318 = vadd.xlane.f32.xlu0 %v317_v4 }
 0x814   :  { %332 = vadd.xlane.f32.xlu0 %v331_v5 }
 0x899   :  { %v309_v6 = vpop.xlane.xlu0 %308 }
 0x89a   :  { %v310_v9 = vsel %vm302_vm11, %v309_v6, %v296_v58  ;;  %vm496_vm11 = vcmp.eq.s32.totalorder %v741_v1, 6 }
 0x89b   :  { %v321_v10 = vmul.f32 %v313_v63, %v310_v9 }
 0x89d   :  { %v319_v12 = vpop.xlane.xlu0 %318  ;;  %322 = vadd.xlane.f32.xlu1 %v321_v10 }
 0x89e   :  { %v320_v13 = vsel %vm316_vm13, %v319_v12, %v306_v62  ;;  %v416_v62 = vld [vmem:[#allocation2 + $0xa] ss:$0 sm:$0xff] }
 0x89f   :  { %v335_v14 = vmul.f32 %v327_v0, %v320_v13 }
 0x8a1   :  { %336 = vadd.xlane.f32.xlu1 %v335_v14  ;;  %v333_v16 = vpop.xlane.xlu0 %332 }
 0x8a2   :  { %v334_v17 = vsel %vm330_vm14, %v333_v16, %v124_v3  ;;  %v417_v3 = vxor.u32 2147483648, %v416_v62 }
 0x8a3   :  { %v349_v18 = vmul.f32 %v345_v15, %v334_v17 }
 0x8a5   :  { %350 = vadd.xlane.f32.xlu1 %v349_v18 }
 0x92a   :  { %v323_v19 = vpop.xlane.xlu1 %322 }
 0x92b   :  { %v324_v20 = vsel %vm316_vm13, %v323_v19, %v310_v9  ;;  %vm540_vm13 = vcmp.eq.s32.totalorder %v741_v1, 4 }
 0x92c   :  { %v339_v21 = vmul.f32 %v327_v0, %v324_v20 }
 0x92e   :  { %340 = vadd.xlane.f32.xlu0 %v339_v21  ;;  %v337_v22 = vpop.xlane.xlu1 %336 }
 0x92f   :  { %v338_v23 = vsel %vm330_vm14, %v337_v22, %v320_v13  ;;  %v434_v13 = vld [vmem:[#allocation2 + $0x9] ss:$0 sm:$0xff] }
 0x930   :  { %v353_v25 = vmul.f32 %v345_v15, %v338_v23  ;;  %v435_v16 = vxor.u32 2147483648, %v434_v13 }
 0x932   :  { %354 = vadd.xlane.f32.xlu0 %v353_v25  ;;  %v351_v26 = vpop.xlane.xlu1 %350  ;;  %v35_v25 = vld [vmem:[%s1003_s0] sm:$0xff] }
 0x933   :  { %v352_v28 = vsel %vm348_vm15, %v351_v26, %v334_v17  ;;  %v54_v26 = vsel %vm52_vm5, %v35_v25, 0.0  ;;  %vm651_vm5 = vweird.f32 %v818_v53 }
 0x934   :  { %v367_v29 = vmul.f32 %v363_v27, %v352_v28 }
 0x936   :  { %368 = vadd.xlane.f32.xlu0 %v367_v29 }
 0x9bb   :  { %v341_v30 = vpop.xlane.xlu0 %340 }
 0x9bc   :  { %v342_v31 = vsel %vm330_vm14, %v341_v30, %v324_v20  ;;  %v452_v30 = vld [vmem:[#allocation2 + $0x8] ss:$0 sm:$0xff]  ;;  %vm562_vm14 = vcmp.eq.s32.totalorder %v741_v1, 3 }
 0x9bd   :  { %v357_v32 = vmul.f32 %v345_v15, %v342_v31 }
 0x9bf   :  { %358 = vadd.xlane.f32.xlu1 %v357_v32  ;;  %v355_v33 = vpop.xlane.xlu0 %354 }
 0x9c0   :  { %v356_v34 = vsel %vm348_vm15, %v355_v33, %v338_v23 }
 0x9c1   :  { %v371_v36 = vmul.f32 %v363_v27, %v356_v34 }
 0x9c3   :  { %372 = vadd.xlane.f32.xlu1 %v371_v36  ;;  %v369_v37 = vpop.xlane.xlu0 %368 }
 0x9c4   :  { %v370_v39 = vsel %vm366_vm1, %v369_v37, %v352_v28 }
 0x9c5   :  { %v385_v40 = vmul.f32 %v381_v38, %v370_v39 }
 0x9c7   :  { %386 = vadd.xlane.f32.xlu1 %v385_v40 }
 0xa4c   :  { %v359_v41 = vpop.xlane.xlu1 %358 }
 0xa4d   :  { %v360_v42 = vsel %vm348_vm15, %v359_v41, %v342_v31  ;;  %vm584_vm15 = vcmp.eq.s32.totalorder %v741_v1, 2 }
 0xa4e   :  { %v375_v43 = vmul.f32 %v363_v27, %v360_v42 }
 0xa50   :  { %376 = vadd.xlane.f32.xlu0 %v375_v43  ;;  %v373_v45 = vpop.xlane.xlu1 %372 }
 0xa51   :  { %v374_v47 = vsel %vm366_vm1, %v373_v45, %v356_v34  ;;  %v453_v34 = vxor.u32 2147483648, %v452_v30 }
 0xa52   :  { %v389_v50 = vmul.f32 %v381_v38, %v374_v47 }
 0xa54   :  { %390 = vadd.xlane.f32.xlu0 %v389_v50  ;;  %v387_v51 = vpop.xlane.xlu1 %386 }
 0xa55   :  { %v388_v54 = vsel %vm384_vm2, %v387_v51, %v370_v39  ;;  %v59_v39 = vsel %vm58_vm8, %v35_v25, 0.0 }
 0xa56   :  { %v403_v56 = vmul.f32 %v399_v52, %v388_v54 }
 0xa58   :  { %404 = vadd.xlane.f32.xlu0 %v403_v56 }
 0xadd   :  { %v377_v57 = vpop.xlane.xlu0 %376 }
 0xade   :  { %v378_v58 = vsel %vm366_vm1, %v377_v57, %v360_v42  ;;  %v117_v42 = vsel %vm116_vm9, -1.0, %v730_v48  ;;  %vm606_vm1 = vcmp.eq.s32.totalorder %v741_v1, 1 }
 0xadf   :  { %v393_v59 = vmul.f32 %v381_v38, %v378_v58 }
 0xae1   :  { %394 = vadd.xlane.f32.xlu1 %v393_v59  ;;  %v391_v60 = vpop.xlane.xlu0 %390 }
 0xae2   :  { %v392_v61 = vsel %vm384_vm2, %v391_v60, %v374_v47 }
 0xae3   :  { %v407_v63 = vmul.f32 %v399_v52, %v392_v61 }
 0xae5   :  { %408 = vadd.xlane.f32.xlu1 %v407_v63  ;;  %v405_v0 = vpop.xlane.xlu0 %404 }
 0xae6   :  { %v406_v4 = vsel %vm402_vm3, %v405_v0, %v388_v54 }
 0xae7   :  { %v421_v5 = vmul.f32 %v417_v3, %v406_v4 }
 0xae9   :  { %422 = vadd.xlane.f32.xlu1 %v421_v5 }
 0xb6e   :  { %v395_v6 = vpop.xlane.xlu1 %394 }
 0xb6f   :  { %v396_v9 = vsel %vm384_vm2, %v395_v6, %v378_v58  ;;  %vm627_vm2 = vcmp.eq.s32.totalorder %v741_v1, 0 }
 0xb70   :  { %v411_v10 = vmul.f32 %v399_v52, %v396_v9 }
 0xb72   :  { %412 = vadd.xlane.f32.xlu0 %v411_v10  ;;  %v409_v11 = vpop.xlane.xlu1 %408 }
 0xb73   :  { %v410_v12 = vsel %vm402_vm3, %v409_v11, %v392_v61 }
 0xb74   :  { %v425_v14 = vmul.f32 %v417_v3, %v410_v12 }
 0xb76   :  { %426 = vadd.xlane.f32.xlu0 %v425_v14  ;;  %v423_v15 = vpop.xlane.xlu1 %422 }
 0xb77   :  { %v424_v17 = vsel %vm420_vm4, %v423_v15, %v406_v4 }
 0xb78   :  { %v439_v18 = vmul.f32 %v435_v16, %v424_v17 }
 0xb7a   :  { %440 = vadd.xlane.f32.xlu0 %v439_v18 }
 0xbff   :  { %v413_v19 = vpop.xlane.xlu0 %412 }
 0xc00   :  { %v414_v20 = vsel %vm402_vm3, %v413_v19, %v396_v9 }
 0xc01   :  { %v429_v21 = vmul.f32 %v417_v3, %v414_v20 }
 0xc03   :  { %430 = vadd.xlane.f32.xlu1 %v429_v21  ;;  %v427_v22 = vpop.xlane.xlu0 %426 }
 0xc04   :  { %v428_v23 = vsel %vm420_vm4, %v427_v22, %v410_v12 }
 0xc05   :  { %v443_v24 = vmul.f32 %v435_v16, %v428_v23 }
 0xc07   :  { %444 = vadd.xlane.f32.xlu1 %v443_v24  ;;  %v441_v27 = vpop.xlane.xlu0 %440 }
 0xc08   :  { %v442_v32 = vsel %vm438_vm6, %v441_v27, %v424_v17 }
 0xc09   :  { %v457_v36 = vmul.f32 %v453_v34, %v442_v32 }
 0xc0b   :  { %55 = vadd.xlane.f32.xlu1 %v54_v26 }
 0xc90   :  { %v431_v28 = vpop.xlane.xlu1 %430 }
 0xc91   :  { %v432_v29 = vsel %vm420_vm4, %v431_v28, %v414_v20  ;;  %vm657_vm4 = vweird.f32 %v772_v44 }
 0xc92   :  { %v447_v31 = vmul.f32 %v435_v16, %v432_v29 }
 0xc94   :  { %448 = vadd.xlane.f32.xlu0 %v447_v31  ;;  %v445_v33 = vpop.xlane.xlu1 %444 }
 0xc95   :  { %v446_v35 = vsel %vm438_vm6, %v445_v33, %v428_v23 }
 0xc96   :  { %v461_v37 = vmul.f32 %v453_v34, %v446_v35 }
 0xc98   :  { %458 = vadd.xlane.f32.xlu0 %v457_v36  ;;  %462 = vadd.xlane.f32.xlu1 %v461_v37  ;;  %v889_v38 = vpop.xlane.xlu1 %55 }
 0xc99   :  { %727 = vrcp.f32 %v889_v38  ;;  %vm646_vm3 = vweird.f32 %v889_v38 }
 0xca3   :  { %v896_v40 = vpop.eup %727 }
 0xca4   :  { %v61_v41 = vmul.f32 %v896_v40, %v59_v39 }
 0xca6   :  { %62 = vst [vmem:[#allocation2] sm:$0xff] %v61_v41 }
 0xcad   :  { %v470_v43 = vld [vmem:[#allocation2 + $0x7] ss:$0 sm:$0xff]  ;;  %v492_v58 = vld [vmem:[#allocation2 + $0x6] ss:$0 sm:$0xff]  ;;  %v514_v12 = vld [vmem:[#allocation2 + $0x5] ss:$0 sm:$0xff] }
 0xcae   :  { %v471_v45 = vxor.u32 2147483648, %v470_v43  ;;  %v493_v59 = vxor.u32 2147483648, %v492_v58  ;;  %v515_v14 = vxor.u32 2147483648, %v514_v12  ;;  %v536_v26 = vld [vmem:[#allocation2 + $0x4] ss:$0 sm:$0xff] }
 0xcaf   :  { %v537_v28 = vxor.u32 2147483648, %v536_v26 }
 0xcb0   :  { %v475_v47 = vmul.f32 %v471_v45, %v117_v42 }
 0xcb2   :  { %476 = vadd.xlane.f32.xlu1 %v475_v47 }
 0xd21   :  { %v449_v49 = vpop.xlane.xlu0 %448 }
 0xd22   :  { %v450_v50 = vsel %vm438_vm6, %v449_v49, %v432_v29  ;;  %vm663_vm6 = vweird.f32 %v754_v7 }
 0xd23   :  { %v465_v51 = vmul.f32 %v453_v34, %v450_v50 }
 0xd25   :  { %466 = vadd.xlane.f32.xlu0 %v465_v51  ;;  %v459_v52 = vpop.xlane.xlu0 %458  ;;  %v463_v54 = vpop.xlane.xlu1 %462 }
 0xd26   :  { %v460_v56 = vsel %vm456_vm0, %v459_v52, %v442_v32  ;;  %v464_v2 = vsel %vm456_vm0, %v463_v54, %v446_v35 }
 0xd27   :  { %v479_v48 = vmul.f32 %v471_v45, %v460_v56  ;;  %v483_v57 = vmul.f32 %v471_v45, %v464_v2 }
 0xd29   :  { %480 = vadd.xlane.f32.xlu0 %v479_v48  ;;  %484 = vadd.xlane.f32.xlu1 %v483_v57 }
 0xd3f   :  { %v477_v60 = vpop.xlane.xlu1 %476 }
 0xd40   :  { %v478_v61 = vsel %vm474_vm10, %v477_v60, %v117_v42  ;;  %v558_v42 = vld [vmem:[#allocation2 + $0x3] ss:$0 sm:$0xff] }
 0xd41   :  { %v497_v62 = vmul.f32 %v493_v59, %v478_v61 }
 0xd43   :  { %498 = vadd.xlane.f32.xlu1 %v497_v62 }
 0xdb2   :  { %v467_v63 = vpop.xlane.xlu0 %466 }
 0xdb3   :  { %v468_v0 = vsel %vm456_vm0, %v467_v63, %v450_v50 }
 0xdb4   :  { %v487_v3 = vmul.f32 %v471_v45, %v468_v0  ;;  %v559_v45 = vxor.u32 2147483648, %v558_v42 }
 0xdb6   :  { %488 = vadd.xlane.f32.xlu0 %v487_v3  ;;  %v481_v4 = vpop.xlane.xlu0 %480  ;;  %v485_v5 = vpop.xlane.xlu1 %484 }
 0xdb7   :  { %v482_v6 = vsel %vm474_vm10, %v481_v4, %v460_v56  ;;  %v486_v9 = vsel %vm474_vm10, %v485_v5, %v464_v2 }
 0xdb8   :  { %v501_v10 = vmul.f32 %v493_v59, %v482_v6  ;;  %v505_v11 = vmul.f32 %v493_v59, %v486_v9 }
 0xdba   :  { %502 = vadd.xlane.f32.xlu0 %v501_v10  ;;  %506 = vadd.xlane.f32.xlu1 %v505_v11 }
 0xdd0   :  { %v499_v13 = vpop.xlane.xlu1 %498 }
 0xdd1   :  { %v500_v15 = vsel %vm496_vm11, %v499_v13, %v478_v61  ;;  %v602_v13 = vld [vmem:[#allocation2 + $0x1] ss:$0 sm:$0xff] }
 0xdd2   :  { %v519_v16 = vmul.f32 %v515_v14, %v500_v15 }
 0xdd4   :  { %520 = vadd.xlane.f32.xlu1 %v519_v16 }
 0xe43   :  { %v489_v17 = vpop.xlane.xlu0 %488 }
 0xe44   :  { %v490_v18 = vsel %vm474_vm10, %v489_v17, %v468_v0 }
 0xe45   :  { %v509_v19 = vmul.f32 %v493_v59, %v490_v18  ;;  %v580_v59 = vld [vmem:[#allocation2 + $0x2] ss:$0 sm:$0xff] }
 0xe46   :  { %v581_v61 = vxor.u32 2147483648, %v580_v59 }
 0xe47   :  { %510 = vadd.xlane.f32.xlu0 %v509_v19  ;;  %v503_v20 = vpop.xlane.xlu0 %502  ;;  %v507_v21 = vpop.xlane.xlu1 %506 }
 0xe48   :  { %v504_v22 = vsel %vm496_vm11, %v503_v20, %v482_v6  ;;  %v508_v23 = vsel %vm496_vm11, %v507_v21, %v486_v9 }
 0xe49   :  { %v523_v24 = vmul.f32 %v515_v14, %v504_v22  ;;  %v527_v25 = vmul.f32 %v515_v14, %v508_v23 }
 0xe4b   :  { %524 = vadd.xlane.f32.xlu0 %v523_v24  ;;  %528 = vadd.xlane.f32.xlu1 %v527_v25 }
 0xe61   :  { %v521_v27 = vpop.xlane.xlu1 %520 }
 0xe62   :  { %v522_v29 = vsel %vm518_vm12, %v521_v27, %v500_v15  ;;  %v603_v15 = vxor.u32 2147483648, %v602_v13  ;;  %v623_v27 = vld [vmem:[#allocation2] ss:$0 sm:$0xff] }
 0xe63   :  { %v541_v30 = vmul.f32 %v537_v28, %v522_v29 }
 0xe65   :  { %542 = vadd.xlane.f32.xlu1 %v541_v30 }
 0xed4   :  { %v511_v31 = vpop.xlane.xlu0 %510 }
 0xed5   :  { %v512_v32 = vsel %vm496_vm11, %v511_v31, %v490_v18 }
 0xed6   :  { %v531_v33 = vmul.f32 %v515_v14, %v512_v32 }
 0xed8   :  { %532 = vadd.xlane.f32.xlu0 %v531_v33  ;;  %v525_v34 = vpop.xlane.xlu0 %524  ;;  %v529_v35 = vpop.xlane.xlu1 %528 }
 0xed9   :  { %v526_v36 = vsel %vm518_vm12, %v525_v34, %v504_v22  ;;  %v530_v37 = vsel %vm518_vm12, %v529_v35, %v508_v23 }
 0xeda   :  { %v545_v39 = vmul.f32 %v537_v28, %v526_v36  ;;  %v549_v41 = vmul.f32 %v537_v28, %v530_v37 }
 0xedc   :  { %546 = vadd.xlane.f32.xlu0 %v545_v39  ;;  %550 = vadd.xlane.f32.xlu1 %v549_v41 }
 0xef2   :  { %v543_v43 = vpop.xlane.xlu1 %542 }
 0xef3   :  { %v544_v47 = vsel %vm540_vm13, %v543_v43, %v522_v29  ;;  %v624_v29 = vxor.u32 2147483648, %v623_v27 }
 0xef4   :  { %v563_v49 = vmul.f32 %v559_v45, %v544_v47 }
 0xef6   :  { %564 = vadd.xlane.f32.xlu1 %v563_v49 }
 0xf65   :  { %v533_v50 = vpop.xlane.xlu0 %532 }
 0xf66   :  { %v534_v51 = vsel %vm518_vm12, %v533_v50, %v512_v32 }
 0xf67   :  { %v553_v52 = vmul.f32 %v537_v28, %v534_v51 }
 0xf69   :  { %554 = vadd.xlane.f32.xlu0 %v553_v52  ;;  %v547_v54 = vpop.xlane.xlu0 %546  ;;  %v551_v56 = vpop.xlane.xlu1 %550 }
 0xf6a   :  { %v548_v2 = vsel %vm540_vm13, %v547_v54, %v526_v36  ;;  %v552_v48 = vsel %vm540_vm13, %v551_v56, %v530_v37 }
 0xf6b   :  { %v567_v57 = vmul.f32 %v559_v45, %v548_v2  ;;  %v571_v58 = vmul.f32 %v559_v45, %v552_v48 }
 0xf6d   :  { %568 = vadd.xlane.f32.xlu0 %v567_v57  ;;  %572 = vadd.xlane.f32.xlu1 %v571_v58 }
 0xf83   :  { %v565_v60 = vpop.xlane.xlu1 %564 }
 0xf84   :  { %v566_v62 = vsel %vm562_vm14, %v565_v60, %v544_v47 }
 0xf85   :  { %v585_v63 = vmul.f32 %v581_v61, %v566_v62 }
 0xf87   :  { %586 = vadd.xlane.f32.xlu1 %v585_v63 }
 0xff6   :  { %v555_v0 = vpop.xlane.xlu0 %554 }
 0xff7   :  { %v556_v3 = vsel %vm540_vm13, %v555_v0, %v534_v51 }
 0xff8   :  { %v575_v4 = vmul.f32 %v559_v45, %v556_v3 }
 0xffa   :  { %576 = vadd.xlane.f32.xlu0 %v575_v4  ;;  %v569_v5 = vpop.xlane.xlu0 %568  ;;  %v573_v6 = vpop.xlane.xlu1 %572 }
 0xffb   :  { %v570_v9 = vsel %vm562_vm14, %v569_v5, %v548_v2  ;;  %v574_v10 = vsel %vm562_vm14, %v573_v6, %v552_v48 }
 0xffc   :  { %v589_v11 = vmul.f32 %v581_v61, %v570_v9  ;;  %v593_v12 = vmul.f32 %v581_v61, %v574_v10 }
 0xffe   :  { %590 = vadd.xlane.f32.xlu0 %v589_v11  ;;  %594 = vadd.xlane.f32.xlu1 %v593_v12 }
0x1014   :  { %v587_v14 = vpop.xlane.xlu1 %586 }
0x1015   :  { %v588_v16 = vsel %vm584_vm15, %v587_v14, %v566_v62 }
0x1016   :  { %v607_v17 = vmul.f32 %v603_v15, %v588_v16 }
0x1018   :  { %608 = vadd.xlane.f32.xlu1 %v607_v17 }
0x1087   :  { %v577_v18 = vpop.xlane.xlu0 %576 }
0x1088   :  { %v578_v19 = vsel %vm562_vm14, %v577_v18, %v556_v3 }
0x1089   :  { %v597_v20 = vmul.f32 %v581_v61, %v578_v19 }
0x108b   :  { %598 = vadd.xlane.f32.xlu0 %v597_v20  ;;  %v591_v21 = vpop.xlane.xlu0 %590  ;;  %v595_v22 = vpop.xlane.xlu1 %594 }
0x108c   :  { %v592_v23 = vsel %vm584_vm15, %v591_v21, %v570_v9  ;;  %v596_v24 = vsel %vm584_vm15, %v595_v22, %v574_v10 }
0x108d   :  { %v611_v25 = vmul.f32 %v603_v15, %v592_v23  ;;  %v615_v26 = vmul.f32 %v603_v15, %v596_v24 }
0x108f   :  { %612 = vadd.xlane.f32.xlu0 %v611_v25  ;;  %616 = vadd.xlane.f32.xlu1 %v615_v26 }
0x10a5   :  { %v609_v28 = vpop.xlane.xlu1 %608 }
0x10a6   :  { %v610_v30 = vsel %vm606_vm1, %v609_v28, %v588_v16 }
0x10a7   :  { %v628_v31 = vmul.f32 %v624_v29, %v610_v30 }
0x10a9   :  { %629 = vadd.xlane.f32.xlu1 %v628_v31 }
0x1118   :  { %v599_v32 = vpop.xlane.xlu0 %598 }
0x1119   :  { %v600_v33 = vsel %vm584_vm15, %v599_v32, %v578_v19 }
0x111a   :  { %v619_v34 = vmul.f32 %v603_v15, %v600_v33 }
0x111c   :  { %620 = vadd.xlane.f32.xlu0 %v619_v34  ;;  %v613_v35 = vpop.xlane.xlu0 %612  ;;  %v617_v36 = vpop.xlane.xlu1 %616 }
0x111d   :  { %v614_v37 = vsel %vm606_vm1, %v613_v35, %v592_v23  ;;  %v618_v39 = vsel %vm606_vm1, %v617_v36, %v596_v24 }
0x111e   :  { %v632_v41 = vmul.f32 %v624_v29, %v614_v37  ;;  %v636_v42 = vmul.f32 %v624_v29, %v618_v39 }
0x1120   :  { %633 = vadd.xlane.f32.xlu0 %v632_v41  ;;  %637 = vadd.xlane.f32.xlu1 %v636_v42 }
0x1136   :  { %v630_v43 = vpop.xlane.xlu1 %629 }
0x1137   :  { %v631_v45 = vsel %vm627_vm2, %v630_v43, %v610_v30 }
0x1138   :  { %v645_v47 = vmul.f32 %v896_v40, %v631_v45 }
0x113a   :  { %v647_v49 = vsel %vm646_vm3, %v631_v45, %v645_v47 }
0x113b   :  { %701 = vst [vmem:[%s1004_s1] sm:$0xff] %v647_v49 }
0x11a9   :  { %v621_v50 = vpop.xlane.xlu0 %620 }
0x11aa   :  { %v622_v51 = vsel %vm606_vm1, %v621_v50, %v600_v33 }
0x11ab   :  { %v640_v52 = vmul.f32 %v624_v29, %v622_v51 }
0x11ad   :  { %641 = vadd.xlane.f32.xlu0 %v640_v52  ;;  %v634_v54 = vpop.xlane.xlu0 %633  ;;  %v638_v56 = vpop.xlane.xlu1 %637 }
0x11ae   :  { %v635_v2 = vsel %vm627_vm2, %v634_v54, %v614_v37  ;;  %v639_v40 = vsel %vm627_vm2, %v638_v56, %v618_v39 }
0x11af   :  { %v650_v38 = vmul.f32 %v824_v55, %v635_v2  ;;  %v656_v48 = vmul.f32 %v778_v46, %v639_v40 }
0x11b1   :  { %v652_v57 = vsel %vm651_vm5, %v635_v2, %v650_v38  ;;  %v658_v58 = vsel %vm657_vm4, %v639_v40, %v656_v48 }
0x11b2   :  { %703 = vst [vmem:[%s1004_s1 + $0x8] sm:$0xff] %v652_v57  ;;  %705 = vst [vmem:[%s1004_s1 + $0x10] sm:$0xff] %v658_v58 }
0x123a   :  { %v642_v59 = vpop.xlane.xlu0 %641 }
0x123b   :  { %v643_v55 = vsel %vm627_vm2, %v642_v59, %v622_v51 }
0x123c   :  { %v662_v46 = vmul.f32 %v757_v8, %v643_v55 }
0x123e   :  { %v664_v44 = vsel %vm663_vm6, %v643_v55, %v662_v46 }
0x123f   :  { %707 = vst [vmem:[%s1004_s1 + $0x18] sm:$0xff] %v664_v44 }

// kernel: custom-call.18
= control target key start
LH: loop header
LB: loop body
LE: loop exit
PB: predicated region body
PF: predicated region fallthrough
CT: control target
= control target key end

     0   :  { %v592_v0 = vmov 0.0   ;;  %vm41_vm0 = vcmask 7168   ;;  %vm72_vm1 = vcmask 15368   ;;  %vm89_vm2 = vcmask 1047553   ;;  %s676_s0 = inlined_call_operand.vmem [shape: f32[16,16], index: 0, kind: input, shape index: {}]   ;;  %s677_s1 = inlined_call_operand.vmem [shape: f32[16,16], index: 1, kind: output, shape index: {}]  }
   0x1   :  { %38 = vst [vmem:[#allocation1] sm:$0xff] %v592_v0  ;;  %v606_v4 = vld [vmem:[%s676_s0] sm:$0xff]  ;;  %v612_v5 = vld [vmem:[%s676_s0 + $0x8] sm:$0xff]  ;;  %vm90_vm3 = vmand %vm72_vm1, %vm89_vm2  ;;  %vm107_vm4 = vcmask 23568   ;;  %vm124_vm5 = vcmask 1047554   ;;  %vm142_vm7 = vcmask 31768  }
   0x2   :  { %32 = vst [vmem:[#allocation0] sm:$0xff] %v606_v4  ;;  %34 = vst [vmem:[#allocation0 + $0x8] sm:$0xff] %v612_v5  ;;  %vm159_vm8 = vcmask 1047555   ;;  %vm177_vm10 = vcmask 39968   ;;  %vm194_vm11 = vcmask 1047556   ;;  %vm212_vm13 = vcmask 48168  }
   0x3   :  { %vm125_vm6 = vmand %vm107_vm4, %vm124_vm5  ;;  %vm229_vm14 = vcmask 1047557  }
   0x4   :  { %vm160_vm9 = vmand %vm142_vm7, %vm159_vm8 }
   0x5   :  { %vm195_vm12 = vmand %vm177_vm10, %vm194_vm11 }
   0x6   :  { %vm230_vm15 = vmand %vm212_vm13, %vm229_vm14 }
   0x8   :  { %v42_v1 = vld [vmem:[#allocation1] ss:$0 sm:$0xff] }
   0x9   :  { %v44_v2 = vmul.f32 %v42_v1, %v42_v1  ;;  %v63_v3 = vmul.f32 0.0, %v42_v1  ;;  %v43_v6 = vld [vmem:[#allocation0] ss:$0 sm:$0xff]  ;;  %v76_v22 = vld [vmem:[#allocation0 + $0x1] ss:$0 sm:$0xff] }
   0xa   :  { %v111_v40 = vld [vmem:[#allocation0 + $0x2] ss:$0 sm:$0xff]  ;;  %v146_v58 = vld [vmem:[#allocation0 + $0x3] ss:$0 sm:$0xff] }
   0xb   :  { %45 = vadd.xlane.f32.xlu0 %v44_v2  ;;  %64 = vadd.xlane.f32.xlu1 %v63_v3 }
   0xf   :  { %52 = vadd.xlane.f32.xlu0 %v63_v3 }
  0x98   :  { %v46_v7 = vpop.xlane.xlu0 %45  ;;  %v65_v13 = vpop.xlane.xlu1 %64 }
  0x99   :  { %v47_v8 = vsub.f32 %v43_v6, %v46_v7  ;;  %v66_v15 = vsub.f32 %v612_v5, %v65_v13 }
  0x9b   :  { %560 = vrsqrt.f32 %v47_v8 }
  0x9c   :  { %v53_v9 = vpop.xlane.xlu0 %52 }
  0x9d   :  { %v54_v10 = vsub.f32 %v606_v4, %v53_v9 }
  0xa5   :  { %v561_v11 = vpop.eup %560 }
  0xa6   :  { %v55_v12 = vmul.f32 %v561_v11, %v54_v10  ;;  %v67_v16 = vmul.f32 %v561_v11, %v66_v15 }
  0xa8   :  { %v56_v14 = vsel %vm41_vm0, %v55_v12, 0.0  ;;  %v68_v17 = vsel %vm41_vm0, %v67_v16, 0.0  ;;  %vm247_vm0 = vcmask 56368  }
  0xa9   :  { %58 = vst [vmem:[#allocation1] sm:$0xff] %v56_v14 }
  0xb0   :  { %v74_v18 = vld [vmem:[#allocation1 + $0x1] ss:$0 sm:$0xff] }
  0xb1   :  { %v84_v19 = vmul.f32 %v74_v18, %v56_v14  ;;  %v77_v20 = vmul.f32 %v74_v18, %v74_v18  ;;  %v98_v21 = vmul.f32 %v74_v18, %v68_v17 }
  0xb3   :  { %85 = vadd.xlane.f32.xlu0 %v84_v19  ;;  %78 = vadd.xlane.f32.xlu1 %v77_v20 }
  0xb7   :  { %99 = vadd.xlane.f32.xlu1 %v98_v21 }
 0x140   :  { %v79_v23 = vpop.xlane.xlu1 %78  ;;  %v86_v25 = vpop.xlane.xlu0 %85 }
 0x141   :  { %v80_v24 = vsub.f32 %v76_v22, %v79_v23  ;;  %v87_v26 = vsub.f32 %v606_v4, %v86_v25 }
 0x143   :  { %562 = vrsqrt.f32 %v80_v24 }
 0x144   :  { %v100_v31 = vpop.xlane.xlu1 %99 }
 0x145   :  { %v101_v32 = vsub.f32 %v612_v5, %v100_v31 }
 0x14d   :  { %v563_v27 = vpop.eup %562 }
 0x14e   :  { %v88_v28 = vmul.f32 %v563_v27, %v87_v26  ;;  %v102_v33 = vmul.f32 %v563_v27, %v101_v32  ;;  %v216_v32 = vld [vmem:[#allocation0 + $0x5] ss:$0 sm:$0xff] }
 0x150   :  { %v91_v29 = vsel %vm90_vm3, %v88_v28, 0.0  ;;  %v103_v34 = vsel %vm72_vm1, %v102_v33, 0.0  ;;  %vm264_vm1 = vcmask 1047558  }
 0x151   :  { %v92_v30 = vadd.f32 %v91_v29, %v56_v14  ;;  %v104_v38 = vadd.f32 %v103_v34, %v68_v17  ;;  %v181_v14 = vld [vmem:[#allocation0 + $0x4] ss:$0 sm:$0xff]  ;;  %vm265_vm3 = vmand %vm247_vm0, %vm264_vm1 }
 0x153   :  { %93 = vst [vmem:[#allocation1] sm:$0xff] %v92_v30 }
 0x15a   :  { %v109_v35 = vld [vmem:[#allocation1 + $0x2] ss:$0 sm:$0xff] }
 0x15b   :  { %v119_v36 = vmul.f32 %v109_v35, %v92_v30  ;;  %v112_v37 = vmul.f32 %v109_v35, %v109_v35  ;;  %v133_v39 = vmul.f32 %v109_v35, %v104_v38 }
 0x15d   :  { %120 = vadd.xlane.f32.xlu1 %v119_v36  ;;  %113 = vadd.xlane.f32.xlu0 %v112_v37 }
 0x161   :  { %134 = vadd.xlane.f32.xlu0 %v133_v39 }
 0x1ea   :  { %v114_v41 = vpop.xlane.xlu0 %113  ;;  %v121_v43 = vpop.xlane.xlu1 %120 }
 0x1eb   :  { %v115_v42 = vsub.f32 %v111_v40, %v114_v41  ;;  %v122_v44 = vsub.f32 %v606_v4, %v121_v43 }
 0x1ed   :  { %564 = vrsqrt.f32 %v115_v42 }
 0x1ee   :  { %v135_v49 = vpop.xlane.xlu0 %134 }
 0x1ef   :  { %v136_v50 = vsub.f32 %v612_v5, %v135_v49 }
 0x1f7   :  { %v565_v45 = vpop.eup %564 }
 0x1f8   :  { %v123_v46 = vmul.f32 %v565_v45, %v122_v44  ;;  %v137_v51 = vmul.f32 %v565_v45, %v136_v50  ;;  %v251_v50 = vld [vmem:[#allocation0 + $0x6] ss:$0 sm:$0xff] }
 0x1fa   :  { %v126_v47 = vsel %vm125_vm6, %v123_v46, 0.0  ;;  %v138_v52 = vsel %vm107_vm4, %v137_v51, 0.0  ;;  %vm282_vm4 = vcmask 64568   ;;  %vm317_vm6 = vcmask 72768  }
 0x1fb   :  { %v127_v48 = vadd.f32 %v126_v47, %v92_v30  ;;  %v139_v56 = vadd.f32 %v138_v52, %v104_v38 }
 0x1fd   :  { %128 = vst [vmem:[#allocation1] sm:$0xff] %v127_v48 }
 0x204   :  { %v144_v53 = vld [vmem:[#allocation1 + $0x3] ss:$0 sm:$0xff] }
 0x205   :  { %v154_v54 = vmul.f32 %v144_v53, %v127_v48  ;;  %v147_v55 = vmul.f32 %v144_v53, %v144_v53  ;;  %v168_v57 = vmul.f32 %v144_v53, %v139_v56 }
 0x207   :  { %155 = vadd.xlane.f32.xlu0 %v154_v54  ;;  %148 = vadd.xlane.f32.xlu1 %v147_v55 }
 0x20b   :  { %169 = vadd.xlane.f32.xlu1 %v168_v57 }
 0x294   :  { %v149_v59 = vpop.xlane.xlu1 %148  ;;  %v156_v61 = vpop.xlane.xlu0 %155 }
 0x295   :  { %v150_v60 = vsub.f32 %v146_v58, %v149_v59  ;;  %v157_v62 = vsub.f32 %v606_v4, %v156_v61 }
 0x297   :  { %566 = vrsqrt.f32 %v150_v60 }
 0x298   :  { %v170_v3 = vpop.xlane.xlu1 %169 }
 0x299   :  { %v171_v6 = vsub.f32 %v612_v5, %v170_v3  ;;  %v286_v3 = vld [vmem:[#allocation0 + $0x7] ss:$0 sm:$0xff] }
 0x2a1   :  { %v567_v63 = vpop.eup %566 }
 0x2a2   :  { %v158_v0 = vmul.f32 %v567_v63, %v157_v62  ;;  %v172_v7 = vmul.f32 %v567_v63, %v171_v6 }
 0x2a4   :  { %v161_v1 = vsel %vm160_vm9, %v158_v0, 0.0  ;;  %v173_v8 = vsel %vm142_vm7, %v172_v7, 0.0  ;;  %vm340_vm7 = vcmask 80968  }
 0x2a5   :  { %v162_v2 = vadd.f32 %v161_v1, %v127_v48  ;;  %v174_v12 = vadd.f32 %v173_v8, %v139_v56  ;;  %vm360_vm9 = vmand %vm340_vm7, %vm89_vm2 }
 0x2a7   :  { %163 = vst [vmem:[#allocation1] sm:$0xff] %v162_v2 }
 0x2ae   :  { %v179_v9 = vld [vmem:[#allocation1 + $0x4] ss:$0 sm:$0xff] }
 0x2af   :  { %v189_v10 = vmul.f32 %v179_v9, %v162_v2  ;;  %v182_v11 = vmul.f32 %v179_v9, %v179_v9  ;;  %v203_v13 = vmul.f32 %v179_v9, %v174_v12 }
 0x2b1   :  { %190 = vadd.xlane.f32.xlu1 %v189_v10  ;;  %183 = vadd.xlane.f32.xlu0 %v182_v11 }
 0x2b5   :  { %204 = vadd.xlane.f32.xlu0 %v203_v13 }
 0x33e   :  { %v184_v15 = vpop.xlane.xlu0 %183  ;;  %v191_v17 = vpop.xlane.xlu1 %190 }
 0x33f   :  { %v185_v16 = vsub.f32 %v181_v14, %v184_v15  ;;  %v192_v18 = vsub.f32 %v606_v4, %v191_v17  ;;  %v321_v17 = vld [vmem:[#allocation0 + $0x8] ss:$0 sm:$0xff] }
 0x341   :  { %568 = vrsqrt.f32 %v185_v16 }
 0x342   :  { %v205_v23 = vpop.xlane.xlu0 %204 }
 0x343   :  { %v206_v24 = vsub.f32 %v612_v5, %v205_v23 }
 0x34b   :  { %v569_v19 = vpop.eup %568 }
 0x34c   :  { %v193_v20 = vmul.f32 %v569_v19, %v192_v18  ;;  %v207_v25 = vmul.f32 %v569_v19, %v206_v24 }
 0x34e   :  { %v196_v21 = vsel %vm195_vm12, %v193_v20, 0.0  ;;  %v208_v26 = vsel %vm177_vm10, %v207_v25, 0.0  ;;  %vm365_vm10 = vcmask 89168   ;;  %vm390_vm12 = vcmask 97368  }
 0x34f   :  { %v197_v22 = vadd.f32 %v196_v21, %v162_v2  ;;  %v209_v30 = vadd.f32 %v208_v26, %v174_v12  ;;  %vm385_vm2 = vmand %vm365_vm10, %vm124_vm5 }
 0x350   :  { %vm410_vm5 = vmand %vm390_vm12, %vm159_vm8 }
 0x351   :  { %198 = vst [vmem:[#allocation1] sm:$0xff] %v197_v22 }
 0x358   :  { %v214_v27 = vld [vmem:[#allocation1 + $0x5] ss:$0 sm:$0xff] }
 0x359   :  { %v224_v28 = vmul.f32 %v214_v27, %v197_v22  ;;  %v217_v29 = vmul.f32 %v214_v27, %v214_v27  ;;  %v238_v31 = vmul.f32 %v214_v27, %v209_v30 }
 0x35b   :  { %225 = vadd.xlane.f32.xlu0 %v224_v28  ;;  %218 = vadd.xlane.f32.xlu1 %v217_v29  ;;  %v344_v29 = vld [vmem:[#allocation0 + $0x9] ss:$0 sm:$0xff] }
 0x35f   :  { %239 = vadd.xlane.f32.xlu1 %v238_v31 }
 0x3e8   :  { %v219_v33 = vpop.xlane.xlu1 %218  ;;  %v226_v35 = vpop.xlane.xlu0 %225 }
 0x3e9   :  { %v220_v34 = vsub.f32 %v216_v32, %v219_v33  ;;  %v227_v36 = vsub.f32 %v606_v4, %v226_v35 }
 0x3eb   :  { %570 = vrsqrt.f32 %v220_v34 }
 0x3ec   :  { %v240_v41 = vpop.xlane.xlu1 %239 }
 0x3ed   :  { %v241_v42 = vsub.f32 %v612_v5, %v240_v41  ;;  %v369_v41 = vld [vmem:[#allocation0 + $0xa] ss:$0 sm:$0xff] }
 0x3f5   :  { %v571_v37 = vpop.eup %570 }
 0x3f6   :  { %v228_v38 = vmul.f32 %v571_v37, %v227_v36  ;;  %v242_v43 = vmul.f32 %v571_v37, %v241_v42 }
 0x3f8   :  { %v231_v39 = vsel %vm230_vm15, %v228_v38, 0.0  ;;  %v243_v44 = vsel %vm212_vm13, %v242_v43, 0.0  ;;  %vm415_vm13 = vcmask 105568   ;;  %vm440_vm15 = vcmask 113768  }
 0x3f9   :  { %v232_v40 = vadd.f32 %v231_v39, %v197_v22  ;;  %v244_v48 = vadd.f32 %v243_v44, %v209_v30  ;;  %vm435_vm8 = vmand %vm415_vm13, %vm194_vm11 }
 0x3fa   :  { %vm460_vm11 = vmand %vm440_vm15, %vm229_vm14 }
 0x3fb   :  { %233 = vst [vmem:[#allocation1] sm:$0xff] %v232_v40 }
 0x402   :  { %v249_v45 = vld [vmem:[#allocation1 + $0x6] ss:$0 sm:$0xff] }
 0x403   :  { %v259_v46 = vmul.f32 %v249_v45, %v232_v40  ;;  %v252_v47 = vmul.f32 %v249_v45, %v249_v45  ;;  %v273_v49 = vmul.f32 %v249_v45, %v244_v48 }
 0x405   :  { %260 = vadd.xlane.f32.xlu1 %v259_v46  ;;  %253 = vadd.xlane.f32.xlu0 %v252_v47 }
 0x409   :  { %274 = vadd.xlane.f32.xlu0 %v273_v49 }
 0x492   :  { %v254_v51 = vpop.xlane.xlu0 %253  ;;  %v261_v53 = vpop.xlane.xlu1 %260 }
 0x493   :  { %v255_v52 = vsub.f32 %v251_v50, %v254_v51  ;;  %v262_v54 = vsub.f32 %v606_v4, %v261_v53  ;;  %v394_v53 = vld [vmem:[#allocation0 + $0xb] ss:$0 sm:$0xff] }
 0x495   :  { %572 = vrsqrt.f32 %v255_v52 }
 0x496   :  { %v275_v56 = vpop.xlane.xlu0 %274 }
 0x497   :  { %v276_v59 = vsub.f32 %v612_v5, %v275_v56 }
 0x49f   :  { %v573_v55 = vpop.eup %572 }
 0x4a0   :  { %v263_v57 = vmul.f32 %v573_v55, %v262_v54  ;;  %v277_v61 = vmul.f32 %v573_v55, %v276_v59 }
 0x4a2   :  { %v266_v58 = vsel %vm265_vm3, %v263_v57, 0.0  ;;  %v278_v62 = vsel %vm247_vm0, %v277_v61, 0.0  ;;  %vm299_vm0 = vcmask 1047559   ;;  %vm465_vm3 = vcmask 121968  }
 0x4a3   :  { %v635_v60 = vadd.f32 %v266_v58, %v232_v40  ;;  %v279_v63 = vadd.f32 %v278_v62, %v244_v48  ;;  %vm300_vm14 = vmand %vm282_vm4, %vm299_vm0 }
 0x4a5   :  { %268 = vst [vmem:[#allocation1] sm:$0xff] %v635_v60 }
 0x4ac   :  { %v638_v0 = vld [vmem:[#allocation1 + $0x7] ss:$0 sm:$0xff] }
 0x4ad   :  { %v308_v1 = vmul.f32 %v638_v0, %v279_v63  ;;  %v287_v2 = vmul.f32 %v638_v0, %v638_v0 }
 0x4af   :  { %309 = vadd.xlane.f32.xlu0 %v308_v1  ;;  %288 = vadd.xlane.f32.xlu1 %v287_v2 }
 0x53c   :  { %v289_v6 = vpop.xlane.xlu1 %288  ;;  %v310_v8 = vpop.xlane.xlu0 %309 }
 0x53d   :  { %v290_v7 = vsub.f32 %v286_v3, %v289_v6  ;;  %v311_v9 = vsub.f32 %v612_v5, %v310_v8  ;;  %v419_v3 = vld [vmem:[#allocation0 + $0xc] ss:$0 sm:$0xff] }
 0x53f   :  { %574 = vrsqrt.f32 %v290_v7 }
 0x549   :  { %v644_v10 = vpop.eup %574 }
 0x54a   :  { %v312_v11 = vmul.f32 %v644_v10, %v311_v9 }
 0x54c   :  { %v313_v12 = vsel %vm282_vm4, %v312_v11, 0.0  ;;  %vm490_vm4 = vcmask 130168  }
 0x54d   :  { %v314_v13 = vadd.f32 %v313_v12, %v279_v63 }
 0x54f   :  { %316 = vst [vmem:[#allocation1 + $0x8] sm:$0xff] %v314_v13 }
 0x556   :  { %v319_v14 = vld [vmem:[#allocation1 + $0x8] ss:$0 sm:$0xff] }
 0x557   :  { %v331_v15 = vmul.f32 %v319_v14, %v314_v13  ;;  %v322_v16 = vmul.f32 %v319_v14, %v319_v14 }
 0x559   :  { %332 = vadd.xlane.f32.xlu0 %v331_v15  ;;  %323 = vadd.xlane.f32.xlu1 %v322_v16 }
 0x5e6   :  { %v324_v18 = vpop.xlane.xlu1 %323  ;;  %v333_v20 = vpop.xlane.xlu0 %332 }
 0x5e7   :  { %v325_v19 = vsub.f32 %v321_v17, %v324_v18  ;;  %v334_v21 = vsub.f32 %v612_v5, %v333_v20  ;;  %v444_v18 = vld [vmem:[#allocation0 + $0xd] ss:$0 sm:$0xff] }
 0x5e9   :  { %576 = vrsqrt.f32 %v325_v19 }
 0x5f3   :  { %v577_v22 = vpop.eup %576 }
 0x5f4   :  { %v335_v23 = vmul.f32 %v577_v22, %v334_v21 }
 0x5f6   :  { %v336_v24 = vsel %vm317_vm6, %v335_v23, 0.0  ;;  %vm485_vm6 = vmand %vm465_vm3, %vm264_vm1 }
 0x5f7   :  { %v337_v25 = vadd.f32 %v336_v24, %v314_v13  ;;  %vm510_vm1 = vmand %vm490_vm4, %vm299_vm0 }
 0x5f9   :  { %339 = vst [vmem:[#allocation1 + $0x8] sm:$0xff] %v337_v25 }
 0x600   :  { %v342_v26 = vld [vmem:[#allocation1 + $0x9] ss:$0 sm:$0xff] }
 0x601   :  { %v354_v27 = vmul.f32 %v342_v26, %v337_v25  ;;  %v345_v28 = vmul.f32 %v342_v26, %v342_v26 }
 0x603   :  { %355 = vadd.xlane.f32.xlu0 %v354_v27  ;;  %346 = vadd.xlane.f32.xlu1 %v345_v28 }
 0x690   :  { %v347_v30 = vpop.xlane.xlu1 %346  ;;  %v356_v32 = vpop.xlane.xlu0 %355 }
 0x691   :  { %v348_v31 = vsub.f32 %v344_v29, %v347_v30  ;;  %v357_v33 = vsub.f32 %v612_v5, %v356_v32  ;;  %v294_v30 = vmul.f32 %v638_v0, %v635_v60 }
 0x693   :  { %578 = vrsqrt.f32 %v348_v31  ;;  %v469_v31 = vld [vmem:[#allocation0 + $0xe] ss:$0 sm:$0xff] }
 0x69d   :  { %v579_v34 = vpop.eup %578 }
 0x69e   :  { %v358_v35 = vmul.f32 %v579_v34, %v357_v33 }
 0x6a0   :  { %v361_v36 = vsel %vm360_vm9, %v358_v35, 0.0 }
 0x6a1   :  { %v362_v37 = vadd.f32 %v361_v36, %v337_v25 }
 0x6a3   :  { %364 = vst [vmem:[#allocation1 + $0x8] sm:$0xff] %v362_v37 }
 0x6aa   :  { %v367_v38 = vld [vmem:[#allocation1 + $0xa] ss:$0 sm:$0xff] }
 0x6ab   :  { %v379_v39 = vmul.f32 %v367_v38, %v362_v37  ;;  %v370_v40 = vmul.f32 %v367_v38, %v367_v38 }
 0x6ad   :  { %380 = vadd.xlane.f32.xlu0 %v379_v39  ;;  %371 = vadd.xlane.f32.xlu1 %v370_v40 }
 0x73a   :  { %v372_v42 = vpop.xlane.xlu1 %371  ;;  %v381_v44 = vpop.xlane.xlu0 %380 }
 0x73b   :  { %v373_v43 = vsub.f32 %v369_v41, %v372_v42  ;;  %v382_v45 = vsub.f32 %v612_v5, %v381_v44 }
 0x73d   :  { %580 = vrsqrt.f32 %v373_v43 }
 0x747   :  { %v581_v46 = vpop.eup %580 }
 0x748   :  { %v383_v47 = vmul.f32 %v581_v46, %v382_v45 }
 0x74a   :  { %v386_v48 = vsel %vm385_vm2, %v383_v47, 0.0 }
 0x74b   :  { %v387_v49 = vadd.f32 %v386_v48, %v362_v37 }
 0x74d   :  { %389 = vst [vmem:[#allocation1 + $0x8] sm:$0xff] %v387_v49 }
 0x754   :  { %v392_v50 = vld [vmem:[#allocation1 + $0xb] ss:$0 sm:$0xff] }
 0x755   :  { %v404_v51 = vmul.f32 %v392_v50, %v387_v49  ;;  %v395_v52 = vmul.f32 %v392_v50, %v392_v50 }
 0x757   :  { %405 = vadd.xlane.f32.xlu0 %v404_v51  ;;  %396 = vadd.xlane.f32.xlu1 %v395_v52 }
 0x7e4   :  { %v397_v54 = vpop.xlane.xlu1 %396  ;;  %v406_v56 = vpop.xlane.xlu0 %405 }
 0x7e5   :  { %v398_v55 = vsub.f32 %v394_v53, %v397_v54  ;;  %v407_v57 = vsub.f32 %v612_v5, %v406_v56 }
 0x7e7   :  { %582 = vrsqrt.f32 %v398_v55 }
 0x7f1   :  { %v583_v58 = vpop.eup %582 }
 0x7f2   :  { %v408_v59 = vmul.f32 %v583_v58, %v407_v57 }
 0x7f4   :  { %v411_v61 = vsel %vm410_vm5, %v408_v59, 0.0 }
 0x7f5   :  { %v412_v62 = vadd.f32 %v411_v61, %v387_v49 }
 0x7f7   :  { %414 = vst [vmem:[#allocation1 + $0x8] sm:$0xff] %v412_v62 }
 0x7fe   :  { %v417_v63 = vld [vmem:[#allocation1 + $0xc] ss:$0 sm:$0xff] }
 0x7ff   :  { %v429_v1 = vmul.f32 %v417_v63, %v412_v62  ;;  %v420_v2 = vmul.f32 %v417_v63, %v417_v63 }
 0x801   :  { %430 = vadd.xlane.f32.xlu0 %v429_v1  ;;  %421 = vadd.xlane.f32.xlu1 %v420_v2 }
 0x88e   :  { %v422_v6 = vpop.xlane.xlu1 %421  ;;  %v431_v8 = vpop.xlane.xlu0 %430 }
 0x88f   :  { %v423_v7 = vsub.f32 %v419_v3, %v422_v6  ;;  %v432_v9 = vsub.f32 %v612_v5, %v431_v8 }
 0x891   :  { %584 = vrsqrt.f32 %v423_v7 }
 0x89b   :  { %v585_v11 = vpop.eup %584 }
 0x89c   :  { %v433_v12 = vmul.f32 %v585_v11, %v432_v9 }
 0x89e   :  { %v436_v13 = vsel %vm435_vm8, %v433_v12, 0.0 }
 0x89f   :  { %v437_v14 = vadd.f32 %v436_v13, %v412_v62 }
 0x8a1   :  { %439 = vst [vmem:[#allocation1 + $0x8] sm:$0xff] %v437_v14 }
 0x8a8   :  { %v442_v15 = vld [vmem:[#allocation1 + $0xd] ss:$0 sm:$0xff] }
 0x8a9   :  { %v454_v16 = vmul.f32 %v442_v15, %v437_v14  ;;  %v445_v17 = vmul.f32 %v442_v15, %v442_v15 }
 0x8ab   :  { %455 = vadd.xlane.f32.xlu0 %v454_v16  ;;  %446 = vadd.xlane.f32.xlu1 %v445_v17 }
 0x938   :  { %v447_v19 = vpop.xlane.xlu1 %446  ;;  %v456_v21 = vpop.xlane.xlu0 %455 }
 0x939   :  { %v448_v20 = vsub.f32 %v444_v18, %v447_v19  ;;  %v457_v22 = vsub.f32 %v612_v5, %v456_v21 }
 0x93b   :  { %586 = vrsqrt.f32 %v448_v20 }
 0x945   :  { %v587_v23 = vpop.eup %586 }
 0x946   :  { %v458_v24 = vmul.f32 %v587_v23, %v457_v22 }
 0x948   :  { %v461_v25 = vsel %vm460_vm11, %v458_v24, 0.0 }
 0x949   :  { %v462_v26 = vadd.f32 %v461_v25, %v437_v14 }
 0x94b   :  { %464 = vst [vmem:[#allocation1 + $0x8] sm:$0xff] %v462_v26 }
 0x952   :  { %v467_v27 = vld [vmem:[#allocation1 + $0xe] ss:$0 sm:$0xff] }
 0x953   :  { %v479_v28 = vmul.f32 %v467_v27, %v462_v26  ;;  %v470_v29 = vmul.f32 %v467_v27, %v467_v27 }
 0x955   :  { %480 = vadd.xlane.f32.xlu0 %v479_v28  ;;  %471 = vadd.xlane.f32.xlu1 %v470_v29 }
 0x959   :  { %295 = vadd.xlane.f32.xlu0 %v294_v30 }
 0x9e2   :  { %v481_v32 = vpop.xlane.xlu0 %480  ;;  %v472_v33 = vpop.xlane.xlu1 %471 }
 0x9e3   :  { %v473_v34 = vsub.f32 %v469_v31, %v472_v33  ;;  %v482_v0 = vsub.f32 %v612_v5, %v481_v32 }
 0x9e5   :  { %588 = vrsqrt.f32 %v473_v34 }
 0x9e6   :  { %v296_v35 = vpop.xlane.xlu0 %295 }
 0x9e7   :  { %v297_v36 = vsub.f32 %v606_v4, %v296_v35 }
 0x9e9   :  { %v298_v37 = vmul.f32 %v644_v10, %v297_v36 }
 0x9eb   :  { %v301_v38 = vsel %vm300_vm14, %v298_v37, 0.0 }
 0x9ec   :  { %v302_v39 = vadd.f32 %v301_v38, %v635_v60  ;;  %v494_v60 = vld [vmem:[#allocation0 + $0xf] ss:$0 sm:$0xff] }
 0x9ee   :  { %303 = vst [vmem:[#allocation1] sm:$0xff] %v302_v39  ;;  %545 = vst [vmem:[%s677_s1] sm:$0xff] %v302_v39 }
 0x9ef   :  { %v589_v40 = vpop.eup %588 }
 0x9f0   :  { %v483_v4 = vmul.f32 %v589_v40, %v482_v0 }
 0x9f2   :  { %v486_v41 = vsel %vm485_vm6, %v483_v4, 0.0 }
 0x9f3   :  { %v487_v42 = vadd.f32 %v486_v41, %v462_v26 }
 0x9f5   :  { %489 = vst [vmem:[#allocation1 + $0x8] sm:$0xff] %v487_v42 }
 0x9fc   :  { %v492_v43 = vld [vmem:[#allocation1 + $0xf] ss:$0 sm:$0xff] }
 0x9fd   :  { %v495_v10 = vmul.f32 %v492_v43, %v492_v43  ;;  %v504_v44 = vmul.f32 %v492_v43, %v487_v42 }
 0x9ff   :  { %496 = vadd.xlane.f32.xlu1 %v495_v10 }
 0xa03   :  { %505 = vadd.xlane.f32.xlu1 %v504_v44 }
 0xa8c   :  { %v497_v45 = vpop.xlane.xlu1 %496 }
 0xa8d   :  { %v498_v46 = vsub.f32 %v494_v60, %v497_v45 }
 0xa8f   :  { %590 = vrsqrt.f32 %v498_v46 }
 0xa90   :  { %v506_v47 = vpop.xlane.xlu1 %505 }
 0xa91   :  { %v507_v48 = vsub.f32 %v612_v5, %v506_v47 }
 0xa99   :  { %v591_v49 = vpop.eup %590 }
 0xa9a   :  { %v508_v50 = vmul.f32 %v591_v49, %v507_v48 }
 0xa9c   :  { %v511_v51 = vsel %vm510_vm1, %v508_v50, 0.0 }
 0xa9d   :  { %v512_v52 = vadd.f32 %v511_v51, %v487_v42 }
 0xa9f   :  { %514 = vst [vmem:[#allocation1 + $0x8] sm:$0xff] %v512_v52  ;;  %547 = vst [vmem:[%s677_s1 + $0x8] sm:$0xff] %v512_v52 }

// kernel: custom-call.22
= control target key start
LH: loop header
LB: loop body
LE: loop exit
PB: predicated region body
PF: predicated region fallthrough
CT: control target
= control target key end

     0   :  { %v38_v0 = vlaneseq  ;;  %v331_v10 = vmov -1.0   ;;  %v332_v47 = vmov 0.0   ;;  %s434_s0 = inlined_call_operand.vmem [shape: f32[1,16,16], index: 0, kind: input, shape index: {}]   ;;  %s435_s1 = inlined_call_operand.vmem [shape: f32[1,16,16], index: 1, kind: output, shape index: {}]  }
   0x1   :  { %v33_v3 = vld [vmem:[%s434_s0 + $0x8] sm:$0xff]  ;;  %v31_v36 = vld [vmem:[%s434_s0] sm:$0xff] }
   0x2   :  { %v343_v1 = vand.u32 127, %v38_v0  ;;  %v345_v2 = vshrl.u32 %v38_v0, 7 }
   0x4   :  { %vm40_vm0 = vcmp.lt.s32.totalorder %v343_v1, 16  ;;  %v59_v4 = vadd.s32 8, %v345_v2  ;;  %vm86_vm4 = vcmp.eq.s32.totalorder %v343_v1, 15  ;;  %vm94_vm6 = vcmp.eq.s32.totalorder %v343_v1, 14 }
   0x5   :  { %v87_v11 = vsel %vm86_vm4, 1.0, %v331_v10  ;;  %vm104_vm7 = vcmp.eq.s32.totalorder %v343_v1, 13  ;;  %vm114_vm8 = vcmp.eq.s32.totalorder %v343_v1, 12  ;;  %vm124_vm9 = vcmp.eq.s32.totalorder %v343_v1, 11 }
   0x6   :  { %vm60_vm1 = vcmp.eq.s32.totalorder %v59_v4, %v343_v1  ;;  %vm65_vm2 = vcmp.le.s32.totalorder %v59_v4, %v343_v1  ;;  %vm83_vm5 = vcmp.eq.s32.totalorder %v343_v1, %v59_v4  ;;  %vm44_vm10 = vcmp.eq.s32.totalorder %v345_v2, %v343_v1 }
   0x7   :  { %v62_v5 = vsel %vm60_vm1, %v33_v3, 0.0  ;;  %vm66_vm3 = vmand %vm65_vm2, %vm40_vm0  ;;  %v88_v12 = vsel %vm83_vm5, %v87_v11, 0.0  ;;  %v46_v37 = vsel %vm44_vm10, %v31_v36, 0.0  ;;  %vm134_vm11 = vcmp.eq.s32.totalorder %v343_v1, 10 }
   0x8   :  { %v67_v6 = vsel %vm66_vm3, %v33_v3, 0.0  ;;  %63 = vadd.xlane.f32.xlu0 %v62_v5  ;;  %vm49_vm12 = vcmp.le.s32.totalorder %v345_v2, %v343_v1  ;;  %vm76_vm14 = vcmp.eq.s32.totalorder %v343_v1, %v345_v2  ;;  %vm144_vm15 = vcmp.eq.s32.totalorder %v343_v1, 9 }
   0x9   :  { %vm50_vm13 = vmand %vm49_vm12, %vm40_vm0  ;;  %v77_v48 = vsel %vm76_vm14, -1.0, %v332_v47  ;;  %vm164_vm0 = vcmp.eq.s32.totalorder %v343_v1, 7  ;;  %vm154_vm1 = vcmp.eq.s32.totalorder %v343_v1, 8  ;;  %vm178_vm2 = vcmp.eq.s32.totalorder %v343_v1, 6 }
   0xa   :  { %v51_v44 = vsel %vm50_vm13, %v31_v36, 0.0  ;;  %vm192_vm3 = vcmp.eq.s32.totalorder %v343_v1, 5  ;;  %vm206_vm4 = vcmp.eq.s32.totalorder %v343_v1, 4  ;;  %vm220_vm5 = vcmp.eq.s32.totalorder %v343_v1, 3 }
  0x95   :  { %v356_v7 = vpop.xlane.xlu0 %63 }
  0x96   :  { %327 = vrcp.f32 %v356_v7  ;;  %vm277_vm10 = vweird.f32 %v356_v7 }
  0xa0   :  { %v359_v8 = vpop.eup %327 }
  0xa1   :  { %v69_v9 = vmul.f32 %v359_v8, %v67_v6 }
  0xa3   :  { %70 = vst [vmem:[#allocation2 + $0x8] sm:$0xff] %v69_v9 }
  0xaa   :  { %v90_v13 = vld [vmem:[#allocation2 + $0xe] ss:$0 sm:$0xff]  ;;  %v100_v16 = vld [vmem:[#allocation2 + $0xd] ss:$0 sm:$0xff]  ;;  %v110_v21 = vld [vmem:[#allocation2 + $0xc] ss:$0 sm:$0xff] }
  0xab   :  { %v91_v14 = vxor.u32 2147483648, %v90_v13  ;;  %v101_v18 = vxor.u32 2147483648, %v100_v16  ;;  %v111_v23 = vxor.u32 2147483648, %v110_v21  ;;  %v120_v26 = vld [vmem:[#allocation2 + $0xb] ss:$0 sm:$0xff] }
  0xac   :  { %v121_v28 = vxor.u32 2147483648, %v120_v26  ;;  %v130_v31 = vld [vmem:[#allocation2 + $0xa] ss:$0 sm:$0xff]  ;;  %v140_v38 = vld [vmem:[#allocation2 + $0x9] ss:$0 sm:$0xff] }
  0xad   :  { %v95_v15 = vmul.f32 %v91_v14, %v88_v12  ;;  %v131_v33 = vxor.u32 2147483648, %v130_v31  ;;  %v141_v40 = vxor.u32 2147483648, %v140_v38  ;;  %v150_v52 = vld [vmem:[#allocation2 + $0x8] ss:$0 sm:$0xff] }
  0xae   :  { %v151_v54 = vxor.u32 2147483648, %v150_v52 }
  0xaf   :  { %96 = vadd.xlane.f32.xlu0 %v95_v15 }
 0x13c   :  { %v97_v17 = vpop.xlane.xlu0 %96 }
 0x13d   :  { %v98_v19 = vsel %vm94_vm6, %v97_v17, %v88_v12  ;;  %vm234_vm6 = vcmp.eq.s32.totalorder %v343_v1, 2 }
 0x13e   :  { %v105_v20 = vmul.f32 %v101_v18, %v98_v19 }
 0x140   :  { %106 = vadd.xlane.f32.xlu1 %v105_v20 }
 0x1cd   :  { %v107_v22 = vpop.xlane.xlu1 %106 }
 0x1ce   :  { %v108_v24 = vsel %vm104_vm7, %v107_v22, %v98_v19  ;;  %vm248_vm7 = vcmp.eq.s32.totalorder %v343_v1, 1 }
 0x1cf   :  { %v115_v25 = vmul.f32 %v111_v23, %v108_v24 }
 0x1d1   :  { %116 = vadd.xlane.f32.xlu1 %v115_v25 }
 0x25e   :  { %v117_v27 = vpop.xlane.xlu1 %116 }
 0x25f   :  { %v118_v29 = vsel %vm114_vm8, %v117_v27, %v108_v24  ;;  %vm261_vm8 = vcmp.eq.s32.totalorder %v343_v1, 0 }
 0x260   :  { %v125_v30 = vmul.f32 %v121_v28, %v118_v29 }
 0x262   :  { %126 = vadd.xlane.f32.xlu0 %v125_v30 }
 0x2ef   :  { %v127_v32 = vpop.xlane.xlu0 %126 }
 0x2f0   :  { %v128_v34 = vsel %vm124_vm9, %v127_v32, %v118_v29 }
 0x2f1   :  { %v135_v35 = vmul.f32 %v131_v33, %v128_v34 }
 0x2f3   :  { %136 = vadd.xlane.f32.xlu1 %v135_v35 }
 0x2f7   :  { %47 = vadd.xlane.f32.xlu1 %v46_v37 }
 0x380   :  { %v137_v39 = vpop.xlane.xlu1 %136 }
 0x381   :  { %v138_v41 = vsel %vm134_vm11, %v137_v39, %v128_v34 }
 0x382   :  { %v145_v42 = vmul.f32 %v141_v40, %v138_v41 }
 0x384   :  { %146 = vadd.xlane.f32.xlu0 %v145_v42  ;;  %v374_v43 = vpop.xlane.xlu1 %47 }
 0x385   :  { %329 = vrcp.f32 %v374_v43  ;;  %vm272_vm9 = vweird.f32 %v374_v43 }
 0x38f   :  { %v381_v45 = vpop.eup %329 }
 0x390   :  { %v53_v46 = vmul.f32 %v381_v45, %v51_v44 }
 0x392   :  { %54 = vst [vmem:[#allocation2] sm:$0xff] %v53_v46 }
 0x399   :  { %v160_v49 = vld [vmem:[#allocation2 + $0x7] ss:$0 sm:$0xff]  ;;  %v174_v57 = vld [vmem:[#allocation2 + $0x6] ss:$0 sm:$0xff]  ;;  %v188_v2 = vld [vmem:[#allocation2 + $0x5] ss:$0 sm:$0xff] }
 0x39a   :  { %v161_v50 = vxor.u32 2147483648, %v160_v49  ;;  %v175_v58 = vxor.u32 2147483648, %v174_v57  ;;  %v189_v4 = vxor.u32 2147483648, %v188_v2  ;;  %v202_v12 = vld [vmem:[#allocation2 + $0x4] ss:$0 sm:$0xff] }
 0x39b   :  { %v203_v14 = vxor.u32 2147483648, %v202_v12  ;;  %v216_v20 = vld [vmem:[#allocation2 + $0x3] ss:$0 sm:$0xff]  ;;  %v230_v28 = vld [vmem:[#allocation2 + $0x2] ss:$0 sm:$0xff] }
 0x39c   :  { %v165_v51 = vmul.f32 %v161_v50, %v77_v48  ;;  %v217_v22 = vxor.u32 2147483648, %v216_v20  ;;  %v231_v30 = vxor.u32 2147483648, %v230_v28  ;;  %v244_v36 = vld [vmem:[#allocation2 + $0x1] ss:$0 sm:$0xff]  ;;  %v257_v46 = vld [vmem:[#allocation2] ss:$0 sm:$0xff] }
 0x39d   :  { %v245_v38 = vxor.u32 2147483648, %v244_v36 }
 0x39e   :  { %166 = vadd.xlane.f32.xlu1 %v165_v51 }
 0x411   :  { %v147_v53 = vpop.xlane.xlu0 %146 }
 0x412   :  { %v148_v55 = vsel %vm144_vm15, %v147_v53, %v138_v41 }
 0x413   :  { %v155_v56 = vmul.f32 %v151_v54, %v148_v55 }
 0x415   :  { %156 = vadd.xlane.f32.xlu0 %v155_v56 }
 0x42b   :  { %v167_v59 = vpop.xlane.xlu1 %166 }
 0x42c   :  { %v168_v60 = vsel %vm164_vm0, %v167_v59, %v77_v48  ;;  %v258_v48 = vxor.u32 2147483648, %v257_v46 }
 0x42d   :  { %v179_v61 = vmul.f32 %v175_v58, %v168_v60 }
 0x42f   :  { %180 = vadd.xlane.f32.xlu1 %v179_v61 }
 0x4a2   :  { %v157_v62 = vpop.xlane.xlu0 %156 }
 0x4a3   :  { %v158_v63 = vsel %vm154_vm1, %v157_v62, %v148_v55 }
 0x4a4   :  { %v169_v0 = vmul.f32 %v161_v50, %v158_v63 }
 0x4a6   :  { %170 = vadd.xlane.f32.xlu0 %v169_v0 }
 0x4bc   :  { %v181_v3 = vpop.xlane.xlu1 %180 }
 0x4bd   :  { %v182_v5 = vsel %vm178_vm2, %v181_v3, %v168_v60 }
 0x4be   :  { %v193_v6 = vmul.f32 %v189_v4, %v182_v5 }
 0x4c0   :  { %194 = vadd.xlane.f32.xlu1 %v193_v6 }
 0x533   :  { %v171_v9 = vpop.xlane.xlu0 %170 }
 0x534   :  { %v172_v10 = vsel %vm164_vm0, %v171_v9, %v158_v63 }
 0x535   :  { %v183_v11 = vmul.f32 %v175_v58, %v172_v10 }
 0x537   :  { %184 = vadd.xlane.f32.xlu0 %v183_v11 }
 0x54d   :  { %v195_v13 = vpop.xlane.xlu1 %194 }
 0x54e   :  { %v196_v15 = vsel %vm192_vm3, %v195_v13, %v182_v5 }
 0x54f   :  { %v207_v16 = vmul.f32 %v203_v14, %v196_v15 }
 0x551   :  { %208 = vadd.xlane.f32.xlu1 %v207_v16 }
 0x5c4   :  { %v185_v17 = vpop.xlane.xlu0 %184 }
 0x5c5   :  { %v186_v18 = vsel %vm178_vm2, %v185_v17, %v172_v10 }
 0x5c6   :  { %v197_v19 = vmul.f32 %v189_v4, %v186_v18 }
 0x5c8   :  { %198 = vadd.xlane.f32.xlu0 %v197_v19 }
 0x5de   :  { %v209_v21 = vpop.xlane.xlu1 %208 }
 0x5df   :  { %v210_v23 = vsel %vm206_vm4, %v209_v21, %v196_v15 }
 0x5e0   :  { %v221_v24 = vmul.f32 %v217_v22, %v210_v23 }
 0x5e2   :  { %222 = vadd.xlane.f32.xlu1 %v221_v24 }
 0x655   :  { %v199_v25 = vpop.xlane.xlu0 %198 }
 0x656   :  { %v200_v26 = vsel %vm192_vm3, %v199_v25, %v186_v18 }
 0x657   :  { %v211_v27 = vmul.f32 %v203_v14, %v200_v26 }
 0x659   :  { %212 = vadd.xlane.f32.xlu0 %v211_v27 }
 0x66f   :  { %v223_v29 = vpop.xlane.xlu1 %222 }
 0x670   :  { %v224_v31 = vsel %vm220_vm5, %v223_v29, %v210_v23 }
 0x671   :  { %v235_v32 = vmul.f32 %v231_v30, %v224_v31 }
 0x673   :  { %236 = vadd.xlane.f32.xlu1 %v235_v32 }
 0x6e6   :  { %v213_v33 = vpop.xlane.xlu0 %212 }
 0x6e7   :  { %v214_v34 = vsel %vm206_vm4, %v213_v33, %v200_v26 }
 0x6e8   :  { %v225_v35 = vmul.f32 %v217_v22, %v214_v34 }
 0x6ea   :  { %226 = vadd.xlane.f32.xlu0 %v225_v35 }
 0x700   :  { %v237_v37 = vpop.xlane.xlu1 %236 }
 0x701   :  { %v238_v39 = vsel %vm234_vm6, %v237_v37, %v224_v31 }
 0x702   :  { %v249_v40 = vmul.f32 %v245_v38, %v238_v39 }
 0x704   :  { %250 = vadd.xlane.f32.xlu1 %v249_v40 }
 0x777   :  { %v227_v41 = vpop.xlane.xlu0 %226 }
 0x778   :  { %v228_v42 = vsel %vm220_vm5, %v227_v41, %v214_v34 }
 0x779   :  { %v239_v44 = vmul.f32 %v231_v30, %v228_v42 }
 0x77b   :  { %240 = vadd.xlane.f32.xlu0 %v239_v44 }
 0x791   :  { %v251_v47 = vpop.xlane.xlu1 %250 }
 0x792   :  { %v252_v49 = vsel %vm248_vm7, %v251_v47, %v238_v39 }
 0x793   :  { %v262_v50 = vmul.f32 %v258_v48, %v252_v49 }
 0x795   :  { %263 = vadd.xlane.f32.xlu1 %v262_v50 }
 0x808   :  { %v241_v51 = vpop.xlane.xlu0 %240 }
 0x809   :  { %v242_v52 = vsel %vm234_vm6, %v241_v51, %v228_v42 }
 0x80a   :  { %v253_v53 = vmul.f32 %v245_v38, %v242_v52 }
 0x80c   :  { %254 = vadd.xlane.f32.xlu0 %v253_v53 }
 0x822   :  { %v264_v54 = vpop.xlane.xlu1 %263 }
 0x823   :  { %v265_v55 = vsel %vm261_vm8, %v264_v54, %v252_v49 }
 0x824   :  { %v271_v56 = vmul.f32 %v381_v45, %v265_v55 }
 0x826   :  { %v273_v57 = vsel %vm272_vm9, %v265_v55, %v271_v56 }
 0x827   :  { %311 = vst [vmem:[%s435_s1] sm:$0xff] %v273_v57 }
 0x899   :  { %v255_v58 = vpop.xlane.xlu0 %254 }
 0x89a   :  { %v256_v59 = vsel %vm248_vm7, %v255_v58, %v242_v52 }
 0x89b   :  { %v266_v60 = vmul.f32 %v258_v48, %v256_v59 }
 0x89d   :  { %267 = vadd.xlane.f32.xlu0 %v266_v60 }
 0x92a   :  { %v268_v61 = vpop.xlane.xlu0 %267 }
 0x92b   :  { %v269_v62 = vsel %vm261_vm8, %v268_v61, %v256_v59 }
 0x92c   :  { %v276_v63 = vmul.f32 %v359_v8, %v269_v62 }
 0x92e   :  { %v278_v45 = vsel %vm277_vm10, %v269_v62, %v276_v63 }
 0x92f   :  { %313 = vst [vmem:[%s435_s1 + $0x8] sm:$0xff] %v278_v45 }

</bundles_post_ra>
